<compile_context>
chip_gen: v6e
topology: v6e:2x2x1
jax: 0.10.0
libtpu: 0.0.40
codegen_flags: <defaults>
</compile_context>

<pallas_src>
import functools

import jax
import jax.numpy as jnp
from jax.experimental import pallas as pl
from jax.experimental.pallas import tpu as pltpu

LANE = 128


def _round_up(x, m):
    return (x + m - 1) // m * m


def _vmem_capacity_bytes():
    try:
        return int(pltpu.get_tpu_info().vmem_capacity_bytes)
    except Exception:
        return 64 * 1024 * 1024  # conservative default (v7x per-TensorCore)


def _pick_tiles(cin_p, cout_p, H, W, in_itemsize, out_itemsize, vmem_cap):
    """VMEM-aware channel-tile selection (tiles are multiples of 128)."""
    max_tile = 256 if vmem_cap <= 64 * 1024 * 1024 else 512
    budget = int(vmem_cap * 0.55)
    cands = [t for t in (512, 384, 256, 128) if t <= max_tile]

    def vmem_use(tck, tcn):
        acc = H * W * tcn * 4                                   # f32 accumulator
        x_db = 2 * (H + 2) * (W + 2) * tck * in_itemsize        # input double-buffer
        w_db = 2 * 9 * tck * tcn * in_itemsize                  # weight double-buffer
        o_db = 2 * (H + 2) * (W + 2) * tcn * out_itemsize       # output double-buffer
        return acc + x_db + w_db + o_db + 64 * 1024

    for tcn in cands:
        if cout_p % tcn:
            continue
        for tck in cands:
            if cin_p % tck:
                continue
            if vmem_use(tck, tcn) <= budget:
                return tck, tcn
    # TODO(synk): spatial row tiling instead of falling back to minimal tiles.
    return 128, 128


def _conv3x3_kernel(x_ref, w_ref, b_ref, o_ref, acc_ref, *,
                    H, W, apply_relu, pad_output):
    # x_ref:   (H+2, W+2, tck)   spatially padded bf16 input tile (batch squeezed)
    # w_ref:   (3, 3, tck, tcn)  bf16 HWIO weight tile
    # b_ref:   (1, tcn)          f32 bias tile
    # o_ref:   (H, W, tcn) or (H+2, W+2, tcn) when pad_output
    # acc_ref: (H*W, tcn) f32 scratch, carried across the Cin (k) grid axis.
    #
    # NOTE: the accumulator carried in acc_ref is only correct because the Cin
    # (k) axis is the innermost, "arbitrary" grid axis.
    k = pl.program_id(2)

    @pl.when(k == 0)
    def _():
        acc_ref[...] = jnp.zeros_like(acc_ref)

    acc = acc_ref[...]
    # Hoist the sublane-shifting width (dx) slice out of the dy loop: 3
    # relayout copies per k-step instead of 9; the dy shift is then a plain
    # row slice of the flattened column (8-aligned when W % 8 == 0).
    for dx in range(3):
        col = x_ref[:, dx:dx + W, :].reshape((H + 2) * W, -1)
        for dy in range(3):
            patch = col[dy * W:dy * W + H * W]
            acc += jnp.dot(patch, w_ref[dy, dx],
                           preferred_element_type=jnp.float32)
    acc_ref[...] = acc

    @pl.when(k == pl.num_programs(2) - 1)
    def _():
        out = acc_ref[...] + b_ref[...]
        if apply_relu:
            out = jnp.maximum(out, 0.0)
        out = out.reshape(H, W, -1).astype(o_ref.dtype)
        if pad_output:
            # Emit a spatially pre-padded activation: zero halo via one
            # lane-dense full-block store, then fill the interior.
            o_ref[...] = jnp.zeros_like(o_ref)
            o_ref[1:H + 1, 1:W + 1, :] = out
        else:
            o_ref[...] = out


def _conv3x3_nhwc(x_p, weight, bias, *, apply_relu, pad_output, out_dtype):
    """3x3 conv, stride 1, on a spatially pre-padded NHWC input.

    x_p:    (N, H+2, W+2, Cin_p)  bf16, Cin_p multiple of 128
    weight: (3, 3, Cin_p, Cout_p) bf16
    bias:   (1, Cout_p)           f32
    returns (N, H, W, Cout_p), or (N, H+2, W+2, Cout_p) with a zero halo
    when pad_output=True (so the next conv needs no wrapper jnp.pad).
    """
    N, Hp2, Wp2, cin = x_p.shape
    H, W = Hp2 - 2, Wp2 - 2
    cout = weight.shape[-1]

    out_itemsize = jnp.dtype(out_dtype).itemsize
    vmem_cap = _vmem_capacity_bytes()
    tck, tcn = _pick_tiles(cin, cout, H, W, x_p.dtype.itemsize, out_itemsize,
                           vmem_cap)
    grid = (N, cout // tcn, cin // tck)

    if pad_output:
        out_sd = jax.ShapeDtypeStruct((N, Hp2, Wp2, cout), out_dtype)
        out_spec = pl.BlockSpec((None, Hp2, Wp2, tcn),
                                lambda n, j, k: (n, 0, 0, j))
        out_elems = N * Hp2 * Wp2 * cout
    else:
        out_sd = jax.ShapeDtypeStruct((N, H, W, cout), out_dtype)
        out_spec = pl.BlockSpec((None, H, W, tcn),
                                lambda n, j, k: (n, 0, 0, j))
        out_elems = N * H * W * cout

    kernel = functools.partial(_conv3x3_kernel, H=H, W=W,
                               apply_relu=apply_relu, pad_output=pad_output)

    flops = 2 * N * H * W * 9 * cin * cout
    bytes_accessed = (x_p.size * x_p.dtype.itemsize
                      + weight.size * weight.dtype.itemsize
                      + bias.size * bias.dtype.itemsize
                      + out_elems * out_itemsize)

    vmem_limit = (40 * 1024 * 1024 if vmem_cap <= 64 * 1024 * 1024
                  else 96 * 1024 * 1024)

    return pl.pallas_call(
        kernel,
        out_shape=out_sd,
        grid_spec=pltpu.PrefetchScalarGridSpec(
            num_scalar_prefetch=0,
            grid=grid,
            in_specs=[
                pl.BlockSpec((None, Hp2, Wp2, tck),
                             lambda n, j, k: (n, 0, 0, k)),
                pl.BlockSpec((3, 3, tck, tcn),
                             lambda n, j, k: (0, 0, k, j)),
                pl.BlockSpec((1, tcn),
                             lambda n, j, k: (0, j)),
            ],
            out_specs=out_spec,
            scratch_shapes=[pltpu.VMEM((H * W, tcn), jnp.float32)],
        ),
        compiler_params=pltpu.CompilerParams(
            dimension_semantics=("parallel", "parallel", "arbitrary"),
            vmem_limit_bytes=vmem_limit,
        ),
        cost_estimate=pl.CostEstimate(
            flops=flops, transcendentals=0, bytes_accessed=bytes_accessed),
    )(x_p, weight, bias)


def conv_basic_block_forward(x, w1, b1, w2, b2, dropout_rate=0.0):
    """Pallas implementation of ConvBasicBlock.forward (inference / dropout=0).

    x:  (N, inplanes, H, W)             -- NCHW, same as PyTorch
    w1: (planes, inplanes, 3, 3), b1: (planes,)
    w2: (inplanes, planes, 3, 3), b2: (inplanes,)
    """
    if dropout_rate != 0.0:
        # TODO(synk): in-kernel stochastic dropout (pltpu.prng_*) not implemented.
        raise NotImplementedError("training-mode dropout (p>0) not supported")

    N, cin, H, W = x.shape
    planes = w1.shape[0]
    cin_p = _round_up(cin, LANE)
    planes_p = _round_up(planes, LANE)

    # Single data-prep pass on x: NCHW -> NHWC, bf16 cast, and ONE jnp.pad
    # doing both the spatial halo and the lane-dense channel padding.
    x_nhwc = jnp.transpose(x, (0, 2, 3, 1)).astype(jnp.bfloat16)
    x_p = jnp.pad(x_nhwc, ((0, 0), (1, 1), (1, 1), (0, cin_p - cin)))

    def prep_w(w, cin_pad, cout_pad):
        cout_w, cin_w = w.shape[0], w.shape[1]
        w = jnp.transpose(w, (2, 3, 1, 0)).astype(jnp.bfloat16)  # OIHW -> HWIO
        return jnp.pad(w, ((0, 0), (0, 0),
                           (0, cin_pad - cin_w), (0, cout_pad - cout_w)))

    def prep_b(b, cout_pad):
        return jnp.pad(b.astype(jnp.float32),
                       (0, cout_pad - b.shape[0])).reshape(1, cout_pad)

    w1p, b1p = prep_w(w1, cin_p, planes_p), prep_b(b1, planes_p)
    w2p, b2p = prep_w(w2, planes_p, cin_p), prep_b(b2, cin_p)

    # conv1 + bias + ReLU fused; writes a spatially pre-padded bf16 activation
    # so conv2 consumes it directly (no intermediate HBM pad round trip).
    h_p = _conv3x3_nhwc(x_p, w1p, b1p, apply_relu=True,
                        pad_output=True, out_dtype=jnp.bfloat16)
    y = _conv3x3_nhwc(h_p, w2p, b2p, apply_relu=False,
                      pad_output=False, out_dtype=jnp.float32)

    y = y[..., :cin]
    return jnp.transpose(y, (0, 3, 1, 2))  # back to NCHW


if __name__ == "__main__":
    # Small synthetic config: batch=2, inplanes=4, planes=8, spatial 16x16.
    N, cin, H, W = 2, 4, 16, 16
    planes = 8

    key = jax.random.PRNGKey(0)
    kx, kw1, kb1, kw2, kb2 = jax.random.split(key, 5)

    x = jax.random.normal(kx, (N, cin, H, W), dtype=jnp.float32)

    bound1 = 1.0 / ((cin * 9) ** 0.5)
    w1 = jax.random.uniform(kw1, (planes, cin, 3, 3), jnp.float32, -bound1, bound1)
    b1 = jax.random.uniform(kb1, (planes,), jnp.float32, -bound1, bound1)

    bound2 = 1.0 / ((planes * 9) ** 0.5)
    w2 = jax.random.uniform(kw2, (cin, planes, 3, 3), jnp.float32, -bound2, bound2)
    b2 = jax.random.uniform(kb2, (cin,), jnp.float32, -bound2, bound2)

    y = conv_basic_block_forward(x, w1, b1, w2, b2)
    jax.block_until_ready(y)

    # Pure-JAX reference mirroring the kernel numerics: bf16 inputs/activations,
    # f32 accumulation, f32 bias + ReLU (PyTorch f32 semantics up to bf16 cast).
    def ref_conv(a_bf16, w, b_f32):
        out = jax.lax.conv_general_dilated(
            a_bf16, w.astype(jnp.bfloat16),
            window_strides=(1, 1), padding=((1, 1), (1, 1)),
            dimension_numbers=("NCHW", "OIHW", "NCHW"),
            preferred_element_type=jnp.float32,
            precision=jax.lax.Precision.HIGHEST)
        return out + b_f32.reshape(1, -1, 1, 1)

    ref = ref_conv(x.astype(jnp.bfloat16), w1, b1)
    ref = jnp.maximum(ref, 0.0).astype(jnp.bfloat16)
    ref = ref_conv(ref, w2, b2)

    assert y.shape == (N, cin, H, W)
    assert y.dtype == jnp.float32
    assert jnp.allclose(y, ref, atol=2e-2, rtol=2e-2), "mismatch vs reference conv block"

    print("KERNEL_OK")
</pallas_src>

<mosaic_0001>
module attributes {stable_mosaic.version = 11 : i64} {
  func.func @_conv3x3_kernel(%arg0: i32, %arg1: i32, %arg2: i32, %arg3: memref<1x18x18x128xbf16, #tpu.memory_space<vmem>>, %arg4: memref<3x3x128x128xbf16, #tpu.memory_space<vmem>>, %arg5: memref<1x128xf32, #tpu.memory_space<vmem>>, %arg6: memref<1x18x18x128xbf16, #tpu.memory_space<vmem>>, %arg7: memref<256x128xf32, #tpu.memory_space<vmem>>) attributes {dimension_semantics = [#tpu.dimension_semantics<parallel>, #tpu.dimension_semantics<parallel>, #tpu.dimension_semantics<arbitrary>], iteration_bounds = array<i64: 2, 1, 1>, scalar_prefetch = 0 : i64, scratch_operands = 1 : i64, tpu.core_type = #tpu.core_type<tc>, window_params = [{transform_indices = @transform_0, window_bounds = array<i64: 1, 18, 18, 128>}, {transform_indices = @transform_1, window_bounds = array<i64: 3, 3, 128, 128>}, {transform_indices = @transform_2, window_bounds = array<i64: 1, 128>}, {transform_indices = @transform_3, window_bounds = array<i64: 1, 18, 18, 128>}]} {
    %c0_i32 = arith.constant 0 : i32
    %0 = arith.cmpi eq, %arg2, %c0_i32 : i32
    %1 = arith.extui %0 : i1 to i32
    %c0_i32_0 = arith.constant 0 : i32
    %2 = arith.cmpi ne, %1, %c0_i32_0 : i32
    scf.if %2 {
      %cst_60 = arith.constant 0.000000e+00 : f32
      %62 = vector.broadcast %cst_60 : f32 to vector<256x128xf32>
      %c0_61 = arith.constant 0 : index
      %c0_62 = arith.constant 0 : index
      %63 = vector.load %arg7[%c0_61, %c0_62] : memref<256x128xf32, #tpu.memory_space<vmem>>, vector<256x128xf32>
      tpu.vector_store %arg7[%c0_61, %c0_62], %62 {strides = array<i32>} : memref<256x128xf32, #tpu.memory_space<vmem>>, vector<256x128xf32>,
    } else {
    }
    %c0 = arith.constant 0 : index
    %c0_1 = arith.constant 0 : index
    %3 = vector.load %arg7[%c0, %c0_1] : memref<256x128xf32, #tpu.memory_space<vmem>>, vector<256x128xf32>
    %c0_2 = arith.constant 0 : index
    %c0_3 = arith.constant 0 : index
    %c0_4 = arith.constant 0 : index
    %c0_5 = arith.constant 0 : index
    %4 = vector.load %arg3[%c0_2, %c0_3, %c0_4, %c0_5] : memref<1x18x18x128xbf16, #tpu.memory_space<vmem>>, vector<1x18x16x128xbf16>
    %5 = vector.shape_cast %4 : vector<1x18x16x128xbf16> to vector<18x16x128xbf16>
    %6 = vector.shape_cast %5 : vector<18x16x128xbf16> to vector<288x128xbf16>
    %7 = vector.extract_strided_slice %6 {offsets = [0, 0], sizes = [256, 128], strides = [1, 1]} : vector<288x128xbf16> to vector<256x128xbf16>
    %c0_6 = arith.constant 0 : index
    %c0_7 = arith.constant 0 : index
    %c0_8 = arith.constant 0 : index
    %c0_9 = arith.constant 0 : index
    %8 = vector.load %arg4[%c0_6, %c0_7, %c0_8, %c0_9] : memref<3x3x128x128xbf16, #tpu.memory_space<vmem>>, vector<1x1x128x128xbf16>
    %9 = vector.shape_cast %8 : vector<1x1x128x128xbf16> to vector<128x128xbf16>
    %cst = arith.constant dense<0.000000e+00> : vector<256x128xf32>
    %10 = tpu.matmul %7, %9, %cst {dimension_numbers = #tpu.dot_dimension_numbers<[1], [0], [0], [1], [0, 0, 1, 1], [], []>} : vector<256x128xbf16>, vector<128x128xbf16>, vector<256x128xf32> -> vector<256x128xf32>
    %11 = arith.addf %3, %10 : vector<256x128xf32>
    %12 = vector.extract_strided_slice %6 {offsets = [16, 0], sizes = [256, 128], strides = [1, 1]} : vector<288x128xbf16> to vector<256x128xbf16>
    %c1 = arith.constant 1 : index
    %c0_10 = arith.constant 0 : index
    %c0_11 = arith.constant 0 : index
    %c0_12 = arith.constant 0 : index
    %13 = vector.load %arg4[%c1, %c0_10, %c0_11, %c0_12] : memref<3x3x128x128xbf16, #tpu.memory_space<vmem>>, vector<1x1x128x128xbf16>
    %14 = vector.shape_cast %13 : vector<1x1x128x128xbf16> to vector<128x128xbf16>
    %cst_13 = arith.constant dense<0.000000e+00> : vector<256x128xf32>
    %15 = tpu.matmul %12, %14, %cst_13 {dimension_numbers = #tpu.dot_dimension_numbers<[1], [0], [0], [1], [0, 0, 1, 1], [], []>} : vector<256x128xbf16>, vector<128x128xbf16>, vector<256x128xf32> -> vector<256x128xf32>
    %16 = arith.addf %11, %15 : vector<256x128xf32>
    %17 = vector.extract_strided_slice %6 {offsets = [32, 0], sizes = [256, 128], strides = [1, 1]} : vector<288x128xbf16> to vector<256x128xbf16>
    %c2 = arith.constant 2 : index
    %c0_14 = arith.constant 0 : index
    %c0_15 = arith.constant 0 : index
    %c0_16 = arith.constant 0 : index
    %18 = vector.load %arg4[%c2, %c0_14, %c0_15, %c0_16] : memref<3x3x128x128xbf16, #tpu.memory_space<vmem>>, vector<1x1x128x128xbf16>
    %19 = vector.shape_cast %18 : vector<1x1x128x128xbf16> to vector<128x128xbf16>
    %cst_17 = arith.constant dense<0.000000e+00> : vector<256x128xf32>
    %20 = tpu.matmul %17, %19, %cst_17 {dimension_numbers = #tpu.dot_dimension_numbers<[1], [0], [0], [1], [0, 0, 1, 1], [], []>} : vector<256x128xbf16>, vector<128x128xbf16>, vector<256x128xf32> -> vector<256x128xf32>
    %21 = arith.addf %16, %20 : vector<256x128xf32>
    %c0_18 = arith.constant 0 : index
    %c0_19 = arith.constant 0 : index
    %c1_20 = arith.constant 1 : index
    %c0_21 = arith.constant 0 : index
    %22 = vector.load %arg3[%c0_18, %c0_19, %c1_20, %c0_21] : memref<1x18x18x128xbf16, #tpu.memory_space<vmem>>, vector<1x18x16x128xbf16>
    %23 = vector.shape_cast %22 : vector<1x18x16x128xbf16> to vector<18x16x128xbf16>
    %24 = vector.shape_cast %23 : vector<18x16x128xbf16> to vector<288x128xbf16>
    %25 = vector.extract_strided_slice %24 {offsets = [0, 0], sizes = [256, 128], strides = [1, 1]} : vector<288x128xbf16> to vector<256x128xbf16>
    %c0_22 = arith.constant 0 : index
    %c1_23 = arith.constant 1 : index
    %c0_24 = arith.constant 0 : index
    %c0_25 = arith.constant 0 : index
    %26 = vector.load %arg4[%c0_22, %c1_23, %c0_24, %c0_25] : memref<3x3x128x128xbf16, #tpu.memory_space<vmem>>, vector<1x1x128x128xbf16>
    %27 = vector.shape_cast %26 : vector<1x1x128x128xbf16> to vector<128x128xbf16>
    %cst_26 = arith.constant dense<0.000000e+00> : vector<256x128xf32>
    %28 = tpu.matmul %25, %27, %cst_26 {dimension_numbers = #tpu.dot_dimension_numbers<[1], [0], [0], [1], [0, 0, 1, 1], [], []>} : vector<256x128xbf16>, vector<128x128xbf16>, vector<256x128xf32> -> vector<256x128xf32>
    %29 = arith.addf %21, %28 : vector<256x128xf32>
    %30 = vector.extract_strided_slice %24 {offsets = [16, 0], sizes = [256, 128], strides = [1, 1]} : vector<288x128xbf16> to vector<256x128xbf16>
    %c1_27 = arith.constant 1 : index
    %c1_28 = arith.constant 1 : index
    %c0_29 = arith.constant 0 : index
    %c0_30 = arith.constant 0 : index
    %31 = vector.load %arg4[%c1_27, %c1_28, %c0_29, %c0_30] : memref<3x3x128x128xbf16, #tpu.memory_space<vmem>>, vector<1x1x128x128xbf16>
    %32 = vector.shape_cast %31 : vector<1x1x128x128xbf16> to vector<128x128xbf16>
    %cst_31 = arith.constant dense<0.000000e+00> : vector<256x128xf32>
    %33 = tpu.matmul %30, %32, %cst_31 {dimension_numbers = #tpu.dot_dimension_numbers<[1], [0], [0], [1], [0, 0, 1, 1], [], []>} : vector<256x128xbf16>, vector<128x128xbf16>, vector<256x128xf32> -> vector<256x128xf32>
    %34 = arith.addf %29, %33 : vector<256x128xf32>
    %35 = vector.extract_strided_slice %24 {offsets = [32, 0], sizes = [256, 128], strides = [1, 1]} : vector<288x128xbf16> to vector<256x128xbf16>
    %c2_32 = arith.constant 2 : index
    %c1_33 = arith.constant 1 : index
    %c0_34 = arith.constant 0 : index
    %c0_35 = arith.constant 0 : index
    %36 = vector.load %arg4[%c2_32, %c1_33, %c0_34, %c0_35] : memref<3x3x128x128xbf16, #tpu.memory_space<vmem>>, vector<1x1x128x128xbf16>
    %37 = vector.shape_cast %36 : vector<1x1x128x128xbf16> to vector<128x128xbf16>
    %cst_36 = arith.constant dense<0.000000e+00> : vector<256x128xf32>
    %38 = tpu.matmul %35, %37, %cst_36 {dimension_numbers = #tpu.dot_dimension_numbers<[1], [0], [0], [1], [0, 0, 1, 1], [], []>} : vector<256x128xbf16>, vector<128x128xbf16>, vector<256x128xf32> -> vector<256x128xf32>
    %39 = arith.addf %34, %38 : vector<256x128xf32>
    %c0_37 = arith.constant 0 : index
    %c0_38 = arith.constant 0 : index
    %c2_39 = arith.constant 2 : index
    %c0_40 = arith.constant 0 : index
    %40 = vector.load %arg3[%c0_37, %c0_38, %c2_39, %c0_40] : memref<1x18x18x128xbf16, #tpu.memory_space<vmem>>, vector<1x18x16x128xbf16>
    %41 = vector.shape_cast %40 : vector<1x18x16x128xbf16> to vector<18x16x128xbf16>
    %42 = vector.shape_cast %41 : vector<18x16x128xbf16> to vector<288x128xbf16>
    %43 = vector.extract_strided_slice %42 {offsets = [0, 0], sizes = [256, 128], strides = [1, 1]} : vector<288x128xbf16> to vector<256x128xbf16>
    %c0_41 = arith.constant 0 : index
    %c2_42 = arith.constant 2 : index
    %c0_43 = arith.constant 0 : index
    %c0_44 = arith.constant 0 : index
    %44 = vector.load %arg4[%c0_41, %c2_42, %c0_43, %c0_44] : memref<3x3x128x128xbf16, #tpu.memory_space<vmem>>, vector<1x1x128x128xbf16>
    %45 = vector.shape_cast %44 : vector<1x1x128x128xbf16> to vector<128x128xbf16>
    %cst_45 = arith.constant dense<0.000000e+00> : vector<256x128xf32>
    %46 = tpu.matmul %43, %45, %cst_45 {dimension_numbers = #tpu.dot_dimension_numbers<[1], [0], [0], [1], [0, 0, 1, 1], [], []>} : vector<256x128xbf16>, vector<128x128xbf16>, vector<256x128xf32> -> vector<256x128xf32>
    %47 = arith.addf %39, %46 : vector<256x128xf32>
    %48 = vector.extract_strided_slice %42 {offsets = [16, 0], sizes = [256, 128], strides = [1, 1]} : vector<288x128xbf16> to vector<256x128xbf16>
    %c1_46 = arith.constant 1 : index
    %c2_47 = arith.constant 2 : index
    %c0_48 = arith.constant 0 : index
    %c0_49 = arith.constant 0 : index
    %49 = vector.load %arg4[%c1_46, %c2_47, %c0_48, %c0_49] : memref<3x3x128x128xbf16, #tpu.memory_space<vmem>>, vector<1x1x128x128xbf16>
    %50 = vector.shape_cast %49 : vector<1x1x128x128xbf16> to vector<128x128xbf16>
    %cst_50 = arith.constant dense<0.000000e+00> : vector<256x128xf32>
    %51 = tpu.matmul %48, %50, %cst_50 {dimension_numbers = #tpu.dot_dimension_numbers<[1], [0], [0], [1], [0, 0, 1, 1], [], []>} : vector<256x128xbf16>, vector<128x128xbf16>, vector<256x128xf32> -> vector<256x128xf32>
    %52 = arith.addf %47, %51 : vector<256x128xf32>
    %53 = vector.extract_strided_slice %42 {offsets = [32, 0], sizes = [256, 128], strides = [1, 1]} : vector<288x128xbf16> to vector<256x128xbf16>
    %c2_51 = arith.constant 2 : index
    %c2_52 = arith.constant 2 : index
    %c0_53 = arith.constant 0 : index
    %c0_54 = arith.constant 0 : index
    %54 = vector.load %arg4[%c2_51, %c2_52, %c0_53, %c0_54] : memref<3x3x128x128xbf16, #tpu.memory_space<vmem>>, vector<1x1x128x128xbf16>
    %55 = vector.shape_cast %54 : vector<1x1x128x128xbf16> to vector<128x128xbf16>
    %cst_55 = arith.constant dense<0.000000e+00> : vector<256x128xf32>
    %56 = tpu.matmul %53, %55, %cst_55 {dimension_numbers = #tpu.dot_dimension_numbers<[1], [0], [0], [1], [0, 0, 1, 1], [], []>} : vector<256x128xbf16>, vector<128x128xbf16>, vector<256x128xf32> -> vector<256x128xf32>
    %57 = arith.addf %52, %56 : vector<256x128xf32>
    %c0_56 = arith.constant 0 : index
    %c0_57 = arith.constant 0 : index
    %58 = vector.load %arg7[%c0_56, %c0_57] : memref<256x128xf32, #tpu.memory_space<vmem>>, vector<256x128xf32>
    tpu.vector_store %arg7[%c0_56, %c0_57], %57 {strides = array<i32>} : memref<256x128xf32, #tpu.memory_space<vmem>>, vector<256x128xf32>,
    %c0_i32_58 = arith.constant 0 : i32
    %59 = arith.cmpi eq, %arg2, %c0_i32_58 : i32
    %60 = arith.extui %59 : i1 to i32
    %c0_i32_59 = arith.constant 0 : i32
    %61 = arith.cmpi ne, %60, %c0_i32_59 : i32
    scf.if %61 {
      %c0_60 = arith.constant 0 : index
      %c0_61 = arith.constant 0 : index
      %62 = vector.load %arg7[%c0_60, %c0_61] : memref<256x128xf32, #tpu.memory_space<vmem>>, vector<256x128xf32>
      %c0_62 = arith.constant 0 : index
      %c0_63 = arith.constant 0 : index
      %63 = vector.load %arg5[%c0_62, %c0_63] : memref<1x128xf32, #tpu.memory_space<vmem>>, vector<1x128xf32>
      %64 = vector.broadcast %63 : vector<1x128xf32> to vector<256x128xf32>
      %65 = arith.addf %62, %64 : vector<256x128xf32>
      %cst_64 = arith.constant 0.000000e+00 : f32
      %66 = vector.broadcast %cst_64 : f32 to vector<256x128xf32>
      %67 = arith.maximumf %65, %66 : vector<256x128xf32>
      %68 = vector.shape_cast %67 : vector<256x128xf32> to vector<16x16x128xf32>
      %69 = arith.truncf %68 : vector<16x16x128xf32> to vector<16x16x128xbf16>
      %cst_65 = arith.constant 0.000000e+00 : bf16
      %70 = vector.broadcast %cst_65 : bf16 to vector<18x18x128xbf16>
      %c0_66 = arith.constant 0 : index
      %c0_67 = arith.constant 0 : index
      %c0_68 = arith.constant 0 : index
      %c0_69 = arith.constant 0 : index
      %71 = vector.load %arg6[%c0_66, %c0_67, %c0_68, %c0_69] : memref<1x18x18x128xbf16, #tpu.memory_space<vmem>>, vector<1x18x18x128xbf16>
      %72 = vector.shape_cast %71 : vector<1x18x18x128xbf16> to vector<18x18x128xbf16>
      %73 = vector.shape_cast %70 : vector<18x18x128xbf16> to vector<1x18x18x128xbf16>
      tpu.vector_store %arg6[%c0_66, %c0_67, %c0_68, %c0_69], %73 {strides = array<i32>} : memref<1x18x18x128xbf16, #tpu.memory_space<vmem>>, vector<1x18x18x128xbf16>,
      %c0_70 = arith.constant 0 : index
      %c1_71 = arith.constant 1 : index
      %c1_72 = arith.constant 1 : index
      %c0_73 = arith.constant 0 : index
      %74 = vector.load %arg6[%c0_70, %c1_71, %c1_72, %c0_73] : memref<1x18x18x128xbf16, #tpu.memory_space<vmem>>, vector<1x16x16x128xbf16>
      %75 = vector.shape_cast %74 : vector<1x16x16x128xbf16> to vector<16x16x128xbf16>
      %76 = vector.shape_cast %69 : vector<16x16x128xbf16> to vector<1x16x16x128xbf16>
      tpu.vector_store %arg6[%c0_70, %c1_71, %c1_72, %c0_73], %76 {strides = array<i32>} : memref<1x18x18x128xbf16, #tpu.memory_space<vmem>>, vector<1x16x16x128xbf16>,
    } else {
    }
    return
  }
  func.func @transform_0(%arg0: i32, %arg1: i32, %arg2: i32) -> (i32, i32, i32, i32) {
    %c0_i32 = arith.constant 0 : i32
    %c0_i32_0 = arith.constant 0 : i32
    %c0_i32_1 = arith.constant 0 : i32
    return %arg0, %c0_i32, %c0_i32_0, %arg2 : i32, i32, i32, i32
  }
  func.func @transform_1(%arg0: i32, %arg1: i32, %arg2: i32) -> (i32, i32, i32, i32) {
    %c0_i32 = arith.constant 0 : i32
    %c0_i32_0 = arith.constant 0 : i32
    %c0_i32_1 = arith.constant 0 : i32
    return %c0_i32, %c0_i32_0, %arg2, %arg1 : i32, i32, i32, i32
  }
  func.func @transform_2(%arg0: i32, %arg1: i32, %arg2: i32) -> (i32, i32) {
    %c0_i32 = arith.constant 0 : i32
    %c0_i32_0 = arith.constant 0 : i32
    return %c0_i32, %arg1 : i32, i32
  }
  func.func @transform_3(%arg0: i32, %arg1: i32, %arg2: i32) -> (i32, i32, i32, i32) {
    %c0_i32 = arith.constant 0 : i32
    %c0_i32_0 = arith.constant 0 : i32
    %c0_i32_1 = arith.constant 0 : i32
    return %arg0, %c0_i32, %c0_i32_0, %arg1 : i32, i32, i32, i32
  }
}

</mosaic_0001>

<bundles_post_ra>
// kernel: tpu_custom_call.1
= control target key start
LH: loop header
LB: loop body
LE: loop exit
PB: predicated region body
PF: predicated region fallthrough
CT: control target
= control target key end

     0   :  { %s5727_s12 = smov 0   ;;  %s5729_s13 = smov 0   ;;  %s7608_s0 = inlined_call_operand.vmem [shape: bf16[2,18,18,128], index: 0, kind: input, shape index: {}]   ;;  %s7609_s1 = inlined_call_operand.vmem [shape: bf16[3,3,128,128], index: 1, kind: input, shape index: {}]   ;;  %s7610_s2 = inlined_call_operand.vmem [shape: f32[1,128], index: 2, kind: input, shape index: {}]   ;;  %s7611_s3 = inlined_call_operand.vmem [shape: bf16[2,18,18,128], index: 3, kind: output, shape index: {}]  }
   0x1   :  { %s5731_s14 = smov 0  }
   0x2 LB: > { %s32_s15 = sadd.s32 1, %s5700_s13  ;;  %p4476_p0 = scmp.ge.s32.totalorder %s5704_s14, 1  ;;  %s5704_s14 = sphi %s5731_s14, %s13_s14   ;;  %s5700_s13 = sphi %s5729_s13, %s7661_s13   ;;  %s5696_s12 = sphi %s5727_s12, %s7660_s12  }
   0x3   : > { %p34_p1 = scmp.ge.s32.totalorder %s32_s15, 2  ;;  %p187_p2 = scmp.lt.s32.totalorder %s5704_s14, 3 }
   0x5   : > { %s7663_s15 = smov (%p34_p1, %s32_s15), 0  ;;  %p188_p3 = pnand %p4476_p0, %p187_p2 }
   0x7   : > { %191 = sbr.rel (%p188_p3) target bundleno = 565 (0x235), region = 32 }
   0xc   : > { %v5588_v0 = vld [vmem:[%s7609_s1 + $0x38] sm:$0xff]   ;;  %p228_p4 = scmp.lt.s32.totalorder %s5696_s12, 1  ;;  %v5589_v1 = vld [vmem:[%s7609_s1 + $0x30] sm:$0xff]   ;;  %v5590_v2 = vld [vmem:[%s7609_s1 + $0x28] sm:$0xff]   ;;  %vm1296_vm0 = vsmask.f32 3328 }
   0xd   : > { %5114 = vmatprep.subr.bf16.mxu0 %v5588_v0  ;;  %5546 = vmatprep.subr.bf16.mxu1 %v5588_v0  ;;  %v5591_v3 = vld [vmem:[%s7609_s1 + $0x20] sm:$0xff]   ;;  %v5592_v6 = vld [vmem:[%s7609_s1 + $0x18] sm:$0xff]   ;;  %v5593_v7 = vld [vmem:[%s7609_s1 + $0x10] sm:$0xff]   ;;  %vm1297_vm1 = vsmask.f32 7440  ;;  %vm2649_vm3 = vcmask 1042432  }
   0xe   : > { %s7665_s12 = smov (!%p228_p4, %s5696_s12), 1  ;;  %5115 = vmatpush3.bf16.msra.mxu0 %v5588_v0  ;;  %5554 = vmatpush3.bf16.msra.mxu1 %v5588_v0  ;;  %v5594_v8 = vld [vmem:[%s7609_s1 + $0x8] sm:$0xff]   ;;  %v5595_v9 = vld [vmem:[%s7609_s1] sm:$0xff]   ;;  %v5600_v10 = vld [vmem:[%s7609_s1 + $0xf8] sm:$0xff]   ;;  %vm2650_vm4 = vcmask 1046532   ;;  %vm4236_vm6 = vcmask 1043456  }
   0xf   : > { %5116 = vmatprep.subr.bf16.mxu0 %v5589_v1  ;;  %5547 = vmatprep.subr.bf16.mxu1 %v5589_v1  ;;  %s5562_s22 = smul.u32 216, %s7665_s12  ;;  %v5601_v12 = vld [vmem:[%s7609_s1 + $0x1b8] sm:$0xff]   ;;  %v5602_v14 = vld [vmem:[%s7609_s1 + $0xf0] sm:$0xff]   ;;  %v5608_v18 = vld [vmem:[%s7609_s1 + $0xe8] sm:$0xff]   ;;  %vm4237_vm7 = vsmask.f32 7938 }
  0x10   : > { %v5603_v15 = vld [vmem:[%s7609_s1 + $0x1b0] sm:$0xff]   ;;  %v5609_v20 = vld [vmem:[%s7609_s1 + $0x1a8] sm:$0xff]   ;;  %v5610_v22 = vld [vmem:[%s7609_s1 + $0xe0] sm:$0xff]   ;;  %vm3912_vm8 = vsmask.f32 256  ;;  %vm4243_vm10 = vcmask 1040384  }
  0x11   : > { %s5762_s25 = scalar_lea.vmem %s7608_s0, %s5562_s22  ;;  %v5611_v23 = vld [vmem:[%s7609_s1 + $0x1a0] sm:$0xff]   ;;  %v5616_v26 = vld [vmem:[%s7609_s1 + $0xd8] sm:$0xff]   ;;  %v5618_v30 = vld [vmem:[%s7609_s1 + $0xd0] sm:$0xff]   ;;  %s6989_s16 = scalar_lea.vmem %s7611_s3, %s5562_s22  ;;  %vm3913_vm9 = vsmask.f32 4368 }
  0x12   : > { %5117 = vmatpush3.bf16.msra.mxu0 %v5589_v1  ;;  %5555 = vmatpush3.bf16.msra.mxu1 %v5589_v1  ;;  %v5596_v4 = vld [vmem:[%s5762_s25] sm:$0xff]   ;;  %v5788_v11 = vld [vmem:[%s5762_s25 + $0xc] sm:$0xff]   ;;  %v5803_v16 = vld [vmem:[%s5762_s25 + $0x18] sm:$0xff]  }
  0x13   : > { %5118 = vmatprep.subr.bf16.mxu0 %v5590_v2  ;;  %5548 = vmatprep.subr.bf16.mxu1 %v5590_v2  ;;  %v5769_v5 = vld [vmem:[%s5762_s25 + $0x60] sm:$0xff]   ;;  %v5794_v13 = vld [vmem:[%s5762_s25 + $0x6c] sm:$0xff]   ;;  %v5806_v17 = vld [vmem:[%s5762_s25 + $0x78] sm:$0xff]  }
  0x14   : > { %5130 = vmatprep.mubr.bf16.mxu0 %v5596_v4  ;;  %5146 = vmatprep.mubr.bf16.mxu1 %v5769_v5  ;;  %v5814_v19 = vld [vmem:[%s5762_s25 + $0x24] sm:$0xff]   ;;  %v5831_v24 = vld [vmem:[%s5762_s25 + $0x30] sm:$0xff]   ;;  %v5842_v27 = vld [vmem:[%s5762_s25 + $0x3c] sm:$0xff]  }
  0x15   : > { %v5822_v21 = vld [vmem:[%s5762_s25 + $0x84] sm:$0xff]   ;;  %v5834_v25 = vld [vmem:[%s5762_s25 + $0x90] sm:$0xff]   ;;  %v5617_v28 = vld [vmem:[%s7609_s1 + $0x198] sm:$0xff]  }
  0x16   : > { %5119 = vmatpush3.bf16.msra.mxu0 %v5590_v2  ;;  %5556 = vmatpush3.bf16.msra.mxu1 %v5590_v2  ;;  %v5850_v29 = vld [vmem:[%s5762_s25 + $0x9c] sm:$0xff]   ;;  %v5619_v31 = vld [vmem:[%s7609_s1 + $0x190] sm:$0xff]   ;;  %v5859_v32 = vld [vmem:[%s5762_s25 + $0x48] sm:$0xff]  }
  0x17   : > { %5120 = vmatprep.subr.bf16.mxu0 %v5591_v3  ;;  %5549 = vmatprep.subr.bf16.mxu1 %v5591_v3  ;;  %v5862_v33 = vld [vmem:[%s5762_s25 + $0xa8] sm:$0xff]   ;;  %v5875_v36 = vld [vmem:[%s5762_s25 + $0x54] sm:$0xff]   ;;  %v5626_v38 = vld [vmem:[%s7609_s1 + $0xc0] sm:$0xff]  }
  0x18   : > { %v5624_v34 = vld [vmem:[%s7609_s1 + $0xc8] sm:$0xff]   ;;  %v5878_v37 = vld [vmem:[%s5762_s25 + $0xb4] sm:$0xff]   ;;  %v5627_v39 = vld [vmem:[%s7609_s1 + $0x180] sm:$0xff]  }
  0x19   : > { %v5625_v35 = vld [vmem:[%s7609_s1 + $0x188] sm:$0xff]   ;;  %v5628_v40 = vld [vmem:[%s7609_s1 + $0x78] sm:$0xff]   ;;  %v5630_v42 = vld [vmem:[%s7609_s1 + $0x70] sm:$0xff]  }
  0x1a   : > { %5121 = vmatpush3.bf16.msra.mxu0 %v5591_v3  ;;  %5557 = vmatpush3.bf16.msra.mxu1 %v5591_v3  ;;  %v5629_v41 = vld [vmem:[%s7609_s1 + $0x138] sm:$0xff]   ;;  %v5631_v43 = vld [vmem:[%s7609_s1 + $0x130] sm:$0xff]   ;;  %v1242_v44 = vld [vmem:[%s5762_s25] sm:$0xf] }
  0x1b   : > { %5122 = vmatprep.subr.bf16.mxu0 %v5592_v6  ;;  %5550 = vmatprep.subr.bf16.mxu1 %v5592_v6  ;;  %v1243_v45 = vld [vmem:[%s5762_s25 + $0x4] sm:$0xf]  ;;  %v5632_v46 = vld [vmem:[%s7609_s1 + $0x68] sm:$0xff]   ;;  %v1300_v48 = vshrl.u32 %v1242_v44, 16  ;;  %v1303_v49 = vshll.u32 %v1242_v44, 16  ;;  %v5636_v0 = vld [vmem:[%s7609_s1 + $0x58] sm:$0xff]  }
  0x1c   : > { %v5633_v47 = vld [vmem:[%s7609_s1 + $0x128] sm:$0xff]   ;;  %v1309_v51 = vshll.u32 %v1243_v45, 16  ;;  %v1313_v52 = vshrl.u32 %v1243_v45, 16  ;;  %v5634_v54 = vld [vmem:[%s7609_s1 + $0x60] sm:$0xff]   ;;  %v5923_v59 = vld [vmem:[%s5762_s25 + $0x10] sm:$0xf] }
  0x1d   : > { %v1244_v50 = vld [vmem:[%s5762_s25 + $0x8] sm:$0x1]  ;;  %v1245_v53 = vld [vmem:[%s5762_s25 + $0xc] sm:$0xf]  ;;  %v1302_v55 = vrot.slane %v1300_v48, 4  ;;  %v1305_v56 = vrot.slane %v1303_v49, 5  ;;  %vm6027_vm2 = vmor %vm1296_vm0, %vm1297_vm1 }
  0x1e   : > { %5123 = vmatpush3.bf16.msra.mxu0 %v5592_v6  ;;  %5558 = vmatpush3.bf16.msra.mxu1 %v5592_v6  ;;  %v5635_v57 = vld [vmem:[%s7609_s1 + $0x120] sm:$0xff]   ;;  %v1319_v58 = vshll.u32 %v1244_v50, 16  ;;  %v5927_v60 = vrot.slane %v1309_v51, 5  ;;  %v1315_v61 = vrot.slane %v1313_v52, 4  ;;  %v1324_v62 = vshrl.u32 %v1245_v53, 16  ;;  %v5637_v6 = vld [vmem:[%s7609_s1 + $0x118] sm:$0xff]   ;;  %vm6335_vm5 = vmor %vm2649_vm3, %vm2650_vm4 }
  0x1f   : > { %5124 = vmatprep.subr.bf16.mxu0 %v5593_v7  ;;  %5551 = vmatprep.subr.bf16.mxu1 %v5593_v7  ;;  %v5932_v63 = vld [vmem:[%s5762_s25 + $0x14] sm:$0x1]  ;;  %v1306_v1 = vor.u32 %v1305_v56, %v1302_v55  ;;  %v1327_v2 = vshll.u32 %v1245_v53, 16  ;;  %v1248_v3 = vld [vmem:[%s5762_s25 + $0x18] sm:$0xf]  ;;  %vm7268_vm11 = vmand %vm4236_vm6, %vm4237_vm7 }
  0x20   : > { %v1249_v4 = vld [vmem:[%s5762_s25 + $0x1c] sm:$0xf]  ;;  %v5998_v50 = vld [vmem:[%s5762_s25 + $0x2c] sm:$0x1]  ;;  %vm7281_vm12 = vmor %vm3912_vm8, %vm3913_vm9 }
  0x21   : > { %vm7288_vm13 = vmand %vm4243_vm10, %vm3912_vm8 }
  0x22   : > { %5125 = vmatpush3.bf16.msra.mxu0 %v5593_v7  ;;  %5559 = vmatpush3.bf16.msra.mxu1 %v5593_v7  ;;  %v5942_v7 = vrot.slane %v1319_v58, 5 }
  0x23   : > { %5126 = vmatprep.subr.bf16.mxu0 %v5594_v8  ;;  %5552 = vmatprep.subr.bf16.mxu1 %v5594_v8 }
  0x26   : > { %5127 = vmatpush3.bf16.msra.mxu0 %v5594_v8  ;;  %5560 = vmatpush3.bf16.msra.mxu1 %v5594_v8  ;;  %v1333_v8 = vshll.u32 %v5923_v59, 16 }
  0x27   : > { %5128 = vmatprep.subr.bf16.mxu0 %v5595_v9  ;;  %5553 = vmatprep.subr.bf16.mxu1 %v5595_v9 }
  0x2a   : > { %5129 = vmatpush3.bf16.msra.mxu0 %v5595_v9  ;;  %5561 = vmatpush3.bf16.msra.mxu1 %v5595_v9  ;;  %v1337_v9 = vshrl.u32 %v5923_v59, 16 }
  0x2b   : > { %5162 = vmatprep.subr.bf16.mxu1 %v5600_v10  ;;  %5210 = vmatprep.subr.bf16.mxu0 %v5601_v12 }
  0x2d   : > { %5131 = vmatmul.mubr.bf16.vlgmr.msra.gmra.mxu0 %v5788_v11  ;;  %5147 = vmatmul.mubr.bf16.vlgmr.msra.gmra.mxu1 %v5794_v13 }
  0x2e   : > { %5163 = vmatpush3.bf16.msra.mxu1 %v5600_v10  ;;  %5211 = vmatpush3.bf16.msra.mxu0 %v5601_v12  ;;  %v1251_v10 = vld [vmem:[%s5762_s25 + $0x24] sm:$0xf]  ;;  %v5948_v12 = vrot.slane %v1324_v62, 4 }
  0x2f   : > { %5164 = vmatprep.subr.bf16.mxu1 %v5602_v14  ;;  %5212 = vmatprep.subr.bf16.mxu0 %v5603_v15 }
  0x30   : > { %5134 = vmatprep.mubr.bf16.mxu0 %v5803_v16  ;;  %5150 = vmatprep.mubr.bf16.mxu1 %v5806_v17 }
  0x32   : > { %5165 = vmatpush3.bf16.msra.mxu1 %v5602_v14  ;;  %5213 = vmatpush3.bf16.msra.mxu0 %v5603_v15  ;;  %v1343_v14 = vshll.u32 %v5932_v63, 16  ;;  %v7612_v15 = vrot.slane %v5923_v59, 5 }
  0x33   : > { %5166 = vmatprep.subr.bf16.mxu1 %v5608_v18  ;;  %5214 = vmatprep.subr.bf16.mxu0 %v5609_v20 }
  0x34   : > { %v5995_v49 = vrot.slane %v7612_v15, 4 }
  0x35   : > { %5135 = vmatmul.mubr.bf16.gmra.mxu0 %v5814_v19  ;;  %5151 = vmatmul.mubr.bf16.gmra.mxu1 %v5822_v21 }
  0x36   : > { %5167 = vmatpush3.bf16.msra.mxu1 %v5608_v18  ;;  %5215 = vmatpush3.bf16.msra.mxu0 %v5609_v20  ;;  %v5638_v18 = vld [vmem:[%s7609_s1 + $0x50] sm:$0xff]   ;;  %v1348_v20 = vshrl.u32 %v1248_v3, 16 }
  0x37   : > { %5168 = vmatprep.subr.bf16.mxu1 %v5610_v22  ;;  %5216 = vmatprep.subr.bf16.mxu0 %v5611_v23 }
  0x38   : > { %5138 = vmatprep.mubr.bf16.mxu0 %v5831_v24  ;;  %5154 = vmatprep.mubr.bf16.mxu1 %v5834_v25  ;;  %v1350_v44 = vrot.slane %v1348_v20, 4 }
  0x3a   : > { %5169 = vmatpush3.bf16.msra.mxu1 %v5610_v22  ;;  %5217 = vmatpush3.bf16.msra.mxu0 %v5611_v23  ;;  %v1351_v22 = vshll.u32 %v1248_v3, 16  ;;  %v1357_v23 = vshll.u32 %v1249_v4, 16 }
  0x3b   : > { %5170 = vmatprep.subr.bf16.mxu1 %v5616_v26  ;;  %5218 = vmatprep.subr.bf16.mxu0 %v5617_v28 }
  0x3c   : > { %v1353_v45 = vrot.slane %v1351_v22, 5 }
  0x3d   : > { %5139 = vmatmul.mubr.bf16.gmra.mxu0 %v5842_v27  ;;  %5155 = vmatmul.mubr.bf16.gmra.mxu1 %v5850_v29 }
  0x3e   : > { %5171 = vmatpush3.bf16.msra.mxu1 %v5616_v26  ;;  %5219 = vmatpush3.bf16.msra.mxu0 %v5617_v28  ;;  %v5961_v26 = vrot.slane %v1306_v1, 4  ;;  %v1372_v28 = vshrl.u32 %v1251_v10, 16 }
  0x3f   : > { %5172 = vmatprep.subr.bf16.mxu1 %v5618_v30  ;;  %5220 = vmatprep.subr.bf16.mxu0 %v5619_v31 }
  0x40   : > { %5142 = vmatprep.mubr.bf16.mxu0 %v5859_v32  ;;  %5158 = vmatprep.mubr.bf16.mxu1 %v5862_v33  ;;  %v1374_v51 = vrot.slane %v1372_v28, 4 }
  0x42   : > { %5173 = vmatpush3.bf16.msra.mxu1 %v5618_v30  ;;  %5221 = vmatpush3.bf16.msra.mxu0 %v5619_v31  ;;  %v1375_v30 = vshll.u32 %v1251_v10, 16  ;;  %v5963_v31 = vrot.slane %v1333_v8, 5  ;;  %v1391_v8 = vshll.u32 %v5998_v50, 16 }
  0x43   : > { %5174 = vmatprep.subr.bf16.mxu1 %v5624_v34  ;;  %5222 = vmatprep.subr.bf16.mxu0 %v5625_v35 }
  0x44   : > { %v1377_v52 = vrot.slane %v1375_v30, 5 }
  0x45   : > { %5143 = vmatmul.mubr.bf16.gmra.mxu0 %v5875_v36  ;;  %5159 = vmatmul.mubr.bf16.gmra.mxu1 %v5878_v37 }
  0x46   : > { %5175 = vmatpush3.bf16.msra.mxu1 %v5624_v34  ;;  %5223 = vmatpush3.bf16.msra.mxu0 %v5625_v35  ;;  %v5965_v34 = vrot.slane %v1337_v9, 4  ;;  %v5968_v35 = vld [vmem:[%s5762_s25 + $0x20] sm:$0x1] }
  0x47   : > { %5176 = vmatprep.subr.bf16.mxu1 %v5626_v38  ;;  %5224 = vmatprep.subr.bf16.mxu0 %v5627_v39 }
  0x48   : > { %5178 = vmatprep.mubr.bf16.mxu1 %v5788_v11  ;;  %5226 = vmatprep.mubr.bf16.mxu0 %v5803_v16  ;;  %v1316_v11 = vor.u32 %v1315_v61, %v5927_v60  ;;  %v1367_v61 = vshll.u32 %v5968_v35, 16  ;;  %v1340_v1 = vor.u32 %v5965_v34, %v5963_v31 }
  0x4a   : > { %5177 = vmatpush3.bf16.msra.mxu1 %v5626_v38  ;;  %5225 = vmatpush3.bf16.msra.mxu0 %v5627_v39 }
  0x4b   : > { %5258 = vmatprep.subr.bf16.mxu1 %v5628_v40  ;;  %5306 = vmatprep.subr.bf16.mxu0 %v5629_v41 }
  0x4d   : > { %5179 = vmatmul.mubr.bf16.vlgmr.msra.gmra.mxu1 %v5803_v16  ;;  %5227 = vmatmul.mubr.bf16.vlgmr.msra.gmra.mxu0 %v5814_v19  ;;  %v5953_v16 = vld [vmem:[%s5762_s25 + $0x28] sm:$0xf] }
  0x4e   : > { %5259 = vmatpush3.bf16.msra.mxu1 %v5628_v40  ;;  %5307 = vmatpush3.bf16.msra.mxu0 %v5629_v41  ;;  %v1381_v38 = vshll.u32 %v5953_v16, 16  ;;  %v1385_v39 = vshrl.u32 %v5953_v16, 16  ;;  %v5974_v40 = vrot.slane %v1316_v11, 4  ;;  %v5976_v41 = vrot.slane %v1343_v14, 5  ;;  %v5644_v11 = vld [vmem:[%s7609_s1 + $0x40] sm:$0xff]  }
  0x4f   : > { %5182 = vmatprep.mubr.bf16.mxu1 %v5814_v19  ;;  %5230 = vmatprep.mubr.bf16.mxu0 %v5831_v24  ;;  %v5639_v19 = vld [vmem:[%s7609_s1 + $0x110] sm:$0xff]  }
  0x50   : > { %5260 = vmatprep.subr.bf16.mxu1 %v5630_v42  ;;  %5308 = vmatprep.subr.bf16.mxu0 %v5631_v43  ;;  %v6000_v53 = vrot.slane %v1381_v38, 5  ;;  %v6044_v38 = vrot.slane %v1367_v61, 5 }
  0x52   : > { %5261 = vmatpush3.bf16.msra.mxu1 %v5630_v42  ;;  %5309 = vmatpush3.bf16.msra.mxu0 %v5631_v43  ;;  %v1254_v42 = vld [vmem:[%s5762_s25 + $0x30] sm:$0xf]  ;;  %v5640_v43 = vld [vmem:[%s7609_s1 + $0x48] sm:$0xff]  }
  0x53   : > { %5262 = vmatprep.subr.bf16.mxu1 %v5632_v46  ;;  %5310 = vmatprep.subr.bf16.mxu0 %v5633_v47  ;;  %v1396_v55 = vshrl.u32 %v1254_v42, 16  ;;  %v1399_v56 = vshll.u32 %v1254_v42, 16 }
  0x55   : > { %5183 = vmatmul.mubr.bf16.gmra.mxu1 %v5831_v24  ;;  %5231 = vmatmul.mubr.bf16.gmra.mxu0 %v5842_v27  ;;  %v1361_v24 = vshrl.u32 %v1249_v4, 16  ;;  %v6011_v4 = vld [vmem:[%s5762_s25 + $0x40] sm:$0xf]  ;;  %v1401_v20 = vrot.slane %v1399_v56, 5 }
  0x56   : > { %5186 = vmatprep.mubr.bf16.mxu1 %v5842_v27  ;;  %5234 = vmatprep.mubr.bf16.mxu0 %v5859_v32  ;;  %v1329_v27 = vrot.slane %v1327_v2, 5  ;;  %v1354_v2 = vor.u32 %v1353_v45, %v1350_v44  ;;  %v1429_v28 = vshll.u32 %v6011_v4, 16  ;;  %v1433_v30 = vshrl.u32 %v6011_v4, 16 }
  0x57   : > { %5263 = vmatpush3.bf16.msra.mxu1 %v5632_v46  ;;  %5311 = vmatpush3.bf16.msra.mxu0 %v5633_v47  ;;  %v5984_v46 = vrot.slane %v1357_v23, 5  ;;  %v5987_v47 = vld [vmem:[%s5762_s25 + $0x34] sm:$0xf]  ;;  %v6032_v23 = vld [vmem:[%s5762_s25 + $0x38] sm:$0x1]  ;;  %v1393_v44 = vrot.slane %v1391_v8, 5 }
  0x58   : > { %5264 = vmatprep.subr.bf16.mxu1 %v5634_v54  ;;  %5312 = vmatprep.subr.bf16.mxu0 %v5635_v57  ;;  %v1330_v48 = vor.u32 %v1329_v27, %v5948_v12  ;;  %v1405_v62 = vshll.u32 %v5987_v47, 16  ;;  %v5645_v12 = vld [vmem:[%s7609_s1 + $0x100] sm:$0xff]   ;;  %v6040_v34 = vrot.slane %v1354_v2, 4  ;;  %v6073_v61 = vrot.slane %v1429_v28, 5  ;;  %v6102_v8 = vld [vmem:[%s5762_s25 + $0x50] sm:$0x1] }
  0x5a   : > { %v6020_v14 = vrot.slane %v1330_v48, 4  ;;  %v1260_v48 = vld [vmem:[%s5762_s25 + $0x48] sm:$0xf] }
  0x5b   : > { %5265 = vmatpush3.bf16.msra.mxu1 %v5634_v54  ;;  %5313 = vmatpush3.bf16.msra.mxu0 %v5635_v57  ;;  %v1387_v54 = vrot.slane %v1385_v39, 4  ;;  %v1257_v57 = vld [vmem:[%s5762_s25 + $0x3c] sm:$0xf] }
  0x5c   : > { %5266 = vmatprep.subr.bf16.mxu1 %v5636_v0  ;;  %5314 = vmatprep.subr.bf16.mxu0 %v5637_v6  ;;  %v1420_v9 = vshrl.u32 %v1257_v57, 16  ;;  %v1423_v10 = vshll.u32 %v1257_v57, 16  ;;  %v6049_v39 = vld [vmem:[%s7609_s1 + $0x1f8] sm:$0xff]  }
  0x5d   : > { %5187 = vmatmul.mubr.bf16.gmra.mxu1 %v5859_v32  ;;  %5235 = vmatmul.mubr.bf16.gmra.mxu0 %v5875_v36  ;;  %v1363_v32 = vrot.slane %v1361_v24, 4  ;;  %v6034_v24 = vrot.slane %v1405_v62, 5  ;;  %v1435_v62 = vrot.slane %v1433_v30, 4 }
  0x5e   : > { %5190 = vmatprep.mubr.bf16.mxu1 %v5875_v36  ;;  %5238 = vmatprep.mubr.bf16.mxu0 %v5769_v5  ;;  %v5641_v36 = vld [vmem:[%s7609_s1 + $0x108] sm:$0xff]   ;;  %v1422_v45 = vrot.slane %v1420_v9, 4 }
  0x5f   : > { %5267 = vmatpush3.bf16.msra.mxu1 %v5636_v0  ;;  %5315 = vmatpush3.bf16.msra.mxu0 %v5637_v6  ;;  %v1409_v0 = vshrl.u32 %v5987_v47, 16  ;;  %v1364_v3 = vor.u32 %v1363_v32, %v5984_v46  ;;  %v1378_v6 = vor.u32 %v1377_v52, %v1374_v51  ;;  %v1425_v32 = vrot.slane %v1423_v10, 5 }
  0x60   : > { %5268 = vmatprep.subr.bf16.mxu1 %v5638_v18  ;;  %5316 = vmatprep.subr.bf16.mxu0 %v5639_v19  ;;  %v1312_v51 = vsel %vm6027_vm2, %v5961_v26, %v5927_v60  ;;  %v1322_v52 = vsel %vm6027_vm2, %v5974_v40, %v5942_v7  ;;  %v1336_v60 = vsel %vm6027_vm2, %v6020_v14, %v5963_v31  ;;  %v1444_v26 = vshrl.u32 %v1260_v48, 16  ;;  %v6110_v14 = vld [vmem:[%s5762_s25 + $0x58] sm:$0xf] }
  0x61   : > { %v1411_v27 = vrot.slane %v1409_v0, 4  ;;  %v6042_v35 = vrot.slane %v1364_v3, 4  ;;  %v1379_v42 = vrot.slane %v1378_v6, 4  ;;  %v1447_v40 = vshll.u32 %v1260_v48, 16  ;;  %v1263_v3 = vld [vmem:[%s5762_s25 + $0x54] sm:$0xf] }
  0x62   : > { %v1360_v0 = vsel %vm6027_vm2, %v6040_v34, %v5984_v46  ;;  %v1426_v31 = vor.u32 %v1425_v32, %v1422_v45  ;;  %v1266_v34 = vld [vmem:[%s5762_s25 + $0x60] sm:$0xf] }
  0x63   : > { %5269 = vmatpush3.bf16.msra.mxu1 %v5638_v18  ;;  %5317 = vmatpush3.bf16.msra.mxu0 %v5639_v19  ;;  %v1388_v18 = vor.u32 %v1387_v54, %v6000_v53  ;;  %v1398_v19 = vrot.slane %v1396_v55, 4  ;;  %v6070_v55 = vld [vmem:[%s5762_s25 + $0x4c] sm:$0xf]  ;;  %v1412_v57 = vor.u32 %v1411_v27, %v6034_v24  ;;  %v6114_v27 = vcombine.low %v1312_v51, %v1322_v52 }
  0x64   : > { %5270 = vmatprep.subr.bf16.mxu1 %v5640_v43  ;;  %5318 = vmatprep.subr.bf16.mxu0 %v5641_v36  ;;  %v1453_v9 = vshll.u32 %v6070_v55, 16  ;;  %v1427_v30 = vrot.slane %v1426_v31, 4  ;;  %v1269_v52 = vld [vmem:[%s5762_s25 + $0x6c] sm:$0xf] }
  0x65   : > { %5191 = vmatmul.mubr.bf16.gmra.mxu1 %v5769_v5  ;;  %5239 = vmatmul.mubr.bf16.gmra.mxu0 %v5794_v13  ;;  %v1341_v5 = vrot.slane %v1340_v1, 4  ;;  %v1389_v54 = vrot.slane %v1388_v18, 4  ;;  %v1402_v56 = vor.u32 %v1401_v20, %v1398_v19  ;;  %v1370_v1 = vsel %vm6027_vm2, %v6042_v35, %v6044_v38  ;;  %v6120_v35 = vld [vmem:[%s5762_s25 + $0x64] sm:$0xf] }
  0x66   : > { %5194 = vmatprep.mubr.bf16.mxu1 %v5794_v13  ;;  %5242 = vmatprep.mubr.bf16.mxu0 %v5806_v17  ;;  %v6054_v13 = vld [vmem:[%s7609_s1 + $0xb8] sm:$0xff]   ;;  %v1446_v18 = vrot.slane %v1444_v26, 4  ;;  %v1449_v19 = vrot.slane %v1447_v40, 5  ;;  %v1468_v20 = vshrl.u32 %v1263_v3, 16  ;;  %v6122_v38 = vrot.slane %v1453_v9, 5 }
  0x67   : > { %5271 = vmatpush3.bf16.msra.mxu1 %v5640_v43  ;;  %5319 = vmatpush3.bf16.msra.mxu0 %v5641_v36  ;;  %v1415_v43 = vshll.u32 %v6032_v23, 16  ;;  %v6067_v36 = vld [vmem:[%s5762_s25 + $0x44] sm:$0x1]  ;;  %v1346_v7 = vsel %vm6027_vm2, %v1341_v5, %v5976_v41  ;;  %v1384_v41 = vsel %vm6027_vm2, %v1379_v42, %v6000_v53  ;;  %v1394_v46 = vsel %vm6027_vm2, %v1389_v54, %v1393_v44 }
  0x68   : > { %5272 = vmatprep.subr.bf16.mxu1 %v5644_v11  ;;  %5320 = vmatprep.subr.bf16.mxu0 %v5645_v12  ;;  %v1439_v2 = vshll.u32 %v6067_v36, 16  ;;  %v1403_v10 = vrot.slane %v1402_v56, 4  ;;  %v1457_v53 = vshrl.u32 %v6070_v55, 16  ;;  %v6116_v28 = vcombine.low %v1336_v60, %v1346_v7  ;;  %v6142_v7 = vld [vmem:[%s5762_s25 + $0x5c] sm:$0x1] }
  0x69   : > { %v6099_v6 = vrot.slane %v1415_v43, 5  ;;  %v1477_v42 = vshll.u32 %v6110_v14, 16  ;;  %v1481_v44 = vshrl.u32 %v6110_v14, 16  ;;  %v6127_v45 = vcombine.low %v1360_v0, %v1370_v1 }
  0x6a   : > { %v1441_v5 = vrot.slane %v1439_v2, 5  ;;  %v6129_v32 = vcombine.low %v1384_v41, %v1394_v46  ;;  %v1459_v51 = vrot.slane %v1457_v53, 4  ;;  %v1408_v54 = vsel %vm6027_vm2, %v1403_v10, %v6034_v24  ;;  %v6149_v2 = vld [vmem:[%s5762_s25 + $0x70] sm:$0xf] }
  0x6b   : > { %5273 = vmatpush3.bf16.msra.mxu1 %v5644_v11  ;;  %5321 = vmatpush3.bf16.msra.mxu0 %v5645_v12  ;;  %v1413_v11 = vrot.slane %v1412_v57, 4  ;;  %v1436_v12 = vor.u32 %v1435_v62, %v6073_v61  ;;  %7625 = vst [vmem:[#allocation3_spill] sm:$0xff] %v6127_v45  ;;  %v1450_v43 = vor.u32 %v1449_v19, %v1446_v18  ;;  %v1470_v56 = vrot.slane %v1468_v20, 4  ;;  %v6170_v20 = vld [vmem:[%s5762_s25 + $0x7c] sm:$0xf] }
  0x6c   : > { %5354 = vmatprep.subr.bf16.mxu1 %v6049_v39  ;;  %5402 = vmatprep.subr.bf16.mxu0 %v6054_v13  ;;  %v1432_v60 = vsel %vm6027_vm2, %v1427_v30, %v6073_v61  ;;  %v1492_v26 = vshrl.u32 %v1266_v34, 16  ;;  %v1495_v40 = vshll.u32 %v1266_v34, 16  ;;  %v6144_v0 = vrot.slane %v1477_v42, 5  ;;  %7626 = vst [vmem:[#allocation4_spill] sm:$0xff] %v6170_v20 }
  0x6d   : > { %5195 = vmatmul.mubr.bf16.gmra.mxu1 %v5806_v17  ;;  %5243 = vmatmul.mubr.bf16.gmra.mxu0 %v5822_v21  ;;  %v1471_v17 = vshll.u32 %v1263_v3, 16  ;;  %v1437_v48 = vrot.slane %v1436_v12, 4  ;;  %v1418_v62 = vsel %vm6027_vm2, %v1413_v11, %v6099_v6  ;;  %v1483_v1 = vrot.slane %v1481_v44, 4  ;;  %v6164_v11 = vld [vmem:[%s5762_s25 + $0x68] sm:$0x1] }
  0x6e   : > { %5198 = vmatprep.mubr.bf16.mxu1 %v5822_v21  ;;  %5246 = vmatprep.mubr.bf16.mxu0 %v5834_v25  ;;  %v1463_v21 = vshll.u32 %v6102_v8, 16  ;;  %v1501_v24 = vshll.u32 %v6120_v35, 16  ;;  %v1505_v31 = vshrl.u32 %v6120_v35, 16  ;;  %v1460_v61 = vor.u32 %v1459_v51, %v6122_v38  ;;  %v1272_v12 = vld [vmem:[%s5762_s25 + $0x78] sm:$0xf]  ;;  %v5642_v51 = vld [vmem:[%s5762_s25 + $0xc0] sm:$0xff]  }
  0x6f   : > { %v1473_v57 = vrot.slane %v1471_v17, 5  ;;  %v1516_v41 = vshrl.u32 %v1269_v52, 16  ;;  %v1519_v46 = vshll.u32 %v1269_v52, 16  ;;  %v1442_v6 = vsel %vm6027_vm2, %v1437_v48, %v1441_v5 }
  0x70   : > { %v6154_v3 = vrot.slane %v1463_v21, 5  ;;  %v6160_v9 = vrot.slane %v1450_v43, 4  ;;  %v1494_v53 = vrot.slane %v1492_v26, 4  ;;  %v1497_v18 = vrot.slane %v1495_v40, 5 }
  0x71   : > { %v1474_v10 = vor.u32 %v1473_v57, %v1470_v56  ;;  %v1525_v19 = vshll.u32 %v6149_v2, 16  ;;  %v6172_v17 = vcombine.low %v1408_v54, %v1418_v62  ;;  %v1484_v30 = vor.u32 %v1483_v1, %v6144_v0  ;;  %v1275_v1 = vld [vmem:[%s5762_s25 + $0x84] sm:$0xf] }
  0x72   : > { %v6175_v5 = vrot.slane %v1501_v24, 5  ;;  %v1507_v34 = vrot.slane %v1505_v31, 4  ;;  %v1518_v21 = vrot.slane %v1516_v41, 4  ;;  %v1521_v42 = vrot.slane %v1519_v46, 5 }
  0x73   : > { %v1540_v44 = vshrl.u32 %v1272_v12, 16  ;;  %v1543_v48 = vshll.u32 %v1272_v12, 16  ;;  %v6178_v52 = vcombine.low %v1432_v60, %v1442_v6  ;;  %v1456_v54 = vsel %vm6027_vm2, %v6160_v9, %v6122_v38  ;;  %v6189_v60 = vld [vmem:[%s5762_s25 + $0x74] sm:$0x1] }
  0x74   : > { %v1461_v43 = vrot.slane %v1460_v61, 4  ;;  %v1511_v56 = vshll.u32 %v6164_v11, 16  ;;  %v1475_v57 = vrot.slane %v1474_v10, 4  ;;  %v1498_v62 = vor.u32 %v1497_v18, %v1494_v53  ;;  %7627 = vst [vmem:[#allocation5_spill] sm:$0xff] %v6189_v60  ;;  %v6197_v10 = vld [vmem:[%s5762_s25 + $0x88] sm:$0xf] }
  0x75   : > { %5199 = vmatmul.mubr.bf16.gmra.mxu1 %v5834_v25  ;;  %5247 = vmatmul.mubr.bf16.gmra.mxu0 %v5850_v29  ;;  %v1487_v25 = vshll.u32 %v6142_v7, 16  ;;  %v6185_v26 = vrot.slane %v1525_v19, 5  ;;  %v1485_v24 = vrot.slane %v1484_v30, 4  ;;  %v1549_v41 = vshll.u32 %v6170_v20, 16  ;;  %7628 = vst [vmem:[#allocation6_spill] sm:$0xff] %v6197_v10 }
  0x76   : > { %5202 = vmatprep.mubr.bf16.mxu1 %v5850_v29  ;;  %5250 = vmatprep.mubr.bf16.mxu0 %v5862_v33  ;;  %v1529_v29 = vshrl.u32 %v6149_v2, 16  ;;  %v1553_v38 = vshrl.u32 %v6170_v20, 16  ;;  %v1508_v61 = vor.u32 %v1507_v34, %v6175_v5  ;;  %v1522_v46 = vor.u32 %v1521_v42, %v1518_v21  ;;  %v1278_v19 = vld [vmem:[%s5762_s25 + $0x90] sm:$0xf] }
  0x77   : > { %v1489_v31 = vrot.slane %v1487_v25, 5  ;;  %v1542_v6 = vrot.slane %v1540_v44, 4  ;;  %v1545_v9 = vrot.slane %v1543_v48, 5  ;;  %v1466_v25 = vsel %vm6027_vm2, %v1461_v43, %v6154_v3  ;;  %v6218_v3 = vld [vmem:[%s5762_s25 + $0x94] sm:$0xf] }
  0x78   : > { %v1531_v40 = vrot.slane %v1529_v29, 4  ;;  %v6203_v12 = vrot.slane %v1511_v56, 5  ;;  %v1564_v53 = vshrl.u32 %v1275_v1, 16  ;;  %v1567_v18 = vshll.u32 %v1275_v1, 16  ;;  %v5643_v29 = vld [vmem:[%s5762_s25 + $0xcc] sm:$0xff]   ;;  %7630 = vst [vmem:[#allocation8_spill] sm:$0xff] %v6218_v3 }
  0x79   : > { %v1480_v30 = vsel %vm6027_vm2, %v1475_v57, %v6144_v0  ;;  %v6213_v34 = vrot.slane %v1498_v62, 4  ;;  %v1535_v21 = vshll.u32 %v6189_v60, 16  ;;  %v6220_v42 = vrot.slane %v1549_v41, 5  ;;  %v6235_v60 = vld [vmem:[%s5762_s25 + $0x8c] sm:$0x1] }
  0x7a   : > { %v1555_v44 = vrot.slane %v1553_v38, 4  ;;  %v1573_v48 = vshll.u32 %v6197_v10, 16  ;;  %v1577_v43 = vshrl.u32 %v6197_v10, 16  ;;  %v1490_v56 = vsel %vm6027_vm2, %v1485_v24, %v1489_v31  ;;  %7631 = vst [vmem:[#allocation9_spill] sm:$0xff] %v6235_v60 }
  0x7b   : > { %v6226_v0 = vrot.slane %v1508_v61, 4  ;;  %v6228_v57 = vrot.slane %v1522_v46, 4  ;;  %v1546_v62 = vor.u32 %v1545_v9, %v1542_v6  ;;  %v1566_v1 = vrot.slane %v1564_v53, 4 }
  0x7c   : > { %v1569_v15 = vrot.slane %v1567_v18, 5  ;;  %v1588_v58 = vshrl.u32 %v1278_v19, 16  ;;  %v1591_v41 = vshll.u32 %v1278_v19, 16  ;;  %v6231_v20 = vrot.slane %v1535_v21, 5  ;;  %v6249_v18 = vld [vmem:[%s5762_s25 + $0x98] sm:$0x1] }
  0x7d   : > { %5203 = vmatmul.mubr.bf16.gmra.mxu1 %v5862_v33  ;;  %5251 = vmatmul.mubr.bf16.gmra.mxu0 %v5878_v37  ;;  %v6206_v33 = vld [vmem:[%s5762_s25 + $0x80] sm:$0x1]  ;;  %v1597_v10 = vshll.u32 %v6218_v3, 16  ;;  %v1601_v24 = vshrl.u32 %v6218_v3, 16  ;;  %v1556_v61 = vor.u32 %v1555_v44, %v6220_v42  ;;  %v6242_v46 = vrot.slane %v1573_v48, 5  ;;  %7632 = vst [vmem:[#allocation10_spill] sm:$0xff] %v6249_v18 }
  0x7e   : > { %5206 = vmatprep.mubr.bf16.mxu1 %v5878_v37  ;;  %5254 = vmatprep.mubr.bf16.mxu0 %v5642_v51  ;;  %7629 = vst [vmem:[#allocation7_spill] sm:$0xff] %v6206_v33  ;;  %v1532_v37 = vor.u32 %v1531_v40, %v6185_v26  ;;  %v1281_v40 = vld [vmem:[%s5762_s25 + $0x9c] sm:$0xf]  ;;  %v1559_v38 = vshll.u32 %v6206_v33, 16  ;;  %v1579_v6 = vrot.slane %v1577_v43, 4  ;;  %v6244_v9 = vcombine.low %v1456_v54, %v1466_v25 }
  0x7f   : > { %v6246_v53 = vcombine.low %v1480_v30, %v1490_v56  ;;  %v1612_v19 = vshrl.u32 %v1281_v40, 16  ;;  %v1615_v21 = vshll.u32 %v1281_v40, 16  ;;  %v1570_v44 = vor.u32 %v1569_v15, %v1566_v1  ;;  %v1284_v40 = vld [vmem:[%s5762_s25 + $0xa8] sm:$0xf]  ;;  %v6319_v3 = vld [vmem:[%s5762_s25 + $0xb4] sm:$0xf] }
  0x80   : > { %v6239_v31 = vrot.slane %v1532_v37, 4  ;;  %v6253_v37 = vrot.slane %v1546_v62, 4  ;;  %v1583_v25 = vshll.u32 %v6235_v60, 16  ;;  %v6260_v30 = vrot.slane %v1597_v10, 5  ;;  %v6275_v62 = vld [vmem:[%s5762_s25 + $0xa4] sm:$0x1] }
  0x81   : > { %v1603_v48 = vrot.slane %v1601_v24, 4  ;;  %v1514_v15 = vsel %vm6027_vm2, %v6226_v0, %v6203_v12  ;;  %v6271_v43 = vrot.slane %v1559_v38, 5  ;;  %v1580_v56 = vor.u32 %v1579_v6, %v6242_v46  ;;  %7634 = vst [vmem:[#allocation12_spill] sm:$0xff] %v6275_v62  ;;  %v6294_v6 = vld [vmem:[%s5762_s25 + $0xac] sm:$0xf]  ;;  %v5648_v10 = vld [vmem:[%s7609_s1 + $0x1f0] sm:$0xff]  }
  0x82   : > { %v1614_v12 = vrot.slane %v1612_v19, 4  ;;  %v1617_v0 = vrot.slane %v1615_v21, 5  ;;  %v6290_v38 = vrot.slane %v1570_v44, 4  ;;  %v1585_v19 = vrot.slane %v1583_v25, 5  ;;  %v2578_v25 = vld [vmem:[%s5762_s25 + $0xc] sm:$0xe] }
  0x83   : > { %v1604_v21 = vor.u32 %v1603_v48, %v6260_v30  ;;  %v1581_v44 = vrot.slane %v1580_v56, 4  ;;  %v6316_v48 = vld [vmem:[%s7609_s1 + $0x1e8] sm:$0xff]   ;;  %v7638_v33 = vrot.slane %v5923_v59, 5  ;;  %v5653_v59 = vld [vmem:[%s7609_s1 + $0xa0] sm:$0xff]  }
  0x85   : > { %5207 = vmatmul.mubr.bf16.gmra.mxu1 %v5642_v51  ;;  %5255 = vmatmul.mubr.bf16.gmra.mxu0 %v5643_v29  ;;  %v1590_v51 = vrot.slane %v1588_v58, 4  ;;  %v1593_v29 = vrot.slane %v1591_v41, 5  ;;  %v6269_v58 = vrot.slane %v1556_v61, 4  ;;  %v1552_v41 = vsel %vm6027_vm2, %v6253_v37, %v6220_v42  ;;  %v5649_v42 = vld [vmem:[%s7609_s1 + $0xb0] sm:$0xff]  }
  0x86   : > { %5274 = vmatprep.mubr.bf16.mxu1 %v6114_v27  ;;  %5322 = vmatprep.mubr.bf16.mxu0 %v6116_v28  ;;  %v6263_v27 = vld [vmem:[%s5762_s25 + $0xa0] sm:$0xf]  ;;  %v1607_v61 = vshll.u32 %v6249_v18, 16  ;;  %v1639_v18 = vshll.u32 %v1284_v40, 16 }
  0x87   : > { %7633 = vst [vmem:[#allocation11_spill] sm:$0xff] %v6263_v27  ;;  %v1594_v24 = vor.u32 %v1593_v29, %v1590_v51  ;;  %v1621_v1 = vshll.u32 %v6263_v27, 16  ;;  %v1625_v54 = vshrl.u32 %v6263_v27, 16  ;;  %v1562_v37 = vsel %vm6027_vm2, %v6269_v58, %v6271_v43 }
  0x88   : > { %v1631_v51 = vshll.u32 %v6275_v62, 16  ;;  %v1636_v29 = vshrl.u32 %v1284_v40, 16  ;;  %v1618_v27 = vor.u32 %v1617_v0, %v1614_v12  ;;  %v1576_v58 = vsel %vm6027_vm2, %v6290_v38, %v6242_v46  ;;  %v6348_v0 = vld [vmem:[%s5762_s25 + $0xb8] sm:$0xf] }
  0x89   : > { %v6330_v43 = vrot.slane %v1594_v24, 4  ;;  %v6332_v56 = vrot.slane %v1607_v61, 5  ;;  %v1645_v40 = vshll.u32 %v6294_v6, 16  ;;  %v6343_v12 = vrot.slane %v1621_v1, 5 }
  0x8a   : > { %v6345_v46 = vrot.slane %v1625_v54, 4  ;;  %v4644_v38 = vrot.slane %v2578_v25, 9  ;;  %v1586_v24 = vsel %vm6027_vm2, %v1581_v44, %v1585_v19  ;;  %v6352_v61 = vrot.slane %v1631_v51, 5  ;;  %v2580_v54 = vld [vmem:[%s5762_s25 + $0x24] sm:$0xe] }
  0x8b   : > { %v6354_v62 = vrot.slane %v1636_v29, 4  ;;  %v6364_v60 = vrot.slane %v1639_v18, 5  ;;  %v1649_v25 = vshrl.u32 %v6294_v6, 16  ;;  %v1660_v18 = vshrl.u32 %v6319_v3, 16  ;;  %v2581_v51 = vld [vmem:[%s5762_s25 + $0x30] sm:$0xe] }
  0x8c   : > { %v2662_v19 = vsel %vm6335_vm5, %v4644_v38, %v7638_v33  ;;  %v6384_v33 = vrot.slane %v1645_v40, 5  ;;  %v2675_v44 = vrot.slane %v5953_v16, 5  ;;  %v6406_v29 = vcombine.low %v1576_v58, %v1586_v24  ;;  %v5654_v38 = vld [vmem:[%s7609_s1 + $0x1d8] sm:$0xff]  }
  0x8d   : > { %5275 = vmatmul.mubr.bf16.vlgmr.msra.gmra.mxu1 %v6116_v28  ;;  %5323 = vmatmul.mubr.bf16.vlgmr.msra.gmra.mxu0 %v6127_v45  ;;  %v5651_v28 = vld [vmem:[%s7609_s1 + $0xa8] sm:$0xff]   ;;  %v1669_v40 = vshll.u32 %v6348_v0, 16  ;;  %v2678_v58 = vrot.slane %v5998_v50, 5  ;;  %v5655_v24 = vld [vmem:[%s7609_s1 + $0x98] sm:$0xff]   ;;  %v2685_v50 = vrot.slane %v6032_v23, 5 }
  0x8e   : > { %5355 = vmatpush3.bf16.msra.mxu1 %v6049_v39  ;;  %5403 = vmatpush3.bf16.msra.mxu0 %v6054_v13  ;;  %v6341_v13 = vrot.slane %v1604_v21, 4  ;;  %v6362_v21 = vrot.slane %v1618_v27, 4  ;;  %v5666_v39 = vld [vmem:[%s7609_s1 + $0x168] sm:$0xff]  }
  0x8f   : > { %5278 = vmatprep.mubr.bf16.mxu1 %v6127_v45  ;;  %5326 = vmatprep.mubr.bf16.mxu0 %v6129_v32  ;;  %v7637_v45 = vrot.slane %v5932_v63, 5  ;;  %v7639_v63 = vsel %vm6027_vm2, %v6213_v34, %v6175_v5  ;;  %v7640_v5 = vsel %vm6027_vm2, %v6239_v31, %v6231_v20  ;;  %v7641_v34 = vsel %vm6027_vm2, %v6228_v57, %v6185_v26  ;;  %v2582_v26 = vld [vmem:[%s5762_s25 + $0x3c] sm:$0xe]  ;;  %v2583_v57 = vld [vmem:[%s5762_s25 + $0x48] sm:$0xe] }
  0x90   : > { %5356 = vmatprep.subr.bf16.mxu1 %v5648_v10  ;;  %5404 = vmatprep.subr.bf16.mxu0 %v5649_v42  ;;  %v1663_v31 = vshll.u32 %v6319_v3, 16 }
  0x91   : > { %v2665_v1 = vsel %vm6335_vm5, %v5995_v49, %v7637_v45  ;;  %v6376_v49 = vcombine.low %v7639_v63, %v1514_v15  ;;  %v5652_v45 = vld [vmem:[%s7609_s1 + $0x1e0] sm:$0xff]   ;;  %v6400_v15 = vcombine.low %v7641_v34, %v7640_v5  ;;  %v1628_v63 = vor.u32 %v6345_v46, %v6343_v12 }
  0x92   : > { %5357 = vmatpush3.bf16.msra.mxu1 %v5648_v10  ;;  %5405 = vmatpush3.bf16.msra.mxu0 %v5649_v42  ;;  %v6387_v27 = vcombine.low %v2662_v19, %v2665_v1  ;;  %v6402_v10 = vcombine.low %v1552_v41, %v1562_v37  ;;  %v4646_v42 = vrot.slane %v2580_v54, 9  ;;  %v2677_v37 = vrot.slane %v2675_v44, 4 }
  0x93   : > { %5358 = vmatprep.subr.bf16.mxu1 %v6316_v48  ;;  %5406 = vmatprep.subr.bf16.mxu0 %v5651_v28  ;;  %v1673_v1 = vshrl.u32 %v6348_v0, 16  ;;  %v4647_v54 = vrot.slane %v2581_v51, 9  ;;  %v2682_v19 = vrot.slane %v5987_v47, 5  ;;  %v4648_v34 = vrot.slane %v2582_v26, 9 }
  0x94   : > { %v2676_v41 = vsel %vm6335_vm5, %v4646_v42, %v2675_v44  ;;  %v2679_v5 = vsel %vm6335_vm5, %v2677_v37, %v2678_v58  ;;  %v2689_v42 = vrot.slane %v6011_v4, 5  ;;  %v2584_v44 = vld [vmem:[%s5762_s25 + $0x54] sm:$0xe]  ;;  %v4649_v26 = vrot.slane %v2583_v57, 9  ;;  %v2586_v37 = vld [vmem:[%s5762_s25 + $0x6c] sm:$0xe] }
  0x95   : > { %5279 = vmatmul.mubr.bf16.gmra.mxu1 %v6129_v32  ;;  %5327 = vmatmul.mubr.bf16.gmra.mxu0 %v6172_v17  ;;  %v6443_v51 = vcombine.low %v2676_v41, %v2679_v5  ;;  %v2683_v47 = vsel %vm6335_vm5, %v4647_v54, %v2682_v19  ;;  %v2684_v23 = vrot.slane %v2682_v19, 4  ;;  %v2696_v4 = vrot.slane %v6070_v55, 5  ;;  %v5656_v41 = vld [vmem:[%s7609_s1 + $0x1d0] sm:$0xff]  }
  0x96   : > { %5282 = vmatprep.mubr.bf16.mxu1 %v6172_v17  ;;  %5330 = vmatprep.mubr.bf16.mxu0 %v6178_v52  ;;  %v2690_v20 = vsel %vm6335_vm5, %v4648_v34, %v2689_v42  ;;  %v2691_v16 = vrot.slane %v2689_v42, 4  ;;  %v2699_v54 = vrot.slane %v6102_v8, 5  ;;  %v2703_v19 = vrot.slane %v6110_v14, 5  ;;  %v5657_v55 = vld [vmem:[%s7609_s1 + $0x90] sm:$0xff]   ;;  %v2587_v8 = vld [vmem:[%s5762_s25 + $0x78] sm:$0xe] }
  0x97   : > { %5359 = vmatpush3.bf16.msra.mxu1 %v6316_v48  ;;  %5407 = vmatpush3.bf16.msra.mxu0 %v5651_v28  ;;  %v2692_v48 = vrot.slane %v6067_v36, 5  ;;  %v2585_v28 = vld [vmem:[%s5762_s25 + $0x60] sm:$0xe]  ;;  %v2686_v58 = vsel %vm6335_vm5, %v2684_v23, %v2685_v50  ;;  %v4650_v36 = vrot.slane %v2584_v44, 9  ;;  %v2697_v50 = vsel %vm6335_vm5, %v4649_v26, %v2696_v4  ;;  %v2588_v44 = vld [vmem:[%s5762_s25 + $0x84] sm:$0xe] }
  0x98   : > { %5360 = vmatprep.subr.bf16.mxu1 %v5652_v45  ;;  %5408 = vmatprep.subr.bf16.mxu0 %v5653_v59  ;;  %v6463_v57 = vcombine.low %v2683_v47, %v2686_v58  ;;  %v2698_v34 = vrot.slane %v2696_v4, 4  ;;  %v4651_v47 = vrot.slane %v2585_v28, 9  ;;  %v2710_v23 = vrot.slane %v6120_v35, 5  ;;  %v5658_v35 = vld [vmem:[%s7609_s1 + $0x1c8] sm:$0xff]  }
  0x99   : > { %v2693_v5 = vsel %vm6335_vm5, %v2691_v16, %v2692_v48  ;;  %v2704_v14 = vsel %vm6335_vm5, %v4650_v36, %v2703_v19  ;;  %v4652_v26 = vrot.slane %v2586_v37, 9  ;;  %v2717_v4 = vrot.slane %v6149_v2, 5  ;;  %v5659_v2 = vld [vmem:[%s7609_s1 + $0x88] sm:$0xff]  }
  0x9a   : > { %v6470_v42 = vcombine.low %v2690_v20, %v2693_v5  ;;  %v2700_v16 = vsel %vm6335_vm5, %v2698_v34, %v2699_v54  ;;  %v2713_v20 = vrot.slane %v6164_v11, 5  ;;  %v2711_v28 = vsel %vm6335_vm5, %v4651_v47, %v2710_v23  ;;  %v7642_v54 = vld [vmem:[#allocation5_spill] sm:$0xff] }
  0x9b   : > { %5361 = vmatpush3.bf16.msra.mxu1 %v5652_v45  ;;  %5409 = vmatpush3.bf16.msra.mxu0 %v5653_v59  ;;  %v2705_v45 = vrot.slane %v2703_v19, 4  ;;  %v2706_v59 = vrot.slane %v6142_v7, 5  ;;  %v6484_v48 = vcombine.low %v2697_v50, %v2700_v16  ;;  %v2712_v58 = vrot.slane %v2710_v23, 4  ;;  %v7643_v19 = vld [vmem:[#allocation4_spill] sm:$0xff]  ;;  %v2589_v50 = vld [vmem:[%s5762_s25 + $0x90] sm:$0xe] }
  0x9c   : > { %5362 = vmatprep.subr.bf16.mxu1 %v5654_v38  ;;  %5410 = vmatprep.subr.bf16.mxu0 %v5655_v24  ;;  %v2720_v36 = vrot.slane %v7642_v54, 5  ;;  %v4653_v37 = vrot.slane %v2587_v8, 9  ;;  %v2724_v5 = vrot.slane %v7643_v19, 5  ;;  %v7645_v16 = vld [vmem:[#allocation6_spill] sm:$0xff] }
  0x9d   : > { %5283 = vmatmul.mubr.bf16.gmra.mxu1 %v6178_v52  ;;  %5331 = vmatmul.mubr.bf16.gmra.mxu0 %v6244_v9  ;;  %v2707_v7 = vsel %vm6335_vm5, %v2705_v45, %v2706_v59  ;;  %v2714_v34 = vsel %vm6335_vm5, %v2712_v58, %v2713_v20  ;;  %v4654_v59 = vrot.slane %v2588_v44, 9  ;;  %v2731_v47 = vrot.slane %v7645_v16, 5  ;;  %v2590_v23 = vld [vmem:[%s5762_s25 + $0x9c] sm:$0xe]  ;;  %v2591_v20 = vld [vmem:[%s5762_s25 + $0xa8] sm:$0xe] }
  0x9e   : > { %5286 = vmatprep.mubr.bf16.mxu1 %v6244_v9  ;;  %5334 = vmatprep.mubr.bf16.mxu0 %v6246_v53  ;;  %v6492_v11 = vcombine.low %v2704_v14, %v2707_v7  ;;  %v7644_v14 = vld [vmem:[#allocation7_spill] sm:$0xff]  ;;  %v6512_v54 = vcombine.low %v2711_v28, %v2714_v34 }
  0x9f   : > { %5363 = vmatpush3.bf16.msra.mxu1 %v5654_v38  ;;  %5411 = vmatpush3.bf16.msra.mxu0 %v5655_v24  ;;  %v2718_v38 = vsel %vm6335_vm5, %v4652_v26, %v2717_v4  ;;  %v2719_v24 = vrot.slane %v2717_v4, 4  ;;  %v2727_v45 = vrot.slane %v7644_v14, 5  ;;  %v5660_v7 = vld [vmem:[%s7609_s1 + $0x1c0] sm:$0xff]   ;;  %v2725_v26 = vsel %vm6335_vm5, %v4653_v37, %v2724_v5  ;;  %v7646_v14 = vld [vmem:[#allocation9_spill] sm:$0xff] }
  0xa0   : > { %5364 = vmatprep.subr.bf16.mxu1 %v5656_v41  ;;  %5412 = vmatprep.subr.bf16.mxu0 %v5657_v55  ;;  %v2726_v4 = vrot.slane %v2724_v5, 4  ;;  %v2732_v58 = vsel %vm6335_vm5, %v4654_v59, %v2731_v47  ;;  %v2733_v19 = vrot.slane %v2731_v47, 4  ;;  %v2734_v16 = vrot.slane %v7646_v14, 5  ;;  %v5661_v28 = vld [vmem:[%s7609_s1 + $0x80] sm:$0xff]   ;;  %v7650_v14 = vld [vmem:[#allocation12_spill] sm:$0xff] }
  0xa1   : > { %v2721_v8 = vsel %vm6335_vm5, %v2719_v24, %v2720_v36  ;;  %v7648_v24 = vld [vmem:[#allocation10_spill] sm:$0xff]  ;;  %v4656_v59 = vrot.slane %v2590_v23, 9  ;;  %v7649_v47 = vld [vmem:[#allocation11_spill] sm:$0xff] }
  0xa2   : > { %v6519_v44 = vcombine.low %v2718_v38, %v2721_v8  ;;  %v2728_v36 = vsel %vm6335_vm5, %v2726_v4, %v2727_v45  ;;  %v2741_v37 = vrot.slane %v7648_v24, 5  ;;  %v2735_v34 = vsel %vm6335_vm5, %v2733_v19, %v2734_v16  ;;  %v2592_v24 = vld [vmem:[%s5762_s25 + $0xb4] sm:$0xe] }
  0xa3   : > { %5365 = vmatpush3.bf16.msra.mxu1 %v5656_v41  ;;  %5413 = vmatpush3.bf16.msra.mxu0 %v5657_v55  ;;  %v4655_v41 = vrot.slane %v2589_v50, 9  ;;  %v7647_v55 = vld [vmem:[#allocation8_spill] sm:$0xff]  ;;  %v6533_v5 = vcombine.low %v2725_v26, %v2728_v36  ;;  %v2745_v8 = vrot.slane %v7649_v47, 5  ;;  %v6540_v50 = vcombine.low %v2732_v58, %v2735_v34  ;;  %v1286_v26 = vld [vmem:[%s5762_s25 + $0xb0] sm:$0x1] }
  0xa4   : > { %5366 = vmatprep.subr.bf16.mxu1 %v5658_v35  ;;  %5414 = vmatprep.subr.bf16.mxu0 %v5659_v2  ;;  %v2738_v38 = vrot.slane %v7647_v55, 5  ;;  %v2748_v55 = vrot.slane %v7650_v14, 5  ;;  %v4657_v16 = vrot.slane %v2591_v20, 9  ;;  %v2752_v36 = vrot.slane %v6294_v6, 5  ;;  %v1289_v47 = vld [vmem:[%s5762_s25 + $0xbc] sm:$0x1] }
  0xa5   : > { %5287 = vmatmul.mubr.bf16.gmra.mxu1 %v6246_v53  ;;  %5335 = vmatmul.mubr.bf16.gmra.mxu0 %v6376_v49  ;;  %v2746_v23 = vsel %vm6335_vm5, %v4656_v59, %v2745_v8  ;;  %v2747_v19 = vrot.slane %v2745_v8, 4  ;;  %v1629_v58 = vrot.slane %v1628_v63, 4  ;;  %v2755_v63 = vrot.slane %v1286_v26, 5  ;;  %v1290_v8 = vld [vmem:[%s5762_s25 + $0xc0] sm:$0xf] }
  0xa6   : > { %5290 = vmatprep.mubr.bf16.mxu1 %v6376_v49  ;;  %5338 = vmatprep.mubr.bf16.mxu0 %v6400_v15  ;;  %v2739_v45 = vsel %vm6335_vm5, %v4655_v41, %v2738_v38  ;;  %v2740_v4 = vrot.slane %v2738_v38, 4  ;;  %v1651_v41 = vrot.slane %v1649_v25, 4  ;;  %v2753_v20 = vsel %vm6335_vm5, %v4657_v16, %v2752_v36 }
  0xa7   : > { %5367 = vmatpush3.bf16.msra.mxu1 %v5658_v35  ;;  %5415 = vmatpush3.bf16.msra.mxu0 %v5659_v2  ;;  %v6557_v35 = vld [vmem:[%s7609_s1 + $0x178] sm:$0xff]   ;;  %v2749_v25 = vsel %vm6335_vm5, %v2747_v19, %v2748_v55  ;;  %v2754_v38 = vrot.slane %v2752_v36, 4  ;;  %v1624_v34 = vsel %vm6027_vm2, %v6362_v21, %v6343_v12  ;;  %v1655_v59 = vshll.u32 %v1286_v26, 16  ;;  %v6590_v19 = vld [vmem:[%s5762_s25 + $0xc4] sm:$0xf] }
  0xa8   : > { %5368 = vmatprep.subr.bf16.mxu1 %v5660_v7  ;;  %5416 = vmatprep.subr.bf16.mxu0 %v5661_v28  ;;  %v6562_v2 = vld [vmem:[%s7609_s1 + $0x238] sm:$0xff]   ;;  %v2742_v46 = vsel %vm6335_vm5, %v2740_v4, %v2741_v37  ;;  %v1662_v37 = vrot.slane %v1660_v18, 4  ;;  %v1665_v4 = vrot.slane %v1663_v31, 5  ;;  %v1671_v14 = vrot.slane %v1669_v40, 5 }
  0xa9   : > { %v6566_v6 = vcombine.low %v2739_v45, %v2742_v46  ;;  %v6581_v45 = vcombine.low %v2746_v23, %v2749_v25  ;;  %v1675_v55 = vrot.slane %v1673_v1, 4  ;;  %v2756_v12 = vsel %vm6335_vm5, %v2754_v38, %v2755_v63 }
  0xaa   : > { %v1642_v21 = vor.u32 %v6364_v60, %v6354_v62  ;;  %v1652_v18 = vor.u32 %v1651_v41, %v6384_v33  ;;  %v6599_v3 = vcombine.low %v2753_v20, %v2756_v12  ;;  %v4658_v31 = vrot.slane %v2592_v24, 9 }
  0xab   : > { %5369 = vmatpush3.bf16.msra.mxu1 %v5660_v7  ;;  %5417 = vmatpush3.bf16.msra.mxu0 %v5661_v28  ;;  %v1634_v40 = vsel %vm6027_vm2, %v1629_v58, %v6352_v61  ;;  %v1684_v1 = vshrl.u32 %v1290_v8, 16  ;;  %v2759_v60 = vrot.slane %v6348_v0, 5  ;;  %v2762_v62 = vrot.slane %v1289_v47, 5 }
  0xac   : > { %5450 = vmatprep.subr.bf16.mxu1 %v6557_v35  ;;  %5498 = vmatprep.subr.bf16.mxu0 %v6562_v2  ;;  %v1679_v7 = vshll.u32 %v1289_v47, 16  ;;  %v1687_v28 = vshll.u32 %v1290_v8, 16  ;;  %v1693_v26 = vshll.u32 %v6590_v19, 16  ;;  %v1697_v23 = vshrl.u32 %v6590_v19, 16 }
  0xad   : > { %5291 = vmatmul.mubr.bf16.gmra.mxu1 %v6400_v15  ;;  %5339 = vmatmul.mubr.bf16.gmra.mxu0 %v6402_v10  ;;  %v1666_v16 = vor.u32 %v1665_v4, %v1662_v37  ;;  %v1676_v36 = vor.u32 %v1675_v55, %v1671_v14  ;;  %v2760_v41 = vsel %vm6335_vm5, %v4658_v31, %v2759_v60  ;;  %v2761_v61 = vrot.slane %v2759_v60, 4  ;;  %v1292_v55 = vld [vmem:[%s5762_s25 + $0xc8] sm:$0x1]  ;;  %v2577_v31 = vld [vmem:[%s5762_s25] sm:$0xe] }
  0xae   : > { %5294 = vmatprep.mubr.bf16.mxu1 %v6402_v10  ;;  %5342 = vmatprep.mubr.bf16.mxu0 %v6406_v29  ;;  %v7651_v0 = vsel %vm6027_vm2, %v6341_v13, %v6332_v56  ;;  %v7652_v58 = vsel %vm6027_vm2, %v6330_v43, %v6260_v30  ;;  %v1643_v63 = vrot.slane %v1642_v21, 4  ;;  %v1657_v25 = vrot.slane %v1655_v59, 5 }
  0xaf   : > { %v6623_v46 = vcombine.low %v7652_v58, %v7651_v0  ;;  %v6625_v20 = vcombine.low %v1624_v34, %v1634_v40  ;;  %v1653_v38 = vrot.slane %v1652_v18, 4  ;;  %v1686_v24 = vrot.slane %v1684_v1, 4  ;;  %v6657_v0 = vld [vmem:[%s5762_s25 + $0xd0] sm:$0xf]  ;;  %v6660_v58 = vld [vmem:[%s5762_s25 + $0xd4] sm:$0x1] }
  0xb0   : > { %v2763_v47 = vsel %vm6335_vm5, %v2761_v61, %v2762_v62  ;;  %v1689_v37 = vrot.slane %v1687_v28, 5  ;;  %v1695_v8 = vrot.slane %v1693_v26, 5  ;;  %v1699_v56 = vrot.slane %v1697_v23, 4 }
  0xb1   : > { %v6629_v13 = vcombine.low %v2760_v41, %v2763_v47  ;;  %v1667_v4 = vrot.slane %v1666_v16, 4  ;;  %v1677_v30 = vrot.slane %v1676_v36, 4  ;;  %v1681_v43 = vrot.slane %v1679_v7, 5  ;;  %v5679_v41 = vld [vmem:[%s5762_s25 + $0x8] sm:$0x1] }
  0xb2   : > { %v1648_v34 = vsel %vm6027_vm2, %v1643_v63, %v6384_v33  ;;  %v1658_v59 = vsel %vm6027_vm2, %v1653_v38, %v1657_v25  ;;  %v1690_v12 = vor.u32 %v1689_v37, %v1686_v24  ;;  %v1700_v21 = vor.u32 %v1699_v56, %v1695_v8  ;;  %v5678_v33 = vld [vmem:[%s5762_s25 + $0x4] sm:$0xf]  ;;  %v2593_v47 = vld [vmem:[%s5762_s25 + $0xc0] sm:$0xe] }
  0xb3   : > { %v1703_v18 = vshll.u32 %v1292_v55, 16  ;;  %v1672_v40 = vsel %vm6027_vm2, %v1667_v4, %v1671_v14  ;;  %v1682_v1 = vsel %vm6027_vm2, %v1677_v30, %v1681_v43  ;;  %v2654_v60 = vrot.slane %v5678_v33, 5  ;;  %v2594_v43 = vld [vmem:[%s5762_s25 + $0xcc] sm:$0xe] }
  0xb4   : > { %v6647_v62 = vcombine.low %v1648_v34, %v1658_v59  ;;  %v4643_v7 = vrot.slane %v2577_v31, 9  ;;  %v6649_v28 = vcombine.low %v1672_v40, %v1682_v1  ;;  %v1691_v26 = vrot.slane %v1690_v12, 4  ;;  %v5680_v34 = vld [vmem:[%s5762_s25 + $0x1c] sm:$0xf] }
  0xb5   : > { %5295 = vmatmul.mubr.bf16.gmra.mxu1 %v6406_v29  ;;  %5343 = vmatmul.mubr.bf16.gmra.mxu0 %v6623_v46  ;;  %v1701_v23 = vrot.slane %v1700_v21, 4  ;;  %v1705_v16 = vrot.slane %v1703_v18, 5  ;;  %v2656_v36 = vrot.slane %v2654_v60, 4  ;;  %v2657_v61 = vrot.slane %v5679_v41, 5  ;;  %v2579_v18 = vld [vmem:[%s5762_s25 + $0x18] sm:$0xe] }
  0xb6   : > { %5298 = vmatprep.mubr.bf16.mxu1 %v6623_v46  ;;  %5346 = vmatprep.mubr.bf16.mxu0 %v6625_v20  ;;  %v2655_v14 = vsel %vm6335_vm5, %v4643_v7, %v2654_v60  ;;  %v2766_v63 = vrot.slane %v6590_v19, 5  ;;  %v1696_v25 = vsel %vm6027_vm2, %v1691_v26, %v1695_v8  ;;  %v2776_v24 = vrot.slane %v6660_v58, 5  ;;  %v7653_v41 = vld [vmem:[#allocation3_spill] sm:$0xff] }
  0xb7   : > { %v1706_v38 = vsel %vm6027_vm2, %v1701_v23, %v1705_v16  ;;  %v2773_v37 = vrot.slane %v6657_v0, 5  ;;  %v2658_v56 = vsel %vm6335_vm5, %v2656_v36, %v2657_v61  ;;  %v4659_v19 = vrot.slane %v2593_v47, 9  ;;  %v5681_v16 = vld [vmem:[%s5762_s25 + $0x20] sm:$0x1]  ;;  %v5674_v47 = vld [vmem:[%s7609_s1 + $0x148] sm:$0xff]  }
  0xb8   : > { %v2768_v4 = vrot.slane %v2766_v63, 4  ;;  %v2769_v30 = vrot.slane %v1292_v55, 5  ;;  %v2668_v59 = vrot.slane %v5680_v34, 5  ;;  %v4660_v12 = vrot.slane %v2594_v43, 9 }
  0xb9   : > { %v2775_v8 = vrot.slane %v2773_v37, 4  ;;  %v6676_v21 = vcombine.low %v1696_v25, %v1706_v38  ;;  %v2767_v31 = vsel %vm6335_vm5, %v4659_v19, %v2766_v63  ;;  %v4677_v1 = vcombine.low %v2655_v14, %v2658_v56  ;;  %v5664_v25 = vld [vmem:[%s7609_s1 + $0x170] sm:$0xff]   ;;  %v1293_v56 = vld [vmem:[%s5762_s25 + $0xcc] sm:$0xf] }
  0xba   : > { %v2770_v40 = vsel %vm6335_vm5, %v2768_v4, %v2769_v30  ;;  %v6687_v55 = vsel %vm6335_vm5, %v4660_v12, %v2773_v37  ;;  %v4645_v26 = vrot.slane %v2579_v18, 9  ;;  %v2670_v23 = vrot.slane %v2668_v59, 4  ;;  %v5665_v38 = vld [vmem:[%s7609_s1 + $0x230] sm:$0xff]   ;;  %v5675_v37 = vld [vmem:[%s7609_s1 + $0x208] sm:$0xff]  }
  0xbb   : > { %v6683_v33 = vcombine.low %v2767_v31, %v2770_v40  ;;  %v6691_v60 = vsel %vm6335_vm5, %v2775_v8, %v2776_v24  ;;  %v2671_v36 = vrot.slane %v5681_v16, 5  ;;  %v5667_v24 = vld [vmem:[%s7609_s1 + $0x228] sm:$0xff]   ;;  %v1717_v30 = vshll.u32 %v6657_v0, 16 }
  0xbc   : > { %v4742_v7 = vcombine.low %v6687_v55, %v6691_v60  ;;  %v2669_v61 = vsel %vm6335_vm5, %v4645_v26, %v2668_v59  ;;  %v1721_v43 = vshrl.u32 %v6657_v0, 16 }
  0xbd   : > { %5299 = vmatmul.mubr.bf16.gmra.mxu1 %v6625_v20  ;;  %5347 = vmatmul.mubr.bf16.gmra.mxu0 %v6647_v62  ;;  %v2672_v14 = vsel %vm6335_vm5, %v2670_v23, %v2671_v36  ;;  %v1719_v31 = vrot.slane %v1717_v30, 5  ;;  %v1727_v36 = vshll.u32 %v6660_v58, 16 }
  0xbe   : > { %5302 = vmatprep.mubr.bf16.mxu1 %v6647_v62  ;;  %5350 = vmatprep.mubr.bf16.mxu0 %v6649_v28  ;;  %v6703_v63 = vcombine.low %v2669_v61, %v2672_v14 }
  0xc5   : > { %5303 = vmatmul.mubr.bf16.gmra.mxu1 %v6649_v28  ;;  %5351 = vmatmul.mubr.bf16.gmra.mxu0 %v6676_v21 }
  0xc6   : > { %5370 = vmatprep.mubr.bf16.mxu1 %v7653_v41  ;;  %5418 = vmatprep.mubr.bf16.mxu0 %v4677_v1 }
  0xcd   : > { %5371 = vmatmul.mubr.bf16.vlgmr.msra.gmra.mxu1 %v6129_v32  ;;  %5419 = vmatmul.mubr.bf16.vlgmr.msra.gmra.mxu0 %v6387_v27  ;;  %v5668_v32 = vld [vmem:[%s7609_s1 + $0x160] sm:$0xff]  }
  0xce   : > { %5451 = vmatpush3.bf16.msra.mxu1 %v6557_v35  ;;  %5499 = vmatpush3.bf16.msra.mxu0 %v6562_v2  ;;  %v5670_v35 = vld [vmem:[%s7609_s1 + $0x158] sm:$0xff]  }
  0xcf   : > { %5374 = vmatprep.mubr.bf16.mxu1 %v6172_v17  ;;  %5422 = vmatprep.mubr.bf16.mxu0 %v6703_v63  ;;  %v5669_v17 = vld [vmem:[%s7609_s1 + $0x220] sm:$0xff]   ;;  %v5671_v2 = vld [vmem:[%s7609_s1 + $0x218] sm:$0xff]  }
  0xd0   : > { %5452 = vmatprep.subr.bf16.mxu1 %v5664_v25  ;;  %5500 = vmatprep.subr.bf16.mxu0 %v5665_v38 }
  0xd2   : > { %5453 = vmatpush3.bf16.msra.mxu1 %v5664_v25  ;;  %5501 = vmatpush3.bf16.msra.mxu0 %v5665_v38 }
  0xd3   : > { %5454 = vmatprep.subr.bf16.mxu1 %v5666_v39  ;;  %5502 = vmatprep.subr.bf16.mxu0 %v5667_v24 }
  0xd5   : > { %5375 = vmatmul.mubr.bf16.gmra.mxu1 %v6178_v52  ;;  %5423 = vmatmul.mubr.bf16.gmra.mxu0 %v6443_v51  ;;  %v5672_v52 = vld [vmem:[%s7609_s1 + $0x150] sm:$0xff]  }
  0xd6   : > { %5378 = vmatprep.mubr.bf16.mxu1 %v6244_v9  ;;  %5426 = vmatprep.mubr.bf16.mxu0 %v6463_v57  ;;  %v5673_v9 = vld [vmem:[%s7609_s1 + $0x210] sm:$0xff]  }
  0xd7   : > { %5455 = vmatpush3.bf16.msra.mxu1 %v5666_v39  ;;  %5503 = vmatpush3.bf16.msra.mxu0 %v5667_v24  ;;  %v1729_v39 = vrot.slane %v1727_v36, 5 }
  0xd8   : > { %5456 = vmatprep.subr.bf16.mxu1 %v5668_v32  ;;  %5504 = vmatprep.subr.bf16.mxu0 %v5669_v17 }
  0xdb   : > { %5457 = vmatpush3.bf16.msra.mxu1 %v5668_v32  ;;  %5505 = vmatpush3.bf16.msra.mxu0 %v5669_v17 }
  0xdc   : > { %5458 = vmatprep.subr.bf16.mxu1 %v5670_v35  ;;  %5506 = vmatprep.subr.bf16.mxu0 %v5671_v2 }
  0xdd   : > { %5379 = vmatmul.mubr.bf16.gmra.mxu1 %v6246_v53  ;;  %5427 = vmatmul.mubr.bf16.gmra.mxu0 %v6470_v42  ;;  %v5676_v53 = vld [vmem:[%s7609_s1 + $0x140] sm:$0xff]  }
  0xde   : > { %5382 = vmatprep.mubr.bf16.mxu1 %v6376_v49  ;;  %5430 = vmatprep.mubr.bf16.mxu0 %v6484_v48  ;;  %v5677_v49 = vld [vmem:[%s7609_s1 + $0x200] sm:$0xff]  }
  0xdf   : > { %5459 = vmatpush3.bf16.msra.mxu1 %v5670_v35  ;;  %5507 = vmatpush3.bf16.msra.mxu0 %v5671_v2 }
  0xe0   : > { %5460 = vmatprep.subr.bf16.mxu1 %v5672_v52  ;;  %5508 = vmatprep.subr.bf16.mxu0 %v5673_v9 }
  0xe3   : > { %5461 = vmatpush3.bf16.msra.mxu1 %v5672_v52  ;;  %5509 = vmatpush3.bf16.msra.mxu0 %v5673_v9 }
  0xe4   : > { %5462 = vmatprep.subr.bf16.mxu1 %v5674_v47  ;;  %5510 = vmatprep.subr.bf16.mxu0 %v5675_v37 }
  0xe5   : > { %5383 = vmatmul.mubr.bf16.gmra.mxu1 %v6400_v15  ;;  %5431 = vmatmul.mubr.bf16.gmra.mxu0 %v6492_v11  ;;  %v1708_v15 = vshrl.u32 %v1293_v56, 16 }
  0xe6   : > { %5386 = vmatprep.mubr.bf16.mxu1 %v6402_v10  ;;  %5434 = vmatprep.mubr.bf16.mxu0 %v6512_v54  ;;  %v1711_v10 = vshll.u32 %v1293_v56, 16 }
  0xe7   : > { %5463 = vmatpush3.bf16.msra.mxu1 %v5674_v47  ;;  %5511 = vmatpush3.bf16.msra.mxu0 %v5675_v37 }
  0xe8   : > { %5464 = vmatprep.subr.bf16.mxu1 %v5676_v53  ;;  %5512 = vmatprep.subr.bf16.mxu0 %v5677_v49  ;;  %v1713_v18 = vrot.slane %v1711_v10, 5 }
  0xeb   : > { %5465 = vmatpush3.bf16.msra.mxu1 %v5676_v53  ;;  %5513 = vmatpush3.bf16.msra.mxu0 %v5677_v49 }
  0xed   : > { %v6766_v19 = vpop.f32.mrf.mxu0  ;;  %v6768_v4 = vpop.f32.mrf.mxu1  ;;  %5387 = vmatmul.mubr.bf16.gmra.mxu1 %v6406_v29  ;;  %5435 = vmatmul.mubr.bf16.gmra.mxu0 %v6519_v44  ;;  %v1710_v29 = vrot.slane %v1708_v15, 4 }
  0xee   : > { %5390 = vmatprep.mubr.bf16.mxu1 %v6623_v46  ;;  %5438 = vmatprep.mubr.bf16.mxu0 %v6533_v5  ;;  %v1723_v46 = vrot.slane %v1721_v43, 4 }
  0xef   : > { %v6776_v34 = vpop.f32.mrf.mxu0  ;;  %v6778_v59 = vpop.f32.mrf.mxu1  ;;  %v1714_v0 = vor.u32 %v1713_v18, %v1710_v29 }
  0xf0   : > { %v1724_v16 = vor.u32 %v1723_v46, %v1719_v31 }
  0xf1   : > { %v6780_v12 = vpop.f32.mrf.mxu0  ;;  %v6782_v8 = vpop.f32.mrf.mxu1  ;;  %v1715_v38 = vrot.slane %v1714_v0, 4 }
  0xf3   : > { %v6784_v40 = vpop.f32.mrf.mxu0  ;;  %v6786_v1 = vpop.f32.mrf.mxu1  ;;  %v1720_v58 = vsel %vm6027_vm2, %v1715_v38, %v1719_v31 }
  0xf5   : > { %v6788_v26 = vpop.f32.mrf.mxu0  ;;  %v6790_v23 = vpop.f32.mrf.mxu1  ;;  %5391 = vmatmul.mubr.bf16.gmra.mxu1 %v6625_v20  ;;  %5439 = vmatmul.mubr.bf16.gmra.mxu0 %v6540_v50  ;;  %v1725_v20 = vrot.slane %v1724_v16, 4 }
  0xf6   : > { %5394 = vmatprep.mubr.bf16.mxu1 %v6647_v62  ;;  %5442 = vmatprep.mubr.bf16.mxu0 %v6566_v6 }
  0xf7   : > { %v6797_v41 = vpop.f32.mrf.mxu0  ;;  %v6799_v61 = vpop.f32.mrf.mxu1  ;;  %v1730_v35 = vsel %vm6027_vm2, %v1725_v20, %v1729_v39 }
  0xf9   : > { %v6801_v14 = vpop.f32.mrf.mxu0  ;;  %v6803_v25 = vpop.f32.mrf.mxu1 }
  0xfb   : > { %v6805_v24 = vpop.f32.mrf.mxu0  ;;  %v6807_v62 = vpop.f32.mrf.mxu1 }
  0xfd   : > { %v6809_v32 = vpop.f32.mrf.mxu0  ;;  %v6811_v17 = vpop.f32.mrf.mxu1  ;;  %5395 = vmatmul.mubr.bf16.gmra.mxu1 %v6649_v28  ;;  %5443 = vmatmul.mubr.bf16.gmra.mxu0 %v6581_v45  ;;  %v4634_v28 = vcombine.low %v1720_v58, %v1730_v35 }
  0xfe   : > { %5398 = vmatprep.mubr.bf16.mxu1 %v6676_v21  ;;  %5446 = vmatprep.mubr.bf16.mxu0 %v6599_v3 }
  0xff   : > { %v6821_v2 = vpop.f32.mrf.mxu0  ;;  %v6823_v52 = vpop.f32.mrf.mxu1 }
 0x101   : > { %v6825_v9 = vpop.f32.mrf.mxu0  ;;  %v6827_v47 = vpop.f32.mrf.mxu1 }
 0x103   : > { %v6829_v37 = vpop.f32.mrf.mxu0  ;;  %v6831_v21 = vpop.f32.mrf.mxu1 }
 0x105   : > { %v6833_v53 = vpop.f32.mrf.mxu0  ;;  %v6835_v49 = vpop.f32.mrf.mxu1  ;;  %5399 = vmatmul.mubr.bf16.gmra.mxu1 %v4634_v28  ;;  %5447 = vmatmul.mubr.bf16.gmra.mxu0 %v6629_v13 }
 0x106   : > { %5466 = vmatprep.mubr.bf16.mxu1 %v6387_v27  ;;  %5514 = vmatprep.mubr.bf16.mxu0 %v6703_v63 }
 0x107   : > { %v6840_v22 = vpop.f32.mrf.mxu0  ;;  %v6842_v56 = vpop.f32.mrf.mxu1 }
 0x109   : > { %v6844_v15 = vpop.f32.mrf.mxu0  ;;  %v6846_v10 = vpop.f32.mrf.mxu1 }
 0x10b   : > { %v6848_v30 = vpop.f32.mrf.mxu0  ;;  %v6850_v43 = vpop.f32.mrf.mxu1 }
 0x10d   : > { %v5180_v29 = vpop.f32.mrf.mxu1  ;;  %v5228_v18 = vpop.f32.mrf.mxu0  ;;  %5467 = vmatmul.mubr.bf16.vlgmr.msra.gmra.mxu1 %v6703_v63  ;;  %5515 = vmatmul.mubr.bf16.vlgmr.msra.gmra.mxu0 %v6443_v51 }
 0x10e   : > { %v948_v27 = vadd.f32 %v5180_v29, %v6766_v19  ;;  %5470 = vmatprep.mubr.bf16.mxu1 %v6443_v51  ;;  %5518 = vmatprep.mubr.bf16.mxu0 %v6463_v57 }
 0x10f   : > { %v819_v31 = vpop.f32.mrf.mxu1  ;;  %v1083_v46 = vpop.f32.mrf.mxu0 }
 0x110   : > { %v6857_v0 = vadd.f32 %v5228_v18, %v948_v27  ;;  %v946_v16 = vadd.f32 %v819_v31, %v6776_v34 }
 0x111   : > { %v5181_v36 = vpop.f32.mrf.mxu1  ;;  %v5229_v38 = vpop.f32.mrf.mxu0 }
 0x112   : > { %v6860_v20 = vadd.f32 %v1083_v46, %v946_v16  ;;  %v949_v63 = vadd.f32 %v5181_v36, %v6780_v12 }
 0x113   : > { %v822_v39 = vpop.f32.mrf.mxu1  ;;  %v1086_v58 = vpop.f32.mrf.mxu0 }
 0x114   : > { %v6863_v35 = vadd.f32 %v5229_v38, %v949_v63  ;;  %v947_v51 = vadd.f32 %v822_v39, %v6784_v40 }
 0x115   : > { %v5184_v19 = vpop.f32.mrf.mxu1  ;;  %v5232_v28 = vpop.f32.mrf.mxu0  ;;  %5471 = vmatmul.mubr.bf16.gmra.mxu1 %v6463_v57  ;;  %5519 = vmatmul.mubr.bf16.gmra.mxu0 %v6470_v42 }
 0x116   : > { %v6868_v29 = vadd.f32 %v1086_v58, %v947_v51  ;;  %v952_v34 = vadd.f32 %v5184_v19, %v6788_v26  ;;  %5474 = vmatprep.mubr.bf16.mxu1 %v6470_v42  ;;  %5522 = vmatprep.mubr.bf16.mxu0 %v6484_v48 }
 0x117   : > { %v835_v12 = vpop.f32.mrf.mxu1  ;;  %v1099_v18 = vpop.f32.mrf.mxu0 }
 0x118   : > { %v6873_v27 = vadd.f32 %v5232_v28, %v952_v34  ;;  %v950_v40 = vadd.f32 %v835_v12, %v6797_v41 }
 0x119   : > { %v5185_v31 = vpop.f32.mrf.mxu1  ;;  %v5233_v46 = vpop.f32.mrf.mxu0 }
 0x11a   : > { %v6876_v16 = vadd.f32 %v1099_v18, %v950_v40  ;;  %v953_v57 = vadd.f32 %v5185_v31, %v6801_v14 }
 0x11b   : > { %v838_v36 = vpop.f32.mrf.mxu1  ;;  %v1102_v38 = vpop.f32.mrf.mxu0 }
 0x11c   : > { %v6879_v63 = vadd.f32 %v5233_v46, %v953_v57  ;;  %v951_v42 = vadd.f32 %v838_v36, %v6805_v24 }
 0x11d   : > { %v5188_v26 = vpop.f32.mrf.mxu1  ;;  %v5236_v39 = vpop.f32.mrf.mxu0  ;;  %5475 = vmatmul.mubr.bf16.gmra.mxu1 %v6484_v48  ;;  %5523 = vmatmul.mubr.bf16.gmra.mxu0 %v6492_v11 }
 0x11e   : > { %v6884_v58 = vadd.f32 %v1102_v38, %v951_v42  ;;  %v956_v41 = vadd.f32 %v5188_v26, %v6809_v32  ;;  %5478 = vmatprep.mubr.bf16.mxu1 %v6492_v11  ;;  %5526 = vmatprep.mubr.bf16.mxu0 %v6512_v54 }
 0x11f   : > { %v851_v14 = vpop.f32.mrf.mxu1  ;;  %v1115_v51 = vpop.f32.mrf.mxu0 }
 0x120   : > { %v6889_v19 = vadd.f32 %v5236_v39, %v956_v41  ;;  %v954_v24 = vadd.f32 %v851_v14, %v6821_v2 }
 0x121   : > { %v5189_v28 = vpop.f32.mrf.mxu1  ;;  %v5237_v34 = vpop.f32.mrf.mxu0 }
 0x122   : > { %v6892_v12 = vadd.f32 %v1115_v51, %v954_v24  ;;  %v957_v48 = vadd.f32 %v5189_v28, %v6825_v9 }
 0x123   : > { %v854_v18 = vpop.f32.mrf.mxu1  ;;  %v1118_v40 = vpop.f32.mrf.mxu0 }
 0x124   : > { %v6895_v31 = vadd.f32 %v5237_v34, %v957_v48  ;;  %v955_v11 = vadd.f32 %v854_v18, %v6829_v37 }
 0x125   : > { %v5192_v32 = vpop.f32.mrf.mxu1  ;;  %v5240_v46 = vpop.f32.mrf.mxu0  ;;  %5479 = vmatmul.mubr.bf16.gmra.mxu1 %v6512_v54  ;;  %5527 = vmatmul.mubr.bf16.gmra.mxu0 %v6519_v44 }
 0x126   : > { %v6900_v57 = vadd.f32 %v1118_v40, %v955_v11  ;;  %v960_v2 = vadd.f32 %v5192_v32, %v6833_v53  ;;  %5482 = vmatprep.mubr.bf16.mxu1 %v6519_v44  ;;  %5530 = vmatprep.mubr.bf16.mxu0 %v6533_v5 }
 0x127   : > { %v867_v9 = vpop.f32.mrf.mxu1  ;;  %v1131_v36 = vpop.f32.mrf.mxu0 }
 0x128   : > { %v6905_v38 = vadd.f32 %v5240_v46, %v960_v2  ;;  %v958_v37 = vadd.f32 %v867_v9, %v6840_v22 }
 0x129   : > { %v5193_v42 = vpop.f32.mrf.mxu1  ;;  %v5241_v26 = vpop.f32.mrf.mxu0 }
 0x12a   : > { %v6908_v39 = vadd.f32 %v1131_v36, %v958_v37  ;;  %v961_v54 = vadd.f32 %v5193_v42, %v6844_v15 }
 0x12b   : > { %v870_v41 = vpop.f32.mrf.mxu1  ;;  %v1134_v14 = vpop.f32.mrf.mxu0 }
 0x12c   : > { %v6911_v51 = vadd.f32 %v5241_v26, %v961_v54  ;;  %v959_v44 = vadd.f32 %v870_v41, %v6848_v30 }
 0x12d   : > { %v5196_v53 = vpop.f32.mrf.mxu1  ;;  %v5244_v24 = vpop.f32.mrf.mxu0  ;;  %5483 = vmatmul.mubr.bf16.gmra.mxu1 %v6533_v5  ;;  %5531 = vmatmul.mubr.bf16.gmra.mxu0 %v6540_v50 }
 0x12e   : > { %v6916_v28 = vadd.f32 %v1134_v14, %v959_v44  ;;  %v964_v22 = vadd.f32 %v5196_v53, %v6768_v4  ;;  %5486 = vmatprep.mubr.bf16.mxu1 %v6540_v50  ;;  %5534 = vmatprep.mubr.bf16.mxu0 %v6566_v6 }
 0x12f   : > { %v883_v15 = vpop.f32.mrf.mxu1  ;;  %v1147_v34 = vpop.f32.mrf.mxu0 }
 0x130   : > { %v6921_v48 = vadd.f32 %v5244_v24, %v964_v22  ;;  %v962_v30 = vadd.f32 %v883_v15, %v6778_v59 }
 0x131   : > { %v5197_v18 = vpop.f32.mrf.mxu1  ;;  %v5245_v40 = vpop.f32.mrf.mxu0 }
 0x132   : > { %v6924_v11 = vadd.f32 %v1147_v34, %v962_v30  ;;  %v965_v5 = vadd.f32 %v5197_v18, %v6782_v8 }
 0x133   : > { %v886_v32 = vpop.f32.mrf.mxu1  ;;  %v1150_v46 = vpop.f32.mrf.mxu0 }
 0x134   : > { %v6927_v2 = vadd.f32 %v5245_v40, %v965_v5  ;;  %v963_v50 = vadd.f32 %v886_v32, %v6786_v1 }
 0x135   : > { %v5200_v4 = vpop.f32.mrf.mxu1  ;;  %v5248_v9 = vpop.f32.mrf.mxu0  ;;  %5487 = vmatmul.mubr.bf16.gmra.mxu1 %v6566_v6  ;;  %5535 = vmatmul.mubr.bf16.gmra.mxu0 %v6581_v45 }
 0x136   : > { %v6932_v36 = vadd.f32 %v1150_v46, %v963_v50  ;;  %v968_v59 = vadd.f32 %v5200_v4, %v6790_v23  ;;  %5490 = vmatprep.mubr.bf16.mxu1 %v6581_v45  ;;  %5538 = vmatprep.mubr.bf16.mxu0 %v6599_v3 }
 0x137   : > { %v899_v8 = vpop.f32.mrf.mxu1  ;;  %v1163_v37 = vpop.f32.mrf.mxu0 }
 0x138   : > { %v6937_v42 = vadd.f32 %v5248_v9, %v968_v59  ;;  %v966_v1 = vadd.f32 %v899_v8, %v6799_v61 }
 0x139   : > { %v5201_v26 = vpop.f32.mrf.mxu1  ;;  %v5249_v54 = vpop.f32.mrf.mxu0 }
 0x13a   : > { %v6940_v41 = vadd.f32 %v1163_v37, %v966_v1  ;;  %v969_v6 = vadd.f32 %v5201_v26, %v6803_v25 }
 0x13b   : > { %v902_v14 = vpop.f32.mrf.mxu1  ;;  %v1166_v44 = vpop.f32.mrf.mxu0 }
 0x13c   : > { %v6943_v53 = vadd.f32 %v5249_v54, %v969_v6  ;;  %v967_v45 = vadd.f32 %v902_v14, %v6807_v62 }
 0x13d   : > { %v5204_v23 = vpop.f32.mrf.mxu1  ;;  %v5252_v24 = vpop.f32.mrf.mxu0  ;;  %5491 = vmatmul.mubr.bf16.gmra.mxu1 %v6599_v3  ;;  %5539 = vmatmul.mubr.bf16.gmra.mxu0 %v6629_v13 }
 0x13e   : > { %v6948_v22 = vadd.f32 %v1166_v44, %v967_v45  ;;  %v972_v61 = vadd.f32 %v5204_v23, %v6811_v17  ;;  %5494 = vmatprep.mubr.bf16.mxu1 %v6629_v13  ;;  %5542 = vmatprep.mubr.bf16.mxu0 %v6683_v33 }
 0x13f   : > { %v915_v25 = vpop.f32.mrf.mxu1  ;;  %v1179_v15 = vpop.f32.mrf.mxu0 }
 0x140   : > { %v6953_v34 = vadd.f32 %v5252_v24, %v972_v61  ;;  %v970_v62 = vadd.f32 %v915_v25, %v6823_v52 }
 0x141   : > { %v5205_v30 = vpop.f32.mrf.mxu1  ;;  %v5253_v18 = vpop.f32.mrf.mxu0 }
 0x142   : > { %v6956_v40 = vadd.f32 %v1179_v15, %v970_v62  ;;  %v973_v3 = vadd.f32 %v5205_v30, %v6827_v47 }
 0x143   : > { %v918_v5 = vpop.f32.mrf.mxu1  ;;  %v1182_v32 = vpop.f32.mrf.mxu0 }
 0x144   : > { %v6959_v46 = vadd.f32 %v5253_v18, %v973_v3  ;;  %v971_v13 = vadd.f32 %v918_v5, %v6831_v21  ;;  %v5706_v18 = vmov 0  }
 0x145   : > { %v5208_v17 = vpop.f32.mrf.mxu1  ;;  %v5256_v50 = vpop.f32.mrf.mxu0  ;;  %5495 = vmatmul.mubr.bf16.gmra.mxu1 %v6683_v33  ;;  %5543 = vmatmul.mubr.bf16.gmra.mxu0 %v4742_v7  ;;  %3784 = vst [vmem:[%s6989_s16 + $0x18] sm:$0xf] %v5706_v18  ;;  %3778 = vst [vmem:[%s6989_s16] sm:$0xf] %v5706_v18 }
 0x146   : > { %v6966_v52 = vadd.f32 %v1182_v32, %v971_v13  ;;  %v976_v4 = vadd.f32 %v5208_v17, %v6835_v49  ;;  %3779 = vst [vmem:[%s6989_s16 + $0x4] sm:$0xf] %v5706_v18  ;;  %3780 = vst [vmem:[%s6989_s16 + $0x8] sm:$0x1] %v5706_v18 }
 0x147   : > { %v931_v9 = vpop.f32.mrf.mxu1  ;;  %v1195_v47 = vpop.f32.mrf.mxu0  ;;  %3781 = vst [vmem:[%s6989_s16 + $0xc] sm:$0xf] %v5706_v18  ;;  %3782 = vst [vmem:[%s6989_s16 + $0x10] sm:$0xf] %v5706_v18 }
 0x148   : > { %v6969_v59 = vadd.f32 %v5256_v50, %v976_v4  ;;  %v974_v8 = vadd.f32 %v931_v9, %v6842_v56  ;;  %3783 = vst [vmem:[%s6989_s16 + $0x14] sm:$0x1] %v5706_v18  ;;  %3785 = vst [vmem:[%s6989_s16 + $0x1c] sm:$0xf] %v5706_v18 }
 0x149   : > { %v5209_v37 = vpop.f32.mrf.mxu1  ;;  %v5257_v21 = vpop.f32.mrf.mxu0  ;;  %3786 = vst [vmem:[%s6989_s16 + $0x20] sm:$0x1] %v5706_v18  ;;  %3787 = vst [vmem:[%s6989_s16 + $0x24] sm:$0xf] %v5706_v18 }
 0x14a   : > { %v6972_v1 = vadd.f32 %v1195_v47, %v974_v8  ;;  %v977_v33 = vadd.f32 %v5209_v37, %v6846_v10  ;;  %3788 = vst [vmem:[%s6989_s16 + $0x28] sm:$0xf] %v5706_v18  ;;  %3789 = vst [vmem:[%s6989_s16 + $0x2c] sm:$0x1] %v5706_v18 }
 0x14b   : > { %v934_v26 = vpop.f32.mrf.mxu1  ;;  %v1198_v55 = vpop.f32.mrf.mxu0  ;;  %3790 = vst [vmem:[%s6989_s16 + $0x30] sm:$0xf] %v5706_v18  ;;  %3791 = vst [vmem:[%s6989_s16 + $0x34] sm:$0xf] %v5706_v18 }
 0x14c   : > { %v6975_v60 = vadd.f32 %v5257_v21, %v977_v33  ;;  %v975_v7 = vadd.f32 %v934_v26, %v6850_v43  ;;  %3792 = vst [vmem:[%s6989_s16 + $0x38] sm:$0x1] %v5706_v18  ;;  %3793 = vst [vmem:[%s6989_s16 + $0x3c] sm:$0xf] %v5706_v18 }
 0x14d   : > { %v5276_v49 = vpop.f32.mrf.mxu1  ;;  %v5324_v54 = vpop.f32.mrf.mxu0  ;;  %3794 = vst [vmem:[%s6989_s16 + $0x40] sm:$0xf] %v5706_v18  ;;  %3795 = vst [vmem:[%s6989_s16 + $0x44] sm:$0x1] %v5706_v18 }
 0x14e   : > { %v6978_v6 = vadd.f32 %v1198_v55, %v975_v7  ;;  %v2023_v14 = vadd.f32 %v5276_v49, %v6857_v0  ;;  %3796 = vst [vmem:[%s6989_s16 + $0x48] sm:$0xf] %v5706_v18  ;;  %3797 = vst [vmem:[%s6989_s16 + $0x4c] sm:$0xf] %v5706_v18 }
 0x14f   : > { %v1894_v56 = vpop.f32.mrf.mxu1  ;;  %v2156_v44 = vpop.f32.mrf.mxu0  ;;  %3798 = vst [vmem:[%s6989_s16 + $0x50] sm:$0x1] %v5706_v18  ;;  %3799 = vst [vmem:[%s6989_s16 + $0x54] sm:$0xf] %v5706_v18 }
 0x150   : > { %v6981_v45 = vadd.f32 %v5324_v54, %v2023_v14  ;;  %v2021_v23 = vadd.f32 %v1894_v56, %v6860_v20  ;;  %3800 = vst [vmem:[%s6989_s16 + $0x58] sm:$0xf] %v5706_v18  ;;  %3801 = vst [vmem:[%s6989_s16 + $0x5c] sm:$0x1] %v5706_v18 }
 0x151   : > { %v5277_v24 = vpop.f32.mrf.mxu1  ;;  %v5325_v10 = vpop.f32.mrf.mxu0  ;;  %3802 = vst [vmem:[%s6989_s16 + $0x60] sm:$0xf] %v5706_v18  ;;  %3803 = vst [vmem:[%s6989_s16 + $0x64] sm:$0xf] %v5706_v18 }
 0x152   : > { %v6991_v43 = vadd.f32 %v2156_v44, %v2021_v23  ;;  %v2024_v0 = vadd.f32 %v5277_v24, %v6863_v35  ;;  %3804 = vst [vmem:[%s6989_s16 + $0x68] sm:$0x1] %v5706_v18  ;;  %3805 = vst [vmem:[%s6989_s16 + $0x6c] sm:$0xf] %v5706_v18 }
 0x153   : > { %v1897_v20 = vpop.f32.mrf.mxu1  ;;  %v2159_v61 = vpop.f32.mrf.mxu0  ;;  %3806 = vst [vmem:[%s6989_s16 + $0x70] sm:$0xf] %v5706_v18  ;;  %3807 = vst [vmem:[%s6989_s16 + $0x74] sm:$0x1] %v5706_v18 }
 0x154   : > { %v6994_v25 = vadd.f32 %v5325_v10, %v2024_v0  ;;  %v2022_v15 = vadd.f32 %v1897_v20, %v6868_v29  ;;  %3808 = vst [vmem:[%s6989_s16 + $0x78] sm:$0xf] %v5706_v18  ;;  %3809 = vst [vmem:[%s6989_s16 + $0x7c] sm:$0xf] %v5706_v18 }
 0x155   : > { %v5280_v62 = vpop.f32.mrf.mxu1  ;;  %v5328_v30 = vpop.f32.mrf.mxu0  ;;  %3810 = vst [vmem:[%s6989_s16 + $0x80] sm:$0x1] %v5706_v18  ;;  %3811 = vst [vmem:[%s6989_s16 + $0x84] sm:$0xf] %v5706_v18 }
 0x156   : > { %3812 = vst [vmem:[%s6989_s16 + $0x88] sm:$0xf] %v5706_v18  ;;  %3813 = vst [vmem:[%s6989_s16 + $0x8c] sm:$0x1] %v5706_v18  ;;  %v7051_v35 = vadd.f32 %v2159_v61, %v2022_v15  ;;  %v2027_v29 = vadd.f32 %v5280_v62, %v6873_v27 }
 0x157   : > { %3814 = vst [vmem:[%s6989_s16 + $0x90] sm:$0xf] %v5706_v18  ;;  %3815 = vst [vmem:[%s6989_s16 + $0x94] sm:$0xf] %v5706_v18  ;;  %v1910_v3 = vpop.f32.mrf.mxu1  ;;  %v2172_v5 = vpop.f32.mrf.mxu0 }
 0x158   : > { %3816 = vst [vmem:[%s6989_s16 + $0x98] sm:$0x1] %v5706_v18  ;;  %3817 = vst [vmem:[%s6989_s16 + $0x9c] sm:$0xf] %v5706_v18  ;;  %v7054_v32 = vadd.f32 %v5328_v30, %v2027_v29  ;;  %v2025_v13 = vadd.f32 %v1910_v3, %v6876_v16 }
 0x159   : > { %3818 = vst [vmem:[%s6989_s16 + $0xa0] sm:$0xf] %v5706_v18  ;;  %3819 = vst [vmem:[%s6989_s16 + $0xa4] sm:$0x1] %v5706_v18  ;;  %v5281_v17 = vpop.f32.mrf.mxu1  ;;  %v5329_v50 = vpop.f32.mrf.mxu0 }
 0x15a   : > { %3820 = vst [vmem:[%s6989_s16 + $0xa8] sm:$0xf] %v5706_v18  ;;  %3821 = vst [vmem:[%s6989_s16 + $0xac] sm:$0xf] %v5706_v18  ;;  %v7057_v4 = vadd.f32 %v2172_v5, %v2025_v13  ;;  %v2028_v9 = vadd.f32 %v5281_v17, %v6879_v63 }
 0x15b   : > { %3822 = vst [vmem:[%s6989_s16 + $0xb0] sm:$0x1] %v5706_v18  ;;  %3823 = vst [vmem:[%s6989_s16 + $0xb4] sm:$0xf] %v5706_v18  ;;  %v1913_v47 = vpop.f32.mrf.mxu1  ;;  %v2175_v8 = vpop.f32.mrf.mxu0 }
 0x15c   : > { %3824 = vst [vmem:[%s6989_s16 + $0xb8] sm:$0xf] %v5706_v18  ;;  %3825 = vst [vmem:[%s6989_s16 + $0xbc] sm:$0x1] %v5706_v18  ;;  %v7060_v37 = vadd.f32 %v5329_v50, %v2028_v9  ;;  %v2026_v21 = vadd.f32 %v1913_v47, %v6884_v58 }
 0x15d   : > { %3826 = vst [vmem:[%s6989_s16 + $0xc0] sm:$0xf] %v5706_v18  ;;  %3827 = vst [vmem:[%s6989_s16 + $0xc4] sm:$0xf] %v5706_v18  ;;  %v5284_v33 = vpop.f32.mrf.mxu1  ;;  %v5332_v27 = vpop.f32.mrf.mxu0 }
 0x15e   : > { %3828 = vst [vmem:[%s6989_s16 + $0xc8] sm:$0x1] %v5706_v18  ;;  %3829 = vst [vmem:[%s6989_s16 + $0xcc] sm:$0xf] %v5706_v18  ;;  %v7063_v26 = vadd.f32 %v2175_v8, %v2026_v21  ;;  %v2031_v55 = vadd.f32 %v5284_v33, %v6889_v19 }
 0x15f   : > { %3830 = vst [vmem:[%s6989_s16 + $0xd0] sm:$0xf] %v5706_v18  ;;  %3831 = vst [vmem:[%s6989_s16 + $0xd4] sm:$0x1] %v5706_v18  ;;  %v1926_v7 = vpop.f32.mrf.mxu1  ;;  %v2188_v16 = vpop.f32.mrf.mxu0 }
 0x160   : > { %v7066_v49 = vadd.f32 %v5332_v27, %v2031_v55  ;;  %v2029_v54 = vadd.f32 %v1926_v7, %v6892_v12 }
 0x161   : > { %v5285_v14 = vpop.f32.mrf.mxu1  ;;  %v5333_v63 = vpop.f32.mrf.mxu0 }
 0x162   : > { %v7069_v56 = vadd.f32 %v2188_v16, %v2029_v54  ;;  %v2032_v44 = vadd.f32 %v5285_v14, %v6895_v31 }
 0x163   : > { %v1929_v23 = vpop.f32.mrf.mxu1  ;;  %v2191_v58 = vpop.f32.mrf.mxu0 }
 0x164   : > { %v7072_v24 = vadd.f32 %v5333_v63, %v2032_v44  ;;  %v2030_v10 = vadd.f32 %v1929_v23, %v6900_v57 }
 0x165   : > { %v5288_v0 = vpop.f32.mrf.mxu1  ;;  %v5336_v19 = vpop.f32.mrf.mxu0 }
 0x166   : > { %v7075_v20 = vadd.f32 %v2191_v58, %v2030_v10  ;;  %v2035_v61 = vadd.f32 %v5288_v0, %v6905_v38 }
 0x167   : > { %v1942_v15 = vpop.f32.mrf.mxu1  ;;  %v2204_v12 = vpop.f32.mrf.mxu0 }
 0x168   : > { %v7078_v62 = vadd.f32 %v5336_v19, %v2035_v61  ;;  %v2033_v30 = vadd.f32 %v1942_v15, %v6908_v39 }
 0x169   : > { %v5289_v18 = vpop.f32.mrf.mxu1  ;;  %v5337_v31 = vpop.f32.mrf.mxu0 }
 0x16a   : > { %v7081_v29 = vadd.f32 %v2204_v12, %v2033_v30  ;;  %v2036_v3 = vadd.f32 %v5289_v18, %v6911_v51 }
 0x16b   : > { %v1945_v5 = vpop.f32.mrf.mxu1  ;;  %v2207_v57 = vpop.f32.mrf.mxu0 }
 0x16c   : > { %v7084_v13 = vadd.f32 %v5337_v31, %v2036_v3  ;;  %v2034_v17 = vadd.f32 %v1945_v5, %v6916_v28 }
 0x16d   : > { %v5292_v50 = vpop.f32.mrf.mxu1  ;;  %v5340_v38 = vpop.f32.mrf.mxu0 }
 0x16e   : > { %v7087_v9 = vadd.f32 %v2207_v57, %v2034_v17  ;;  %v2039_v47 = vadd.f32 %v5292_v50, %v6921_v48 }
 0x16f   : > { %v1958_v8 = vpop.f32.mrf.mxu1  ;;  %v2220_v39 = vpop.f32.mrf.mxu0 }
 0x170   : > { %v7090_v21 = vadd.f32 %v5340_v38, %v2039_v47  ;;  %v2037_v33 = vadd.f32 %v1958_v8, %v6924_v11 }
 0x171   : > { %v5293_v27 = vpop.f32.mrf.mxu1  ;;  %v5341_v51 = vpop.f32.mrf.mxu0 }
 0x172   : > { %v7093_v55 = vadd.f32 %v2220_v39, %v2037_v33  ;;  %v2040_v7 = vadd.f32 %v5293_v27, %v6927_v2 }
 0x173   : > { %v1961_v16 = vpop.f32.mrf.mxu1  ;;  %v2223_v28 = vpop.f32.mrf.mxu0 }
 0x174   : > { %v7096_v54 = vadd.f32 %v5341_v51, %v2040_v7  ;;  %v2038_v14 = vadd.f32 %v1961_v16, %v6932_v36 }
 0x175   : > { %v5296_v63 = vpop.f32.mrf.mxu1  ;;  %v5344_v48 = vpop.f32.mrf.mxu0 }
 0x176   : > { %v7099_v44 = vadd.f32 %v2223_v28, %v2038_v14  ;;  %v2043_v23 = vadd.f32 %v5296_v63, %v6937_v42 }
 0x177   : > { %v1974_v58 = vpop.f32.mrf.mxu1  ;;  %v2236_v11 = vpop.f32.mrf.mxu0 }
 0x178   : > { %v7102_v10 = vadd.f32 %v5344_v48, %v2043_v23  ;;  %v2041_v0 = vadd.f32 %v1974_v58, %v6940_v41 }
 0x179   : > { %v5297_v19 = vpop.f32.mrf.mxu1  ;;  %v5345_v2 = vpop.f32.mrf.mxu0 }
 0x17a   : > { %v7105_v61 = vadd.f32 %v2236_v11, %v2041_v0  ;;  %v2044_v15 = vadd.f32 %v5297_v19, %v6943_v53 }
 0x17b   : > { %v1977_v12 = vpop.f32.mrf.mxu1  ;;  %v2239_v36 = vpop.f32.mrf.mxu0 }
 0x17c   : > { %v7108_v30 = vadd.f32 %v5345_v2, %v2044_v15  ;;  %v2042_v18 = vadd.f32 %v1977_v12, %v6948_v22 }
 0x17d   : > { %v5300_v31 = vpop.f32.mrf.mxu1  ;;  %v5348_v42 = vpop.f32.mrf.mxu0 }
 0x17e   : > { %v7111_v3 = vadd.f32 %v2239_v36, %v2042_v18  ;;  %v2047_v5 = vadd.f32 %v5300_v31, %v6953_v34 }
 0x17f   : > { %v1990_v57 = vpop.f32.mrf.mxu1  ;;  %v2252_v41 = vpop.f32.mrf.mxu0 }
 0x180   : > { %v7114_v17 = vadd.f32 %v5348_v42, %v2047_v5  ;;  %v2045_v50 = vadd.f32 %v1990_v57, %v6956_v40 }
 0x181   : > { %v5301_v38 = vpop.f32.mrf.mxu1  ;;  %v5349_v53 = vpop.f32.mrf.mxu0 }
 0x182   : > { %v7117_v47 = vadd.f32 %v2252_v41, %v2045_v50  ;;  %v2048_v8 = vadd.f32 %v5301_v38, %v6959_v46 }
 0x183   : > { %v1993_v39 = vpop.f32.mrf.mxu1  ;;  %v2255_v22 = vpop.f32.mrf.mxu0 }
 0x184   : > { %v7120_v33 = vadd.f32 %v5349_v53, %v2048_v8  ;;  %v2046_v27 = vadd.f32 %v1993_v39, %v6966_v52 }
 0x185   : > { %v5304_v51 = vpop.f32.mrf.mxu1  ;;  %v5352_v34 = vpop.f32.mrf.mxu0 }
 0x186   : > { %v7123_v7 = vadd.f32 %v2255_v22, %v2046_v27  ;;  %v2051_v16 = vadd.f32 %v5304_v51, %v6969_v59 }
 0x187   : > { %v2006_v28 = vpop.f32.mrf.mxu1  ;;  %v2268_v40 = vpop.f32.mrf.mxu0 }
 0x188   : > { %v7126_v14 = vadd.f32 %v5352_v34, %v2051_v16  ;;  %v2049_v63 = vadd.f32 %v2006_v28, %v6972_v1 }
 0x189   : > { %v5305_v48 = vpop.f32.mrf.mxu1  ;;  %v5353_v46 = vpop.f32.mrf.mxu0 }
 0x18a   : > { %v7129_v23 = vadd.f32 %v2268_v40, %v2049_v63  ;;  %v2052_v58 = vadd.f32 %v5305_v48, %v6975_v60 }
 0x18b   : > { %v2009_v11 = vpop.f32.mrf.mxu1  ;;  %v2271_v52 = vpop.f32.mrf.mxu0 }
 0x18c   : > { %v7132_v0 = vadd.f32 %v5353_v46, %v2052_v58  ;;  %v2050_v19 = vadd.f32 %v2009_v11, %v6978_v6 }
 0x18d   : > { %v7135_v2 = vpop.f32.mrf.mxu1  ;;  %v7137_v59 = vpop.f32.mrf.mxu0 }
 0x18e   : > { %v7139_v15 = vadd.f32 %v2271_v52, %v2050_v19 }
 0x18f   : > { %v7141_v12 = vpop.f32.mrf.mxu1  ;;  %v7143_v1 = vpop.f32.mrf.mxu0 }
 0x191   : > { %v7145_v36 = vpop.f32.mrf.mxu1  ;;  %v7147_v18 = vpop.f32.mrf.mxu0 }
 0x193   : > { %v7149_v60 = vpop.f32.mrf.mxu1  ;;  %v7151_v31 = vpop.f32.mrf.mxu0 }
 0x195   : > { %v7153_v42 = vpop.f32.mrf.mxu1  ;;  %v7155_v6 = vpop.f32.mrf.mxu0 }
 0x197   : > { %v7157_v5 = vpop.f32.mrf.mxu1  ;;  %v7159_v57 = vpop.f32.mrf.mxu0 }
 0x199   : > { %v5377_v41 = vpop.f32.mrf.mxu1  ;;  %v5425_v50 = vpop.f32.mrf.mxu0 }
 0x19a   : > { %v2552_v38 = vadd.f32 %v5377_v41, %v7060_v37 }
 0x19b   : > { %v2437_v53 = vpop.f32.mrf.mxu1  ;;  %v2960_v8 = vpop.f32.mrf.mxu0 }
 0x19c   : > { %v7162_v39 = vadd.f32 %v5425_v50, %v2552_v38  ;;  %v2550_v22 = vadd.f32 %v2437_v53, %v7063_v26 }
 0x19d   : > { %v5380_v27 = vpop.f32.mrf.mxu1  ;;  %v5428_v51 = vpop.f32.mrf.mxu0 }
 0x19e   : > { %v7165_v34 = vadd.f32 %v2960_v8, %v2550_v22  ;;  %v2555_v16 = vadd.f32 %v5380_v27, %v7066_v49 }
 0x19f   : > { %v2450_v28 = vpop.f32.mrf.mxu1  ;;  %v2973_v40 = vpop.f32.mrf.mxu0 }
 0x1a0   : > { %v7168_v63 = vadd.f32 %v5428_v51, %v2555_v16  ;;  %v2553_v48 = vadd.f32 %v2450_v28, %v7069_v56 }
 0x1a1   : > { %v5381_v46 = vpop.f32.mrf.mxu1  ;;  %v5429_v37 = vpop.f32.mrf.mxu0 }
 0x1a2   : > { %v7171_v58 = vadd.f32 %v2973_v40, %v2553_v48  ;;  %v2556_v11 = vadd.f32 %v5381_v46, %v7072_v24 }
 0x1a3   : > { %v2453_v52 = vpop.f32.mrf.mxu1  ;;  %v2976_v26 = vpop.f32.mrf.mxu0 }
 0x1a4   : > { %v7174_v19 = vadd.f32 %v5429_v37, %v2556_v11  ;;  %v2554_v41 = vadd.f32 %v2453_v52, %v7075_v20 }
 0x1a5   : > { %v5384_v50 = vpop.f32.mrf.mxu1  ;;  %v5432_v49 = vpop.f32.mrf.mxu0 }
 0x1a6   : > { %v7177_v38 = vadd.f32 %v2976_v26, %v2554_v41  ;;  %v2559_v53 = vadd.f32 %v5384_v50, %v7078_v62 }
 0x1a7   : > { %v2466_v8 = vpop.f32.mrf.mxu1  ;;  %v2989_v56 = vpop.f32.mrf.mxu0 }
 0x1a8   : > { %v7180_v22 = vadd.f32 %v5432_v49, %v2559_v53  ;;  %v2557_v27 = vadd.f32 %v2466_v8, %v7081_v29 }
 0x1a9   : > { %v5385_v51 = vpop.f32.mrf.mxu1  ;;  %v5433_v24 = vpop.f32.mrf.mxu0 }
 0x1aa   : > { %v7183_v16 = vadd.f32 %v2989_v56, %v2557_v27  ;;  %v2560_v28 = vadd.f32 %v5385_v51, %v7084_v13 }
 0x1ab   : > { %v2469_v40 = vpop.f32.mrf.mxu1  ;;  %v2992_v20 = vpop.f32.mrf.mxu0 }
 0x1ac   : > { %v7186_v48 = vadd.f32 %v5433_v24, %v2560_v28  ;;  %v2558_v46 = vadd.f32 %v2469_v40, %v7087_v9 }
 0x1ad   : > { %v5388_v37 = vpop.f32.mrf.mxu1  ;;  %v5436_v62 = vpop.f32.mrf.mxu0 }
 0x1ae   : > { %v7189_v11 = vadd.f32 %v2992_v20, %v2558_v46  ;;  %v2563_v52 = vadd.f32 %v5388_v37, %v7090_v21 }
 0x1af   : > { %v2482_v26 = vpop.f32.mrf.mxu1  ;;  %v3005_v29 = vpop.f32.mrf.mxu0 }
 0x1b0   : > { %v7192_v41 = vadd.f32 %v5436_v62, %v2563_v52  ;;  %v2561_v50 = vadd.f32 %v2482_v26, %v7093_v55 }
 0x1b1   : > { %v5389_v49 = vpop.f32.mrf.mxu1  ;;  %v5437_v13 = vpop.f32.mrf.mxu0 }
 0x1b2   : > { %v7195_v53 = vadd.f32 %v3005_v29, %v2561_v50  ;;  %v2564_v8 = vadd.f32 %v5389_v49, %v7096_v54 }
 0x1b3   : > { %v2485_v56 = vpop.f32.mrf.mxu1  ;;  %v3008_v9 = vpop.f32.mrf.mxu0 }
 0x1b4   : > { %v7198_v27 = vadd.f32 %v5437_v13, %v2564_v8  ;;  %v2562_v51 = vadd.f32 %v2485_v56, %v7099_v44 }
 0x1b5   : > { %v5392_v24 = vpop.f32.mrf.mxu1  ;;  %v5440_v21 = vpop.f32.mrf.mxu0 }
 0x1b6   : > { %v7201_v28 = vadd.f32 %v3008_v9, %v2562_v51  ;;  %v2567_v40 = vadd.f32 %v5392_v24, %v7102_v10 }
 0x1b7   : > { %v2498_v20 = vpop.f32.mrf.mxu1  ;;  %v3021_v55 = vpop.f32.mrf.mxu0 }
 0x1b8   : > { %v7204_v46 = vadd.f32 %v5440_v21, %v2567_v40  ;;  %v2565_v37 = vadd.f32 %v2498_v20, %v7105_v61 }
 0x1b9   : > { %v5393_v62 = vpop.f32.mrf.mxu1  ;;  %v5441_v54 = vpop.f32.mrf.mxu0 }
 0x1ba   : > { %v7207_v52 = vadd.f32 %v3021_v55, %v2565_v37  ;;  %v2568_v26 = vadd.f32 %v5393_v62, %v7108_v30 }
 0x1bb   : > { %v2501_v29 = vpop.f32.mrf.mxu1  ;;  %v3024_v44 = vpop.f32.mrf.mxu0 }
 0x1bc   : > { %v7210_v50 = vadd.f32 %v5441_v54, %v2568_v26  ;;  %v2566_v49 = vadd.f32 %v2501_v29, %v7111_v3 }
 0x1bd   : > { %v5396_v13 = vpop.f32.mrf.mxu1  ;;  %v5444_v10 = vpop.f32.mrf.mxu0 }
 0x1be   : > { %v7213_v8 = vadd.f32 %v3024_v44, %v2566_v49  ;;  %v2571_v56 = vadd.f32 %v5396_v13, %v7114_v17  ;;  %v2547_v49 = vadd.f32 %v7135_v2, %v6981_v45  ;;  %v2548_v45 = vadd.f32 %v7145_v36, %v6994_v25 }
 0x1bf   : > { %v2514_v9 = vpop.f32.mrf.mxu1  ;;  %v3037_v61 = vpop.f32.mrf.mxu0 }
 0x1c0   : > { %v7216_v51 = vadd.f32 %v5444_v10, %v2571_v56  ;;  %v2569_v24 = vadd.f32 %v2514_v9, %v7117_v47 }
 0x1c1   : > { %v5397_v21 = vpop.f32.mrf.mxu1  ;;  %v5445_v30 = vpop.f32.mrf.mxu0 }
 0x1c2   : > { %v7219_v40 = vadd.f32 %v3037_v61, %v2569_v24  ;;  %v2572_v20 = vadd.f32 %v5397_v21, %v7120_v33  ;;  %v3070_v21 = vadd.f32 %v7137_v59, %v2547_v49  ;;  %v7252_v59 = vld [vmem:[%s7610_s2] ss:$0 sm:$0xff] }
 0x1c3   : > { %v2517_v55 = vpop.f32.mrf.mxu1  ;;  %v3040_v3 = vpop.f32.mrf.mxu0 }
 0x1c4   : > { %v7222_v37 = vadd.f32 %v5445_v30, %v2572_v20  ;;  %v2570_v62 = vadd.f32 %v2517_v55, %v7123_v7  ;;  %v2545_v7 = vadd.f32 %v7141_v12, %v6991_v43  ;;  %v2546_v43 = vadd.f32 %v7149_v60, %v7051_v35 }
 0x1c5   : > { %v5400_v54 = vpop.f32.mrf.mxu1  ;;  %v5448_v17 = vpop.f32.mrf.mxu0 }
 0x1c6   : > { %v7225_v26 = vadd.f32 %v3040_v3, %v2570_v62  ;;  %v2575_v29 = vadd.f32 %v5400_v54, %v7126_v14  ;;  %v3068_v55 = vadd.f32 %v7143_v1, %v2545_v7  ;;  %v3071_v3 = vadd.f32 %v7147_v18, %v2548_v45 }
 0x1c7   : > { %v2530_v44 = vpop.f32.mrf.mxu1  ;;  %v3053_v47 = vpop.f32.mrf.mxu0  ;;  %v2551_v1 = vadd.f32 %v7153_v42, %v7054_v32  ;;  %v3069_v35 = vadd.f32 %v7151_v31, %v2546_v43 }
 0x1c8   : > { %v7230_v13 = vadd.f32 %v5448_v17, %v2575_v29  ;;  %v2573_v33 = vadd.f32 %v2530_v44, %v7129_v23 }
 0x1c9   : > { %v5401_v10 = vpop.f32.mrf.mxu1  ;;  %v5449_v56 = vpop.f32.mrf.mxu0  ;;  %v3074_v32 = vadd.f32 %v7155_v6, %v2551_v1 }
 0x1ca   : > { %v7235_v9 = vadd.f32 %v3053_v47, %v2573_v33  ;;  %v2576_v61 = vadd.f32 %v5401_v10, %v7132_v0  ;;  %v2549_v47 = vadd.f32 %v7157_v5, %v7057_v4 }
 0x1cb   : > { %v2533_v24 = vpop.f32.mrf.mxu1  ;;  %v3056_v14 = vpop.f32.mrf.mxu0 }
 0x1cc   : > { %v7241_v2 = vadd.f32 %v5449_v56, %v2576_v61  ;;  %v2574_v23 = vadd.f32 %v2533_v24, %v7139_v15  ;;  %v3072_v4 = vadd.f32 %v7159_v57, %v2549_v47 }
 0x1cd   : > { %v5468_v30 = vpop.f32.mrf.mxu1  ;;  %v5516_v20 = vpop.f32.mrf.mxu0 }
 0x1ce   : > { %v7247_v12 = vadd.f32 %v3056_v14, %v2574_v23  ;;  %v3332_v0 = vadd.f32 %v5468_v30, %v3070_v21 }
 0x1cf   : > { %v3203_v25 = vpop.f32.mrf.mxu1  ;;  %v3465_v36 = vpop.f32.mrf.mxu0 }
 0x1d0   : > { %v3594_v15 = vadd.f32 %v5516_v20, %v3332_v0  ;;  %v3330_v62 = vadd.f32 %v3203_v25, %v3068_v55 }
 0x1d1   : > { %v5469_v54 = vpop.f32.mrf.mxu1  ;;  %v5517_v17 = vpop.f32.mrf.mxu0 }
 0x1d2   : > { %v3700_v60 = vadd.f32 %v7252_v59, %v3594_v15  ;;  %v3592_v29 = vadd.f32 %v3465_v36, %v3330_v62  ;;  %v3333_v44 = vadd.f32 %v5469_v54, %v3071_v3 }
 0x1d3   : > { %v3206_v49 = vpop.f32.mrf.mxu1  ;;  %v3468_v33 = vpop.f32.mrf.mxu0 }
 0x1d4   : > { %v3732_v10 = vmax.f32 %v3700_v60, 0.0  ;;  %v3698_v18 = vadd.f32 %v7252_v59, %v3592_v29  ;;  %v3595_v56 = vadd.f32 %v5517_v17, %v3333_v44  ;;  %v3331_v7 = vadd.f32 %v3206_v49, %v3069_v35  ;;  %v4789_v17 = vld [vmem:[%s6989_s16 + $0x18] sm:$0xf] }
 0x1d5   : > { %v5472_v42 = vpop.f32.mrf.mxu1  ;;  %v5520_v31 = vpop.f32.mrf.mxu0 }
 0x1d6   : > { %v4868_v61 = vpack.c.bf16 %v3732_v10, %v3732_v10  ;;  %v3730_v24 = vmax.f32 %v3698_v18, 0.0  ;;  %v3701_v14 = vadd.f32 %v7252_v59, %v3595_v56  ;;  %v3593_v21 = vadd.f32 %v3468_v33, %v3331_v7  ;;  %v4784_v7 = vld [vmem:[%s6989_s16 + $0xc] sm:$0xf] }
 0x1d7   : > { %v3336_v5 = vadd.f32 %v5472_v42, %v3074_v32  ;;  %v3219_v45 = vpop.f32.mrf.mxu1  ;;  %v3481_v23 = vpop.f32.mrf.mxu0 }
 0x1d8   : > { %v3933_v30 = vshrl.u32 %v4868_v61, 16  ;;  %v4866_v20 = vpack.c.bf16 %v3730_v24, %v3730_v24  ;;  %v3733_v6 = vmax.f32 %v3701_v14, 0.0  ;;  %v3936_v55 = vshll.u32 %v4868_v61, 16 }
 0x1d9   : > { %v3699_v43 = vadd.f32 %v7252_v59, %v3593_v21  ;;  %v3598_v0 = vadd.f32 %v5520_v31, %v3336_v5  ;;  %v3334_v25 = vadd.f32 %v3219_v45, %v3072_v4  ;;  %v5473_v36 = vpop.f32.mrf.mxu1  ;;  %v5521_v3 = vpop.f32.mrf.mxu0 }
 0x1da   : > { %v3935_v15 = vrot.slane %v3933_v30, 7  ;;  %v3916_v57 = vshrl.u32 %v4866_v20, 16  ;;  %v3919_v62 = vshll.u32 %v4866_v20, 16  ;;  %v4869_v1 = vpack.c.bf16 %v3733_v6, %v3733_v6  ;;  %v4792_v30 = vld [vmem:[%s6989_s16 + $0x20] sm:$0x1] }
 0x1db   : > { %v3731_v35 = vmax.f32 %v3699_v43, 0.0  ;;  %v3704_v60 = vadd.f32 %v7252_v59, %v3598_v0  ;;  %v3596_v29 = vadd.f32 %v3481_v23, %v3334_v25  ;;  %v3337_v44 = vadd.f32 %v5473_v36, %v7162_v39  ;;  %v3222_v47 = vpop.f32.mrf.mxu1  ;;  %v3484_v49 = vpop.f32.mrf.mxu0 }
 0x1dc   : > { %v3938_v33 = vor.u32 %v3936_v55, %v3935_v15  ;;  %v3939_v10 = vrot.slane %v3935_v15, 4  ;;  %v3918_v18 = vrot.slane %v3916_v57, 7  ;;  %v3941_v56 = vshrl.u32 %v4869_v1, 16 }
 0x1dd   : > { %v3944_v32 = vshll.u32 %v4869_v1, 16  ;;  %v4867_v42 = vpack.c.bf16 %v3731_v35, %v3731_v35  ;;  %v3736_v31 = vmax.f32 %v3704_v60, 0.0  ;;  %v3702_v61 = vadd.f32 %v7252_v59, %v3596_v29  ;;  %v5476_v24 = vpop.f32.mrf.mxu1  ;;  %v5524_v14 = vpop.f32.mrf.mxu0 }
 0x1de   : > { %v4249_v21 = vsel %vm7268_vm11, %v3938_v33, %v4789_v17  ;;  %v3921_v39 = vor.u32 %v3919_v62, %v3918_v18  ;;  %v3922_v4 = vrot.slane %v3918_v18, 4  ;;  %v3943_v45 = vrot.slane %v3941_v56, 7 }
 0x1df   : > { %4790 = vst [vmem:[%s6989_s16 + $0x18] sm:$0xf] %v4249_v21  ;;  %v3924_v20 = vshrl.u32 %v4867_v42, 16  ;;  %v3927_v6 = vshll.u32 %v4867_v42, 16  ;;  %v4872_v55 = vpack.c.bf16 %v3736_v31, %v3736_v31  ;;  %v3734_v43 = vmax.f32 %v3702_v61, 0.0  ;;  %v3235_v0 = vpop.f32.mrf.mxu1  ;;  %v3497_v25 = vpop.f32.mrf.mxu0 }
 0x1e0   : > { %v4240_v36 = vsel %vm7268_vm11, %v3921_v39, %v4784_v7  ;;  %v3946_v15 = vor.u32 %v3944_v32, %v3943_v45  ;;  %v3948_v57 = vrot.slane %v3943_v45, 4  ;;  %v3599_v62 = vadd.f32 %v5521_v3, %v3337_v44  ;;  %v4787_v7 = vld [vmem:[%s6989_s16 + $0x14] sm:$0x1] }
 0x1e1   : > { %4785 = vst [vmem:[%s6989_s16 + $0xc] sm:$0xf] %v4240_v36  ;;  %v3926_v1 = vrot.slane %v3924_v20, 7  ;;  %v3967_v17 = vshrl.u32 %v4872_v55, 16  ;;  %v3970_v35 = vshll.u32 %v4872_v55, 16  ;;  %v4870_v60 = vpack.c.bf16 %v3734_v43, %v3734_v43  ;;  %v5477_v29 = vpop.f32.mrf.mxu1  ;;  %v5525_v33 = vpop.f32.mrf.mxu0 }
 0x1e2   : > { %v3947_v18 = vsel %vm7281_vm12, %v3939_v10, %v3946_v15  ;;  %v4253_v56 = vsel %vm7288_vm13, %v3948_v57, %v4792_v30  ;;  %v3705_v32 = vadd.f32 %v7252_v59, %v3599_v62  ;;  %v3335_v42 = vadd.f32 %v3222_v47, %v7165_v34  ;;  %v4799_v10 = vld [vmem:[%s6989_s16 + $0x30] sm:$0xf]  ;;  %v4794_v62 = vld [vmem:[%s6989_s16 + $0x24] sm:$0xf] }
 0x1e3   : > { %4791 = vst [vmem:[%s6989_s16 + $0x1c] sm:$0xf] %v3947_v18  ;;  %4793 = vst [vmem:[%s6989_s16 + $0x20] sm:$0x1] %v4253_v56  ;;  %v3929_v3 = vor.u32 %v3927_v6, %v3926_v1  ;;  %v3931_v44 = vrot.slane %v3926_v1, 4  ;;  %v7305_v31 = vrot.slane %v3967_v17, 7  ;;  %v3238_v21 = vpop.f32.mrf.mxu1  ;;  %v3500_v39 = vpop.f32.mrf.mxu0  ;;  %v3340_v55 = vadd.f32 %v5476_v24, %v7168_v63 }
 0x1e4   : > { %v3950_v61 = vshrl.u32 %v4870_v60, 16  ;;  %v3953_v45 = vshll.u32 %v4870_v60, 16  ;;  %v3737_v20 = vmax.f32 %v3705_v32, 0.0  ;;  %v3597_v30 = vadd.f32 %v3484_v49, %v3335_v42 }
 0x1e5   : > { %v3930_v34 = vsel %vm7281_vm12, %v3922_v4, %v3929_v3  ;;  %v4246_v47 = vsel %vm7288_vm13, %v3931_v44, %v4787_v7  ;;  %v3972_v6 = vor.u32 %v3970_v35, %v7305_v31  ;;  %v3973_v43 = vrot.slane %v7305_v31, 4  ;;  %v5480_v36 = vpop.f32.mrf.mxu1  ;;  %v5528_v15 = vpop.f32.mrf.mxu0 }
 0x1e6   : > { %4786 = vst [vmem:[%s6989_s16 + $0x10] sm:$0xf] %v3930_v34  ;;  %4788 = vst [vmem:[%s6989_s16 + $0x14] sm:$0x1] %v4246_v47  ;;  %v7317_v57 = vrot.slane %v3950_v61, 7  ;;  %v4873_v49 = vpack.c.bf16 %v3737_v20, %v3737_v20  ;;  %v3703_v63 = vadd.f32 %v7252_v59, %v3597_v30  ;;  %v3602_v24 = vadd.f32 %v5524_v14, %v3340_v55 }
 0x1e7   : > { %v4263_v4 = vsel %vm7268_vm11, %v3972_v6, %v4799_v10  ;;  %v3338_v1 = vadd.f32 %v3235_v0, %v7171_v58  ;;  %v3341_v17 = vadd.f32 %v5477_v29, %v7174_v19  ;;  %v3339_v35 = vadd.f32 %v3238_v21, %v7177_v38  ;;  %v3251_v60 = vpop.f32.mrf.mxu1  ;;  %v7326_v18 = vpop.f32.mrf.mxu0  ;;  %v4802_v21 = vld [vmem:[%s6989_s16 + $0x38] sm:$0x1] }
 0x1e8   : > { %4800 = vst [vmem:[%s6989_s16 + $0x30] sm:$0xf] %v4263_v4  ;;  %v3955_v56 = vor.u32 %v3953_v45, %v7317_v57  ;;  %v3956_v14 = vrot.slane %v7317_v57, 4  ;;  %v3975_v7 = vshrl.u32 %v4873_v49, 16  ;;  %v3978_v32 = vshll.u32 %v4873_v49, 16 }
 0x1e9   : > { %v3735_v42 = vmax.f32 %v3703_v63, 0.0  ;;  %v3708_v3 = vadd.f32 %v7252_v59, %v3602_v24  ;;  %v3600_v58 = vadd.f32 %v3497_v25, %v3338_v1  ;;  %v3603_v0 = vadd.f32 %v5525_v33, %v3341_v17  ;;  %v7332_v19 = vpop.f32.mrf.mxu1  ;;  %v7334_v38 = vpop.f32.mrf.mxu0 }
 0x1ea   : > { %v4256_v29 = vsel %vm7268_vm11, %v3955_v56, %v4794_v62  ;;  %v3977_v44 = vrot.slane %v3975_v7, 7  ;;  %v3601_v31 = vadd.f32 %v3500_v39, %v3339_v35  ;;  %v3344_v61 = vadd.f32 %v5480_v36, %v7180_v22 }
 0x1eb   : > { %4795 = vst [vmem:[%s6989_s16 + $0x24] sm:$0xf] %v4256_v29  ;;  %v4871_v10 = vpack.c.bf16 %v3735_v42, %v3735_v42  ;;  %v3740_v45 = vmax.f32 %v3708_v3, 0.0  ;;  %v3706_v20 = vadd.f32 %v7252_v59, %v3600_v58  ;;  %v3709_v25 = vadd.f32 %v7252_v59, %v3603_v0  ;;  %v7343_v33 = vpop.f32.mrf.mxu1  ;;  %v7345_v30 = vpop.f32.mrf.mxu0  ;;  %v4797_v42 = vld [vmem:[%s6989_s16 + $0x2c] sm:$0x1] }
 0x1ec   : > { %v3980_v55 = vor.u32 %v3978_v32, %v3977_v44  ;;  %v3982_v34 = vrot.slane %v3977_v44, 4  ;;  %v3707_v39 = vadd.f32 %v7252_v59, %v3601_v31  ;;  %v3606_v47 = vadd.f32 %v5528_v15, %v3344_v61 }
 0x1ed   : > { %v3958_v22 = vshrl.u32 %v4871_v10, 16  ;;  %v3961_v6 = vshll.u32 %v4871_v10, 16  ;;  %v4876_v36 = vpack.c.bf16 %v3740_v45, %v3740_v45  ;;  %v3738_v57 = vmax.f32 %v3706_v20, 0.0  ;;  %v7348_v49 = vpop.f32.mrf.mxu1  ;;  %v7350_v63 = vpop.f32.mrf.mxu0  ;;  %v4809_v45 = vld [vmem:[%s6989_s16 + $0x48] sm:$0xf] }
 0x1ee   : > { %v3981_v24 = vsel %vm7281_vm12, %v3973_v43, %v3980_v55  ;;  %v4267_v4 = vsel %vm7288_vm13, %v3982_v34, %v4802_v21  ;;  %v3741_v62 = vmax.f32 %v3709_v25, 0.0  ;;  %v3739_v1 = vmax.f32 %v3707_v39, 0.0 }
 0x1ef   : > { %4801 = vst [vmem:[%s6989_s16 + $0x34] sm:$0xf] %v3981_v24  ;;  %4803 = vst [vmem:[%s6989_s16 + $0x38] sm:$0x1] %v4267_v4  ;;  %v3960_v15 = vrot.slane %v3958_v22, 7  ;;  %v4001_v17 = vshrl.u32 %v4876_v36, 16  ;;  %v4874_v56 = vpack.c.bf16 %v3738_v57, %v3738_v57  ;;  %v7358_v7 = vpop.f32.mrf.mxu1  ;;  %v7360_v32 = vpop.f32.mrf.mxu0  ;;  %v3712_v43 = vadd.f32 %v7252_v59, %v3606_v47 }
 0x1f0   : > { %v4004_v35 = vshll.u32 %v4876_v36, 16  ;;  %v4877_v3 = vpack.c.bf16 %v3741_v62, %v3741_v62  ;;  %v4875_v58 = vpack.c.bf16 %v3739_v1, %v3739_v1  ;;  %v3342_v0 = vadd.f32 %v3251_v60, %v7183_v16  ;;  %v4812_v1 = vld [vmem:[%s6989_s16 + $0x50] sm:$0x1] }
 0x1f1   : > { %v3963_v29 = vor.u32 %v3961_v6, %v3960_v15  ;;  %v3965_v44 = vrot.slane %v3960_v15, 4  ;;  %v4003_v31 = vrot.slane %v4001_v17, 7  ;;  %v3984_v61 = vshrl.u32 %v4874_v56, 16  ;;  %v5485_v21 = vpop.f32.mrf.mxu1  ;;  %v7365_v10 = vpop.f32.mrf.mxu0 }
 0x1f2   : > { %v3987_v20 = vshll.u32 %v4874_v56, 16  ;;  %v4009_v25 = vshrl.u32 %v4877_v3, 16  ;;  %v4012_v55 = vshll.u32 %v4877_v3, 16  ;;  %v3992_v34 = vshrl.u32 %v4875_v58, 16 }
 0x1f3   : > { %v3964_v39 = vsel %vm7281_vm12, %v3956_v14, %v3963_v29  ;;  %v4260_v16 = vsel %vm7288_vm13, %v3965_v44, %v4797_v42  ;;  %v4006_v60 = vor.u32 %v4004_v35, %v4003_v31  ;;  %v4007_v47 = vrot.slane %v4003_v31, 4  ;;  %v3270_v22 = vpop.f32.mrf.mxu1  ;;  %v7372_v6 = vpop.f32.mrf.mxu0  ;;  %v4804_v14 = vld [vmem:[%s6989_s16 + $0x3c] sm:$0xf]  ;;  %v4807_v44 = vld [vmem:[%s6989_s16 + $0x44] sm:$0x1] }
 0x1f4   : > { %4796 = vst [vmem:[%s6989_s16 + $0x28] sm:$0xf] %v3964_v39  ;;  %4798 = vst [vmem:[%s6989_s16 + $0x2c] sm:$0x1] %v4260_v16  ;;  %v3986_v36 = vrot.slane %v3984_v61, 7  ;;  %v4011_v57 = vrot.slane %v4009_v25, 7  ;;  %v3604_v17 = vadd.f32 %v7326_v18, %v3342_v0  ;;  %v3345_v35 = vadd.f32 %v7332_v19, %v7186_v48 }
 0x1f5   : > { %v3994_v24 = vrot.slane %v3992_v34, 7  ;;  %v3995_v4 = vshll.u32 %v4875_v58, 16  ;;  %v4277_v62 = vsel %vm7268_vm11, %v4006_v60, %v4809_v45  ;;  %v3744_v15 = vmax.f32 %v3712_v43, 0.0  ;;  %v7383_v56 = vpop.f32.mrf.mxu1  ;;  %v7387_v31 = vpop.f32.mrf.mxu0 }
 0x1f6   : > { %4810 = vst [vmem:[%s6989_s16 + $0x48] sm:$0xf] %v4277_v62  ;;  %v3989_v42 = vor.u32 %v3987_v20, %v3986_v36  ;;  %v3990_v3 = vrot.slane %v3986_v36, 4  ;;  %v4014_v58 = vor.u32 %v4012_v55, %v4011_v57  ;;  %v4016_v29 = vrot.slane %v4011_v57, 4 }
 0x1f7   : > { %v3997_v61 = vor.u32 %v3995_v4, %v3994_v24  ;;  %v3999_v43 = vrot.slane %v3994_v24, 4  ;;  %v4880_v18 = vpack.c.bf16 %v3744_v15, %v3744_v15  ;;  %v3710_v48 = vadd.f32 %v7252_v59, %v3604_v17  ;;  %v7390_v19 = vpop.f32.mrf.mxu1  ;;  %v7415_v24 = vpop.f32.mrf.mxu0  ;;  %v4819_v15 = vld [vmem:[%s6989_s16 + $0x60] sm:$0xf] }
 0x1f8   : > { %v4270_v0 = vsel %vm7268_vm11, %v3989_v42, %v4804_v14  ;;  %v4015_v45 = vsel %vm7281_vm12, %v4007_v47, %v4014_v58  ;;  %v4281_v20 = vsel %vm7288_vm13, %v4016_v29, %v4812_v1  ;;  %v3607_v25 = vadd.f32 %v7334_v38, %v3345_v35 }
 0x1f9   : > { %4805 = vst [vmem:[%s6989_s16 + $0x3c] sm:$0xf] %v4270_v0  ;;  %4811 = vst [vmem:[%s6989_s16 + $0x4c] sm:$0xf] %v4015_v45  ;;  %v3998_v55 = vsel %vm7281_vm12, %v3990_v3, %v3997_v61  ;;  %v4274_v34 = vsel %vm7288_vm13, %v3999_v43, %v4807_v44  ;;  %v4035_v39 = vshrl.u32 %v4880_v18, 16  ;;  %v4038_v16 = vshll.u32 %v4880_v18, 16  ;;  %v7406_v60 = vpop.f32.mrf.mxu1 }
 0x1fa   : > { %4813 = vst [vmem:[%s6989_s16 + $0x50] sm:$0x1] %v4281_v20  ;;  %4806 = vst [vmem:[%s6989_s16 + $0x40] sm:$0xf] %v3998_v55  ;;  %v3742_v47 = vmax.f32 %v3710_v48, 0.0  ;;  %v3713_v36 = vadd.f32 %v7252_v59, %v3607_v25  ;;  %v3343_v38 = vadd.f32 %v7343_v33, %v7189_v11  ;;  %v3348_v57 = vadd.f32 %v7348_v49, %v7192_v41 }
 0x1fb   : > { %4808 = vst [vmem:[%s6989_s16 + $0x44] sm:$0x1] %v4274_v34  ;;  %v4037_v4 = vrot.slane %v4035_v39, 7  ;;  %v3346_v62 = vadd.f32 %v7358_v7, %v7195_v53  ;;  %v3349_v14 = vadd.f32 %v5485_v21, %v7198_v27  ;;  %v3347_v1 = vadd.f32 %v3270_v22, %v7201_v28  ;;  %v7426_v53 = vpop.f32.mrf.mxu1  ;;  %v7429_v22 = vpop.f32.mrf.mxu0  ;;  %v4814_v43 = vld [vmem:[%s6989_s16 + $0x54] sm:$0xf] }
 0x1fc   : > { %v4878_v17 = vpack.c.bf16 %v3742_v47, %v3742_v47  ;;  %v3745_v35 = vmax.f32 %v3713_v36, 0.0  ;;  %v3605_v42 = vadd.f32 %v7345_v30, %v3343_v38  ;;  %v3610_v11 = vadd.f32 %v7350_v63, %v3348_v57  ;;  %v4822_v47 = vld [vmem:[%s6989_s16 + $0x68] sm:$0x1] }
 0x1fd   : > { %v4040_v33 = vor.u32 %v4038_v16, %v4037_v4  ;;  %v4041_v41 = vrot.slane %v4037_v4, 4  ;;  %v3608_v49 = vadd.f32 %v7360_v32, %v3346_v62  ;;  %v3611_v3 = vadd.f32 %v7365_v10, %v3349_v14  ;;  %v7439_v20 = vpop.f32.mrf.mxu1  ;;  %v7441_v16 = vpop.f32.mrf.mxu0 }
 0x1fe   : > { %v4018_v27 = vshrl.u32 %v4878_v17, 16  ;;  %v4021_v7 = vshll.u32 %v4878_v17, 16  ;;  %v4881_v28 = vpack.c.bf16 %v3745_v35, %v3745_v35  ;;  %v3711_v21 = vadd.f32 %v7252_v59, %v3605_v42 }
 0x1ff   : > { %v4291_v30 = vsel %vm7268_vm11, %v4040_v33, %v4819_v15  ;;  %v3716_v63 = vadd.f32 %v7252_v59, %v3610_v11  ;;  %v3714_v58 = vadd.f32 %v7252_v59, %v3608_v49  ;;  %v3717_v32 = vadd.f32 %v7252_v59, %v3611_v3  ;;  %v3299_v11 = vpop.f32.mrf.mxu1 }
 0x200   : > { %4820 = vst [vmem:[%s6989_s16 + $0x60] sm:$0xf] %v4291_v30  ;;  %v4020_v10 = vrot.slane %v4018_v27, 7  ;;  %v4043_v29 = vshrl.u32 %v4881_v28, 16  ;;  %v4046_v44 = vshll.u32 %v4881_v28, 16  ;;  %v3743_v61 = vmax.f32 %v3711_v21, 0.0 }
 0x201   : > { %v3748_v18 = vmax.f32 %v3716_v63, 0.0  ;;  %v3746_v48 = vmax.f32 %v3714_v58, 0.0  ;;  %v3749_v0 = vmax.f32 %v3717_v32, 0.0  ;;  %v3609_v45 = vadd.f32 %v7372_v6, %v3347_v1  ;;  %v4817_v28 = vld [vmem:[%s6989_s16 + $0x5c] sm:$0x1] }
 0x202   : > { %v4023_v25 = vor.u32 %v4021_v7, %v4020_v10  ;;  %v4024_v55 = vrot.slane %v4020_v10, 4  ;;  %v4045_v34 = vrot.slane %v4043_v29, 7  ;;  %v4879_v39 = vpack.c.bf16 %v3743_v61, %v3743_v61  ;;  %v5540_v7 = vpop.f32.mrf.mxu0  ;;  %v4829_v29 = vld [vmem:[%s6989_s16 + $0x78] sm:$0xf] }
 0x203   : > { %v4884_v36 = vpack.c.bf16 %v3748_v18, %v3748_v18  ;;  %v4882_v38 = vpack.c.bf16 %v3746_v48, %v3746_v48  ;;  %v4885_v57 = vpack.c.bf16 %v3749_v0, %v3749_v0  ;;  %v3715_v4 = vadd.f32 %v7252_v59, %v3609_v45  ;;  %v5493_v45 = vpop.f32.mrf.mxu1 }
 0x204   : > { %v4284_v62 = vsel %vm7268_vm11, %v4023_v25, %v4814_v43  ;;  %v4048_v6 = vor.u32 %v4046_v44, %v4045_v34  ;;  %v4050_v14 = vrot.slane %v4045_v34, 4  ;;  %v4026_v1 = vshrl.u32 %v4879_v39, 16  ;;  %v4824_v44 = vld [vmem:[%s6989_s16 + $0x6c] sm:$0xf] }
 0x205   : > { %4815 = vst [vmem:[%s6989_s16 + $0x54] sm:$0xf] %v4284_v62  ;;  %v4029_v15 = vshll.u32 %v4879_v39, 16  ;;  %v4069_v17 = vshrl.u32 %v4884_v36, 16  ;;  %v4072_v35 = vshll.u32 %v4884_v36, 16  ;;  %v4052_v42 = vshrl.u32 %v4882_v38, 16  ;;  %v3561_v36 = vpop.f32.mrf.mxu0 }
 0x206   : > { %v4049_v33 = vsel %vm7281_vm12, %v4041_v41, %v4048_v6  ;;  %v4295_v49 = vsel %vm7288_vm13, %v4050_v14, %v4822_v47  ;;  %v4028_v3 = vrot.slane %v4026_v1, 7  ;;  %v4055_v27 = vshll.u32 %v4882_v38, 16  ;;  %v4832_v38 = vld [vmem:[%s6989_s16 + $0x80] sm:$0x1] }
 0x207   : > { %4821 = vst [vmem:[%s6989_s16 + $0x64] sm:$0xf] %v4049_v33  ;;  %4823 = vst [vmem:[%s6989_s16 + $0x68] sm:$0x1] %v4295_v49  ;;  %v4071_v21 = vrot.slane %v4069_v17, 7  ;;  %v4054_v30 = vrot.slane %v4052_v42, 7  ;;  %v3352_v61 = vadd.f32 %v7383_v56, %v7204_v46  ;;  %v3353_v17 = vadd.f32 %v7406_v60, %v7210_v50  ;;  %v5541_v49 = vpop.f32.mrf.mxu0 }
 0x208   : > { %v4077_v63 = vshrl.u32 %v4885_v57, 16  ;;  %v4080_v58 = vshll.u32 %v4885_v57, 16  ;;  %v4031_v32 = vor.u32 %v4029_v15, %v4028_v3  ;;  %v4033_v10 = vrot.slane %v4028_v3, 4 }
 0x209   : > { %v3747_v41 = vmax.f32 %v3715_v4, 0.0  ;;  %v4074_v43 = vor.u32 %v4072_v35, %v4071_v21  ;;  %v4075_v18 = vrot.slane %v4071_v21, 4  ;;  %v4057_v48 = vor.u32 %v4055_v27, %v4054_v30 }
 0x20a   : > { %v4058_v0 = vrot.slane %v4054_v30, 4  ;;  %v4032_v25 = vsel %vm7281_vm12, %v4024_v55, %v4031_v32  ;;  %v4288_v34 = vsel %vm7288_vm13, %v4033_v10, %v4817_v28  ;;  %v4079_v39 = vrot.slane %v4077_v63, 7 }
 0x20b   : > { %v4883_v47 = vpack.c.bf16 %v3747_v41, %v3747_v41  ;;  %4816 = vst [vmem:[%s6989_s16 + $0x58] sm:$0xf] %v4032_v25  ;;  %4818 = vst [vmem:[%s6989_s16 + $0x5c] sm:$0x1] %v4288_v34  ;;  %v4305_v46 = vsel %vm7268_vm11, %v4074_v43, %v4829_v29  ;;  %v4298_v56 = vsel %vm7268_vm11, %v4057_v48, %v4824_v44 }
 0x20c   : > { %v3614_v57 = vadd.f32 %v7387_v31, %v3352_v61  ;;  %v3350_v55 = vadd.f32 %v7390_v19, %v7207_v52  ;;  %4830 = vst [vmem:[%s6989_s16 + $0x78] sm:$0xf] %v4305_v46  ;;  %4825 = vst [vmem:[%s6989_s16 + $0x6c] sm:$0xf] %v4298_v56  ;;  %v4082_v4 = vor.u32 %v4080_v58, %v4079_v39  ;;  %v4084_v62 = vrot.slane %v4079_v39, 4  ;;  %v7481_v52 = vpop.f32.mrf.mxu1 }
 0x20d   : > { %v4060_v6 = vshrl.u32 %v4883_v47, 16  ;;  %v4063_v14 = vshll.u32 %v4883_v47, 16  ;;  %v3351_v31 = vadd.f32 %v7426_v53, %v7213_v8  ;;  %v3356_v33 = vadd.f32 %v7439_v20, %v7216_v51  ;;  %v4839_v39 = vld [vmem:[%s6989_s16 + $0x90] sm:$0xf] }
 0x20e   : > { %v3720_v1 = vadd.f32 %v7252_v59, %v3614_v57  ;;  %v3612_v15 = vadd.f32 %v7415_v24, %v3350_v55  ;;  %v4083_v19 = vsel %vm7281_vm12, %v4075_v18, %v4082_v4  ;;  %v4309_v35 = vsel %vm7288_vm13, %v4084_v62, %v4832_v38  ;;  %v4827_v24 = vld [vmem:[%s6989_s16 + $0x74] sm:$0x1]  ;;  %v7498_v58 = vpop.f32.mrf.mxu1 }
 0x20f   : > { %v4062_v42 = vrot.slane %v4060_v6, 7  ;;  %4831 = vst [vmem:[%s6989_s16 + $0x7c] sm:$0xf] %v4083_v19  ;;  %4833 = vst [vmem:[%s6989_s16 + $0x80] sm:$0x1] %v4309_v35  ;;  %v3615_v8 = vadd.f32 %v7429_v22, %v3353_v17  ;;  %v3613_v53 = vadd.f32 %v7441_v16, %v3351_v31  ;;  %v3618_v28 = vadd.f32 %v5540_v7, %v3356_v33  ;;  %v7505_v7 = vpop.f32.mrf.mxu0 }
 0x210   : > { %v3752_v50 = vmax.f32 %v3720_v1, 0.0  ;;  %v3718_v60 = vadd.f32 %v7252_v59, %v3612_v15  ;;  %v3354_v21 = vadd.f32 %v3299_v11, %v7219_v40  ;;  %v3357_v43 = vadd.f32 %v5493_v45, %v7222_v37  ;;  %v3315_v34 = vpop.f32.mrf.mxu1  ;;  %v4834_v37 = vld [vmem:[%s6989_s16 + $0x84] sm:$0xf] }
 0x211   : > { %v4065_v3 = vor.u32 %v4063_v14, %v4062_v42  ;;  %v4067_v27 = vrot.slane %v4062_v42, 4  ;;  %v3721_v20 = vadd.f32 %v7252_v59, %v3615_v8  ;;  %v3719_v63 = vadd.f32 %v7252_v59, %v3613_v53  ;;  %v5544_v38 = vpop.f32.mrf.mxu0  ;;  %v4842_v42 = vld [vmem:[%s6989_s16 + $0x98] sm:$0x1] }
 0x212   : > { %v4888_v30 = vpack.c.bf16 %v3752_v50, %v3752_v50  ;;  %v3750_v51 = vmax.f32 %v3718_v60, 0.0  ;;  %v3724_v32 = vadd.f32 %v7252_v59, %v3618_v28  ;;  %v3616_v10 = vadd.f32 %v3561_v36, %v3354_v21  ;;  %v5497_v35 = vpop.f32.mrf.mxu1  ;;  %v4849_v28 = vld [vmem:[%s6989_s16 + $0xa8] sm:$0xf] }
 0x213   : > { %v4066_v22 = vsel %vm7281_vm12, %v4058_v0, %v4065_v3  ;;  %v4302_v16 = vsel %vm7288_vm13, %v4067_v27, %v4827_v24  ;;  %v3753_v29 = vmax.f32 %v3721_v20, 0.0  ;;  %v3751_v44 = vmax.f32 %v3719_v63, 0.0  ;;  %v3577_v60 = vpop.f32.mrf.mxu0  ;;  %v4837_v27 = vld [vmem:[%s6989_s16 + $0x8c] sm:$0x1] }
 0x214   : > { %4826 = vst [vmem:[%s6989_s16 + $0x70] sm:$0xf] %v4066_v22  ;;  %4828 = vst [vmem:[%s6989_s16 + $0x74] sm:$0x1] %v4302_v16  ;;  %v4103_v40 = vshrl.u32 %v4888_v30, 16  ;;  %v4886_v11 = vpack.c.bf16 %v3750_v51, %v3750_v51  ;;  %v3756_v41 = vmax.f32 %v3724_v32, 0.0  ;;  %v3722_v61 = vadd.f32 %v7252_v59, %v3616_v10 }
 0x215   : > { %v4106_v48 = vshll.u32 %v4888_v30, 16  ;;  %v4889_v25 = vpack.c.bf16 %v3753_v29, %v3753_v29  ;;  %v4887_v36 = vpack.c.bf16 %v3751_v44, %v3751_v44  ;;  %v3619_v62 = vadd.f32 %v5541_v49, %v3357_v43 }
 0x216   : > { %v4105_v18 = vrot.slane %v4103_v40, 7  ;;  %v4086_v0 = vshrl.u32 %v4886_v11, 16  ;;  %v4089_v47 = vshll.u32 %v4886_v11, 16  ;;  %v4892_v46 = vpack.c.bf16 %v3756_v41, %v3756_v41  ;;  %v3318_v40 = vpop.f32.mrf.mxu1 }
 0x217   : > { %v3754_v56 = vmax.f32 %v3722_v61, 0.0  ;;  %v4111_v4 = vshrl.u32 %v4889_v25, 16  ;;  %v4114_v45 = vshll.u32 %v4889_v25, 16  ;;  %v4094_v14 = vshrl.u32 %v4887_v36, 16  ;;  %v5545_v61 = vpop.f32.mrf.mxu0  ;;  %v4844_v25 = vld [vmem:[%s6989_s16 + $0x9c] sm:$0xf] }
 0x218   : > { %v4108_v57 = vor.u32 %v4106_v48, %v4105_v18  ;;  %v4088_v55 = vrot.slane %v4086_v0, 7  ;;  %v4109_v6 = vrot.slane %v4105_v18, 4  ;;  %v4137_v1 = vshrl.u32 %v4892_v46, 16 }
 0x219   : > { %v4113_v31 = vrot.slane %v4111_v4, 7  ;;  %v4097_v19 = vshll.u32 %v4887_v36, 16  ;;  %v4096_v33 = vrot.slane %v4094_v14, 7  ;;  %v4140_v49 = vshll.u32 %v4892_v46, 16  ;;  %v3580_v4 = vpop.f32.mrf.mxu0 }
 0x21a   : > { %v4319_v15 = vsel %vm7268_vm11, %v4108_v57, %v4839_v39  ;;  %v4091_v17 = vor.u32 %v4089_v47, %v4088_v55  ;;  %v7517_v24 = vrot.slane %v4137_v1, 7  ;;  %v4890_v50 = vpack.c.bf16 %v3754_v56, %v3754_v56 }
 0x21b   : > { %4840 = vst [vmem:[%s6989_s16 + $0x90] sm:$0xf] %v4319_v15  ;;  %v4116_v53 = vor.u32 %v4114_v45, %v4113_v31  ;;  %v4118_v3 = vrot.slane %v4113_v31, 4  ;;  %v3725_v21 = vadd.f32 %v7252_v59, %v3619_v62  ;;  %v4092_v30 = vrot.slane %v4088_v55, 4 }
 0x21c   : > { %v4312_v8 = vsel %vm7268_vm11, %v4091_v17, %v4834_v37  ;;  %v4099_v51 = vor.u32 %v4097_v19, %v4096_v33  ;;  %v4101_v20 = vrot.slane %v4096_v33, 4  ;;  %v4142_v63 = vor.u32 %v4140_v49, %v7517_v24 }
 0x21d   : > { %4835 = vst [vmem:[%s6989_s16 + $0x84] sm:$0xf] %v4312_v8  ;;  %v4117_v22 = vsel %vm7281_vm12, %v4109_v6, %v4116_v53  ;;  %v4323_v16 = vsel %vm7288_vm13, %v4118_v3, %v4842_v42  ;;  %v4120_v32 = vshrl.u32 %v4890_v50, 16  ;;  %v4123_v10 = vshll.u32 %v4890_v50, 16  ;;  %v4852_v6 = vld [vmem:[%s6989_s16 + $0xb0] sm:$0x1] }
 0x21e   : > { %4841 = vst [vmem:[%s6989_s16 + $0x94] sm:$0xf] %v4117_v22  ;;  %4843 = vst [vmem:[%s6989_s16 + $0x98] sm:$0x1] %v4323_v16  ;;  %v4100_v11 = vsel %vm7281_vm12, %v4092_v30, %v4099_v51  ;;  %v4316_v29 = vsel %vm7288_vm13, %v4101_v20, %v4837_v27  ;;  %v4333_v44 = vsel %vm7268_vm11, %v4142_v63, %v4849_v28  ;;  %v3757_v41 = vmax.f32 %v3725_v21, 0.0 }
 0x21f   : > { %4836 = vst [vmem:[%s6989_s16 + $0x88] sm:$0xf] %v4100_v11  ;;  %4838 = vst [vmem:[%s6989_s16 + $0x8c] sm:$0x1] %v4316_v29  ;;  %v7541_v43 = vrot.slane %v4120_v32, 7  ;;  %v3355_v18 = vadd.f32 %v7481_v52, %v7225_v26  ;;  %v3360_v48 = vadd.f32 %v7498_v58, %v7230_v13  ;;  %v3358_v0 = vadd.f32 %v3315_v34, %v7235_v9 }
 0x220   : > { %4850 = vst [vmem:[%s6989_s16 + $0xa8] sm:$0xf] %v4333_v44  ;;  %v4893_v39 = vpack.c.bf16 %v3757_v41, %v3757_v41  ;;  %v3361_v47 = vadd.f32 %v5497_v35, %v7241_v2  ;;  %v3359_v36 = vadd.f32 %v3318_v40, %v7247_v12  ;;  %v4847_v28 = vld [vmem:[%s6989_s16 + $0xa4] sm:$0x1]  ;;  %v4859_v20 = vld [vmem:[%s6989_s16 + $0xc0] sm:$0xf] }
 0x221   : > { %v4125_v46 = vor.u32 %v4123_v10, %v7541_v43  ;;  %v3617_v56 = vadd.f32 %v7505_v7, %v3355_v18  ;;  %v3622_v57 = vadd.f32 %v5544_v38, %v3360_v48  ;;  %v3620_v26 = vadd.f32 %v3577_v60, %v3358_v0  ;;  %v4854_v44 = vld [vmem:[%s6989_s16 + $0xb4] sm:$0xf]  ;;  %v4862_v41 = vld [vmem:[%s6989_s16 + $0xc8] sm:$0x1] }
 0x222   : > { %v4145_v55 = vshrl.u32 %v4893_v39, 16  ;;  %v3623_v52 = vadd.f32 %v5545_v61, %v3361_v47  ;;  %v3621_v2 = vadd.f32 %v3580_v4, %v3359_v36  ;;  %v4148_v34 = vshll.u32 %v4893_v39, 16 }
 0x223   : > { %v4326_v13 = vsel %vm7268_vm11, %v4125_v46, %v4844_v25  ;;  %v3723_v9 = vadd.f32 %v7252_v59, %v3617_v56  ;;  %v3728_v58 = vadd.f32 %v7252_v59, %v3622_v57  ;;  %v3726_v62 = vadd.f32 %v7252_v59, %v3620_v26  ;;  %v4857_v26 = vld [vmem:[%s6989_s16 + $0xbc] sm:$0x1] }
 0x224   : > { %4845 = vst [vmem:[%s6989_s16 + $0x9c] sm:$0xf] %v4326_v13  ;;  %v4147_v12 = vrot.slane %v4145_v55, 7  ;;  %v3729_v7 = vadd.f32 %v7252_v59, %v3623_v52  ;;  %v4143_v38 = vrot.slane %v7517_v24, 4  ;;  %v3727_v14 = vadd.f32 %v7252_v59, %v3621_v2 }
 0x225   : > { %v3755_v37 = vmax.f32 %v3723_v9, 0.0  ;;  %v3760_v45 = vmax.f32 %v3728_v58, 0.0  ;;  %v3758_v17 = vmax.f32 %v3726_v62, 0.0  ;;  %v4126_v10 = vrot.slane %v7541_v43, 4 }
 0x226   : > { %v4150_v1 = vor.u32 %v4148_v34, %v4147_v12  ;;  %v4152_v15 = vrot.slane %v4147_v12, 4  ;;  %v3761_v31 = vmax.f32 %v3729_v7, 0.0  ;;  %v3759_v42 = vmax.f32 %v3727_v14, 0.0 }
 0x227   : > { %v4891_v19 = vpack.c.bf16 %v3755_v37, %v3755_v37  ;;  %v4896_v35 = vpack.c.bf16 %v3760_v45, %v3760_v45  ;;  %v4894_v49 = vpack.c.bf16 %v3758_v17, %v3758_v17 }
 0x228   : > { %v4151_v33 = vsel %vm7281_vm12, %v4143_v38, %v4150_v1  ;;  %v4337_v24 = vsel %vm7288_vm13, %v4152_v15, %v4852_v6  ;;  %v4897_v50 = vpack.c.bf16 %v3761_v31, %v3761_v31  ;;  %v4895_v51 = vpack.c.bf16 %v3759_v42, %v3759_v42 }
 0x229   : > { %4851 = vst [vmem:[%s6989_s16 + $0xac] sm:$0xf] %v4151_v33  ;;  %4853 = vst [vmem:[%s6989_s16 + $0xb0] sm:$0x1] %v4337_v24  ;;  %v4128_v59 = vshrl.u32 %v4891_v19, 16  ;;  %v4171_v60 = vshrl.u32 %v4896_v35, 16 }
 0x22a   : > { %v4131_v8 = vshll.u32 %v4891_v19, 16  ;;  %v4154_v53 = vshrl.u32 %v4894_v49, 16  ;;  %v4179_v3 = vshrl.u32 %v4897_v50, 16  ;;  %v4174_v30 = vshll.u32 %v4896_v35, 16 }
 0x22b   : > { %v4130_v27 = vrot.slane %v4128_v59, 7  ;;  %v4173_v21 = vrot.slane %v4171_v60, 7  ;;  %v4157_v22 = vshll.u32 %v4894_v49, 16  ;;  %v4182_v32 = vshll.u32 %v4897_v50, 16 }
 0x22c   : > { %v4156_v63 = vrot.slane %v4154_v53, 7  ;;  %v4181_v16 = vrot.slane %v4179_v3, 7  ;;  %v4162_v47 = vshrl.u32 %v4895_v51, 16  ;;  %v4165_v55 = vshll.u32 %v4895_v51, 16 }
 0x22d   : > { %v4133_v40 = vor.u32 %v4131_v8, %v4130_v27  ;;  %v4135_v11 = vrot.slane %v4130_v27, 4  ;;  %v4176_v29 = vor.u32 %v4174_v30, %v4173_v21  ;;  %v4177_v61 = vrot.slane %v4173_v21, 4 }
 0x22e   : > { %v4159_v18 = vor.u32 %v4157_v22, %v4156_v63  ;;  %v4184_v48 = vor.u32 %v4182_v32, %v4181_v16  ;;  %v4186_v0 = vrot.slane %v4181_v16, 4  ;;  %v4164_v57 = vrot.slane %v4162_v47, 7 }
 0x22f   : > { %v4134_v25 = vsel %vm7281_vm12, %v4126_v10, %v4133_v40  ;;  %v4330_v43 = vsel %vm7288_vm13, %v4135_v11, %v4847_v28  ;;  %v4347_v39 = vsel %vm7268_vm11, %v4176_v29, %v4859_v20  ;;  %v4160_v52 = vrot.slane %v4156_v63, 4 }
 0x230   : > { %4846 = vst [vmem:[%s6989_s16 + $0xa0] sm:$0xf] %v4134_v25  ;;  %4848 = vst [vmem:[%s6989_s16 + $0xa4] sm:$0x1] %v4330_v43  ;;  %v4340_v36 = vsel %vm7268_vm11, %v4159_v18, %v4854_v44  ;;  %v4185_v46 = vsel %vm7281_vm12, %v4177_v61, %v4184_v48  ;;  %v4351_v56 = vsel %vm7288_vm13, %v4186_v0, %v4862_v41  ;;  %v4169_v13 = vrot.slane %v4164_v57, 4 }
 0x231   : > { %4860 = vst [vmem:[%s6989_s16 + $0xc0] sm:$0xf] %v4347_v39  ;;  %4855 = vst [vmem:[%s6989_s16 + $0xb4] sm:$0xf] %v4340_v36  ;;  %v4167_v4 = vor.u32 %v4165_v55, %v4164_v57 }
 0x232   : > { %4861 = vst [vmem:[%s6989_s16 + $0xc4] sm:$0xf] %v4185_v46  ;;  %4863 = vst [vmem:[%s6989_s16 + $0xc8] sm:$0x1] %v4351_v56  ;;  %v4344_v9 = vsel %vm7288_vm13, %v4169_v13, %v4857_v26 }
 0x233   : > { %v4168_v54 = vsel %vm7281_vm12, %v4160_v52, %v4167_v4  ;;  %4858 = vst [vmem:[%s6989_s16 + $0xbc] sm:$0x1] %v4344_v9 }
 0x234   : > { %4856 = vst [vmem:[%s6989_s16 + $0xb8] sm:$0xf] %v4168_v54 }
 0x235 PF: > { %s13_s14 = sadd.s32 1, %s5704_s14   ;;  %s7660_s12 = smov %s5700_s13 }
 0x236   : > { %p10_p5 = scmp.ge.s32.totalorder %s13_s14, 4   ;;  %s7661_s13 = smov %s7663_s15 }
 0x238   :  { %12 = sbr.rel (!%p10_p5) target bundleno = 2 (0x2), region = 85 }

</bundles_post_ra>
